<compile_context>
chip_gen: v7x
topology: tpu7x:2x2x1
jax: 0.10.0
libtpu: 0.0.40
codegen_flags: <defaults>
</compile_context>

<pallas_src>
import jax
import jax.numpy as jnp
from jax.experimental import pallas as pl
from jax.experimental.pallas import tpu as pltpu

# ---------------- model hyper-params (small, synthetic) ----------------
B = 2            # batch
S = 8            # sequence length
H = 32           # hidden_size
NH = 4           # attention heads
HD = H // NH     # head dim
F = 4 * H        # FFN intermediate size
A = 8            # adapter bottleneck size
L = 2            # number of encoder layers
C = 5            # num_class
VOCAB = 100
LN_EPS = 1e-5

# lane-aligned packing for the fused QKV projection: q / k / v segments each
# start on a 128-lane tile boundary so the post-matmul split is a free subview
SEG = 128
QOFF, KOFF, VOFF = 0 * SEG, 1 * SEG, 2 * SEG
QKV_COLS = 3 * SEG
# classifier logits padded to one full lane tile (lane-dense store)
C_PAD = 128

LAYER_PARAM_ORDER = ("wqkv", "bqkv", "wo", "bo", "w1", "b1", "w2", "b2",
                     "wad1", "bad1", "wau1", "bau1", "wad2", "bad2",
                     "wau2", "bau2", "ln1_g", "ln1_b", "ln2_g", "ln2_b")


def _ln(x, g, b, eps=LN_EPS):
    mu = jnp.mean(x, axis=-1, keepdims=True)
    var = jnp.mean((x - mu) ** 2, axis=-1, keepdims=True)
    return (x - mu) * jax.lax.rsqrt(var + eps) * g + b


# ---------------- the single fused Pallas kernel ----------------
def fused_kernel(x_ref, amask_ref,
                 wqkv_ref, bqkv_ref, wo_ref, bo_ref,
                 w1_ref, b1_ref, w2_ref, b2_ref,
                 wad1_ref, bad1_ref, wau1_ref, bau1_ref,
                 wad2_ref, bad2_ref, wau2_ref, bau2_ref,
                 ln1g_ref, ln1b_ref, ln2g_ref, ln2b_ref,
                 wd1_ref, bd1_ref, wd2_ref, bd2_ref,
                 out_ref):
    x = x_ref[...]                      # (B*S, H) f32
    amask = amask_ref[...]              # (NH*B, 1, S) additive mask (0 / -1e9), f32

    # TODO(synk): for real RoBERTa dims (L=12/24, H=768/1024) switch this
    # static unroll to a grid axis with BlockSpec-pipelined per-layer weights
    # (plus a batch-parallel axis / core_map to use both v7x TensorCores).
    # At L=2 and B*S=16 the grid-step overhead would exceed the work.
    for l in range(L):
        # ---- fused QKV projection (q/k/v segments 128-lane aligned) ----
        qkv = jnp.dot(x, wqkv_ref[l],
                      preferred_element_type=jnp.float32) + bqkv_ref[l]
        q = qkv[:, QOFF:QOFF + H].reshape(B, S, H)   # 1/sqrt(HD) folded into wq/bq
        k = qkv[:, KOFF:KOFF + H].reshape(B, S, H)
        v = qkv[:, VOFF:VOFF + H].reshape(B, S, H)

        # ---- multi-head attention: all heads in one batched einsum + one
        #      softmax chain (heads stacked into the leading batch axis) ----
        q_h = jnp.concatenate([q[:, :, n * HD:(n + 1) * HD] for n in range(NH)], axis=0)
        k_h = jnp.concatenate([k[:, :, n * HD:(n + 1) * HD] for n in range(NH)], axis=0)
        v_h = jnp.concatenate([v[:, :, n * HD:(n + 1) * HD] for n in range(NH)], axis=0)

        s = jnp.einsum('bqd,bkd->bqk', q_h, k_h,
                       preferred_element_type=jnp.float32) + amask
        s = s - jnp.max(s, axis=-1, keepdims=True)
        p = jnp.exp(s)
        p = p * pl.reciprocal(jnp.sum(p, axis=-1, keepdims=True), approx=True)
        ctx_h = jnp.einsum('bqk,bkd->bqd', p, v_h,
                           preferred_element_type=jnp.float32)   # (NH*B, S, HD)
        ctx = jnp.concatenate([ctx_h[n * B:(n + 1) * B] for n in range(NH)],
                              axis=-1).reshape(B * S, H)

        attn = jnp.dot(ctx, wo_ref[l], preferred_element_type=jnp.float32) + bo_ref[l]

        # adapter #1 (after attention output dense)
        ad = jax.nn.gelu(jnp.dot(attn, wad1_ref[l],
                                 preferred_element_type=jnp.float32) + bad1_ref[l])
        attn = attn + jnp.dot(ad, wau1_ref[l],
                              preferred_element_type=jnp.float32) + bau1_ref[l]

        x = _ln(x + attn, ln1g_ref[l], ln1b_ref[l])           # residual + LN (f32)

        # ---- FFN ----
        ff = jax.nn.gelu(jnp.dot(x, w1_ref[l],
                                 preferred_element_type=jnp.float32) + b1_ref[l])
        ff = jnp.dot(ff, w2_ref[l], preferred_element_type=jnp.float32) + b2_ref[l]

        # adapter #2 (after FFN output dense)
        ad2 = jax.nn.gelu(jnp.dot(ff, wad2_ref[l],
                                  preferred_element_type=jnp.float32) + bad2_ref[l])
        ff = ff + jnp.dot(ad2, wau2_ref[l],
                          preferred_element_type=jnp.float32) + bau2_ref[l]

        x = _ln(x + ff, ln2g_ref[l], ln2b_ref[l])             # residual + LN (f32)

    # ---- classifier head on CLS token (dropout = identity in eval) ----
    cls = x.reshape(B, S, H)[:, 0, :]                          # (B, H)
    z = jnp.tanh(jnp.dot(cls, wd1_ref[...],
                         preferred_element_type=jnp.float32) + bd1_ref[...])
    logits = jnp.dot(z, wd2_ref[...],
                     preferred_element_type=jnp.float32) + bd2_ref[...]
    out_ref[...] = logits                                      # (B, C_PAD) lane-dense


# ---------------- parameter init (deterministic, synthetic) ----------------
def init_params(key):
    ks = iter(jax.random.split(key, 128))

    def nrm(shape, scale=0.1):
        return (scale * jax.random.normal(next(ks), shape)).astype(jnp.float32)

    p = {
        "word_emb": nrm((VOCAB, H)),
        "pos_emb": nrm((S, H)),
        "emb_ln_g": 1.0 + nrm((1, 1, H)),
        "emb_ln_b": nrm((1, 1, H)),
        "w_d1": nrm((H, H)),
        "b_d1": nrm((1, H)),
    }
    # dense2 lane-padded to a full tile (real columns 0:C)
    p["w_d2"] = jnp.zeros((H, C_PAD), jnp.float32).at[:, :C].set(nrm((H, C)))
    p["b_d2"] = jnp.zeros((1, C_PAD), jnp.float32).at[:, :C].set(nrm((1, C)))

    scale = 1.0 / (HD ** 0.5)   # attention scale folded into q projection
    stk = {name: [] for name in LAYER_PARAM_ORDER}
    for _ in range(L):
        wq, wk, wv = nrm((H, H)), nrm((H, H)), nrm((H, H))
        bq, bk, bv = nrm((1, H)), nrm((1, H)), nrm((1, H))
        wqkv = jnp.zeros((H, QKV_COLS), jnp.float32)
        wqkv = wqkv.at[:, QOFF:QOFF + H].set(wq * scale)
        wqkv = wqkv.at[:, KOFF:KOFF + H].set(wk)
        wqkv = wqkv.at[:, VOFF:VOFF + H].set(wv)
        bqkv = jnp.zeros((1, QKV_COLS), jnp.float32)
        bqkv = bqkv.at[:, QOFF:QOFF + H].set(bq * scale)
        bqkv = bqkv.at[:, KOFF:KOFF + H].set(bk)
        bqkv = bqkv.at[:, VOFF:VOFF + H].set(bv)
        stk["wqkv"].append(wqkv); stk["bqkv"].append(bqkv)
        stk["wo"].append(nrm((H, H)));   stk["bo"].append(nrm((1, H)))
        stk["w1"].append(nrm((H, F)));   stk["b1"].append(nrm((1, F)))
        stk["w2"].append(nrm((F, H)));   stk["b2"].append(nrm((1, H)))
        stk["wad1"].append(nrm((H, A))); stk["bad1"].append(nrm((1, A)))
        stk["wau1"].append(nrm((A, H))); stk["bau1"].append(nrm((1, H)))
        stk["wad2"].append(nrm((H, A))); stk["bad2"].append(nrm((1, A)))
        stk["wau2"].append(nrm((A, H))); stk["bau2"].append(nrm((1, H)))
        stk["ln1_g"].append(1.0 + nrm((1, H))); stk["ln1_b"].append(nrm((1, H)))
        stk["ln2_g"].append(1.0 + nrm((1, H))); stk["ln2_b"].append(nrm((1, H)))
    for name, lst in stk.items():
        p[name] = jnp.stack(lst)          # (L, ...)
    return p


# ---------------- full forward (one pallas_call) ----------------
@jax.jit
def adapter_roberta_classifier(params, x_ids, mask):
    # embeddings (gather + LN) kept as JAX glue
    tok = params["word_emb"][x_ids]                                 # (B, S, H)
    emb = _ln(tok + params["pos_emb"][None, :, :],
              params["emb_ln_g"], params["emb_ln_b"])
    x2d = emb.reshape(B * S, H).astype(jnp.float32)
    amask = ((1.0 - mask.astype(jnp.float32)) * -1e9)[:, None, :]   # (B, 1, S)
    amask_h = jnp.tile(amask, (NH, 1, 1))                           # (NH*B, 1, S)

    layer_args = [params[n] for n in LAYER_PARAM_ORDER]
    out_pad = pl.pallas_call(
        fused_kernel,
        out_shape=jax.ShapeDtypeStruct((B, C_PAD), jnp.float32),
        compiler_params=pltpu.CompilerParams(vmem_limit_bytes=64 << 20),
    )(x2d, amask_h, *layer_args,
      params["w_d1"], params["b_d1"], params["w_d2"], params["b_d2"])
    return out_pad[:, :C]


# ---------------- pure-JAX reference (same params) ----------------
def reference_forward(params, x_ids, mask):
    tok = params["word_emb"][x_ids]
    emb = _ln(tok + params["pos_emb"][None, :, :],
              params["emb_ln_g"], params["emb_ln_b"])
    x = emb.reshape(B * S, H)
    amask = ((1.0 - mask.astype(jnp.float32)) * -1e9)[:, None, None, :]  # (B,1,1,S)
    for l in range(L):
        g = lambda n: params[n][l]
        wqkv, bqkv = g("wqkv"), g("bqkv")
        q = (x @ wqkv[:, QOFF:QOFF + H] + bqkv[:, QOFF:QOFF + H]).reshape(B, S, NH, HD)
        k = (x @ wqkv[:, KOFF:KOFF + H] + bqkv[:, KOFF:KOFF + H]).reshape(B, S, NH, HD)
        v = (x @ wqkv[:, VOFF:VOFF + H] + bqkv[:, VOFF:VOFF + H]).reshape(B, S, NH, HD)
        s = jnp.einsum('bqnd,bknd->bnqk', q, k)      # scale already folded into wq
        p = jax.nn.softmax(s + amask, axis=-1)
        ctx = jnp.einsum('bnqk,bknd->bqnd', p, v).reshape(B * S, H)
        attn = ctx @ g("wo") + g("bo")
        ad = jax.nn.gelu(attn @ g("wad1") + g("bad1"))
        attn = attn + ad @ g("wau1") + g("bau1")
        x = _ln(x + attn, g("ln1_g"), g("ln1_b"))
        ff = jax.nn.gelu(x @ g("w1") + g("b1"))
        ff = ff @ g("w2") + g("b2")
        ad2 = jax.nn.gelu(ff @ g("wad2") + g("bad2"))
        ff = ff + ad2 @ g("wau2") + g("bau2")
        x = _ln(x + ff, g("ln2_g"), g("ln2_b"))
    cls = x.reshape(B, S, H)[:, 0, :]
    z = jnp.tanh(cls @ params["w_d1"] + params["b_d1"])
    return z @ params["w_d2"][:, :C] + params["b_d2"][:, :C]


if __name__ == "__main__":
    key = jax.random.PRNGKey(0)
    k_par, k_ids = jax.random.split(key, 2)
    params = init_params(k_par)

    x_ids = jax.random.randint(k_ids, (B, S), 0, VOCAB, dtype=jnp.int32)
    mask = jnp.ones((B, S), jnp.float32).at[1, S - 2:].set(0.0)   # pad last 2 of row 1

    logits = adapter_roberta_classifier(params, x_ids, mask)
    jax.block_until_ready(logits)

    assert logits.shape == (B, C) and logits.dtype == jnp.float32
    assert bool(jnp.all(jnp.isfinite(logits)))
    ref = reference_forward(params, x_ids, mask)
    assert bool(jnp.allclose(logits, ref, atol=2e-2, rtol=2e-2)), (logits, ref)
    print("KERNEL_OK")
</pallas_src>

<mosaic_0001>
module attributes {stable_mosaic.version = 11 : i64} {
  func.func @fused_kernel(%arg0: memref<16x32xf32, #tpu.memory_space<vmem>>, %arg1: memref<8x1x8xf32, #tpu.memory_space<vmem>>, %arg2: memref<2x32x384xf32, #tpu.memory_space<vmem>>, %arg3: memref<2x1x384xf32, #tpu.memory_space<vmem>>, %arg4: memref<2x32x32xf32, #tpu.memory_space<vmem>>, %arg5: memref<2x1x32xf32, #tpu.memory_space<vmem>>, %arg6: memref<2x32x128xf32, #tpu.memory_space<vmem>>, %arg7: memref<2x1x128xf32, #tpu.memory_space<vmem>>, %arg8: memref<2x128x32xf32, #tpu.memory_space<vmem>>, %arg9: memref<2x1x32xf32, #tpu.memory_space<vmem>>, %arg10: memref<2x32x8xf32, #tpu.memory_space<vmem>>, %arg11: memref<2x1x8xf32, #tpu.memory_space<vmem>>, %arg12: memref<2x8x32xf32, #tpu.memory_space<vmem>>, %arg13: memref<2x1x32xf32, #tpu.memory_space<vmem>>, %arg14: memref<2x32x8xf32, #tpu.memory_space<vmem>>, %arg15: memref<2x1x8xf32, #tpu.memory_space<vmem>>, %arg16: memref<2x8x32xf32, #tpu.memory_space<vmem>>, %arg17: memref<2x1x32xf32, #tpu.memory_space<vmem>>, %arg18: memref<2x1x32xf32, #tpu.memory_space<vmem>>, %arg19: memref<2x1x32xf32, #tpu.memory_space<vmem>>, %arg20: memref<2x1x32xf32, #tpu.memory_space<vmem>>, %arg21: memref<2x1x32xf32, #tpu.memory_space<vmem>>, %arg22: memref<32x32xf32, #tpu.memory_space<vmem>>, %arg23: memref<1x32xf32, #tpu.memory_space<vmem>>, %arg24: memref<32x128xf32, #tpu.memory_space<vmem>>, %arg25: memref<1x128xf32, #tpu.memory_space<vmem>>, %arg26: memref<2x128xf32, #tpu.memory_space<vmem>>) attributes {dimension_semantics = [], scalar_prefetch = 0 : i64, scratch_operands = 0 : i64, tpu.core_type = #tpu.core_type<tc>} {
    %c0 = arith.constant 0 : index
    %c0_0 = arith.constant 0 : index
    %0 = vector.load %arg0[%c0, %c0_0] : memref<16x32xf32, #tpu.memory_space<vmem>>, vector<16x32xf32>
    %c0_1 = arith.constant 0 : index
    %c0_2 = arith.constant 0 : index
    %c0_3 = arith.constant 0 : index
    %1 = vector.load %arg1[%c0_1, %c0_2, %c0_3] : memref<8x1x8xf32, #tpu.memory_space<vmem>>, vector<8x1x8xf32>
    %c0_4 = arith.constant 0 : index
    %c0_5 = arith.constant 0 : index
    %c0_6 = arith.constant 0 : index
    %2 = vector.load %arg2[%c0_4, %c0_5, %c0_6] : memref<2x32x384xf32, #tpu.memory_space<vmem>>, vector<1x32x384xf32>
    %3 = vector.shape_cast %2 : vector<1x32x384xf32> to vector<32x384xf32>
    %cst = arith.constant dense<0.000000e+00> : vector<16x384xf32>
    %4 = tpu.matmul %0, %3, %cst {dimension_numbers = #tpu.dot_dimension_numbers<[1], [0], [0], [1], [0, 0, 1, 1], [], []>} : vector<16x32xf32>, vector<32x384xf32>, vector<16x384xf32> -> vector<16x384xf32>
    %c0_7 = arith.constant 0 : index
    %c0_8 = arith.constant 0 : index
    %c0_9 = arith.constant 0 : index
    %5 = vector.load %arg3[%c0_7, %c0_8, %c0_9] : memref<2x1x384xf32, #tpu.memory_space<vmem>>, vector<1x1x384xf32>
    %6 = vector.shape_cast %5 : vector<1x1x384xf32> to vector<1x384xf32>
    %7 = vector.broadcast %6 : vector<1x384xf32> to vector<16x384xf32>
    %8 = arith.addf %4, %7 : vector<16x384xf32>
    %9 = vector.extract_strided_slice %8 {offsets = [0, 0], sizes = [16, 32], strides = [1, 1]} : vector<16x384xf32> to vector<16x32xf32>
    %10 = vector.shape_cast %9 : vector<16x32xf32> to vector<2x8x32xf32>
    %11 = vector.extract_strided_slice %8 {offsets = [0, 128], sizes = [16, 32], strides = [1, 1]} : vector<16x384xf32> to vector<16x32xf32>
    %12 = vector.shape_cast %11 : vector<16x32xf32> to vector<2x8x32xf32>
    %13 = vector.extract_strided_slice %8 {offsets = [0, 256], sizes = [16, 32], strides = [1, 1]} : vector<16x384xf32> to vector<16x32xf32>
    %14 = vector.shape_cast %13 : vector<16x32xf32> to vector<2x8x32xf32>
    %15 = vector.extract_strided_slice %10 {offsets = [0, 0, 0], sizes = [2, 8, 8], strides = [1, 1, 1]} : vector<2x8x32xf32> to vector<2x8x8xf32>
    %16 = vector.extract_strided_slice %10 {offsets = [0, 0, 8], sizes = [2, 8, 8], strides = [1, 1, 1]} : vector<2x8x32xf32> to vector<2x8x8xf32>
    %17 = vector.extract_strided_slice %10 {offsets = [0, 0, 16], sizes = [2, 8, 8], strides = [1, 1, 1]} : vector<2x8x32xf32> to vector<2x8x8xf32>
    %18 = vector.extract_strided_slice %10 {offsets = [0, 0, 24], sizes = [2, 8, 8], strides = [1, 1, 1]} : vector<2x8x32xf32> to vector<2x8x8xf32>
    %19 = tpu.concatenate %15, %16, %17, %18 in 0 : vector<2x8x8xf32>, vector<2x8x8xf32>, vector<2x8x8xf32>, vector<2x8x8xf32> -> vector<8x8x8xf32>
    %20 = vector.extract_strided_slice %12 {offsets = [0, 0, 0], sizes = [2, 8, 8], strides = [1, 1, 1]} : vector<2x8x32xf32> to vector<2x8x8xf32>
    %21 = vector.extract_strided_slice %12 {offsets = [0, 0, 8], sizes = [2, 8, 8], strides = [1, 1, 1]} : vector<2x8x32xf32> to vector<2x8x8xf32>
    %22 = vector.extract_strided_slice %12 {offsets = [0, 0, 16], sizes = [2, 8, 8], strides = [1, 1, 1]} : vector<2x8x32xf32> to vector<2x8x8xf32>
    %23 = vector.extract_strided_slice %12 {offsets = [0, 0, 24], sizes = [2, 8, 8], strides = [1, 1, 1]} : vector<2x8x32xf32> to vector<2x8x8xf32>
    %24 = tpu.concatenate %20, %21, %22, %23 in 0 : vector<2x8x8xf32>, vector<2x8x8xf32>, vector<2x8x8xf32>, vector<2x8x8xf32> -> vector<8x8x8xf32>
    %25 = vector.extract_strided_slice %14 {offsets = [0, 0, 0], sizes = [2, 8, 8], strides = [1, 1, 1]} : vector<2x8x32xf32> to vector<2x8x8xf32>
    %26 = vector.extract_strided_slice %14 {offsets = [0, 0, 8], sizes = [2, 8, 8], strides = [1, 1, 1]} : vector<2x8x32xf32> to vector<2x8x8xf32>
    %27 = vector.extract_strided_slice %14 {offsets = [0, 0, 16], sizes = [2, 8, 8], strides = [1, 1, 1]} : vector<2x8x32xf32> to vector<2x8x8xf32>
    %28 = vector.extract_strided_slice %14 {offsets = [0, 0, 24], sizes = [2, 8, 8], strides = [1, 1, 1]} : vector<2x8x32xf32> to vector<2x8x8xf32>
    %29 = tpu.concatenate %25, %26, %27, %28 in 0 : vector<2x8x8xf32>, vector<2x8x8xf32>, vector<2x8x8xf32>, vector<2x8x8xf32> -> vector<8x8x8xf32>
    "tpu.trace_start"() <{level = 10 : i32, message = "bqd,bkd->bqk"}> : () -> ()
    %cst_10 = arith.constant dense<0.000000e+00> : vector<8x8x8xf32>
    %30 = tpu.matmul %19, %24, %cst_10 {dimension_numbers = #tpu.dot_dimension_numbers<[2], [2], [1], [1], [0, 0, 0, 1, 1, 1], [0], [0]>} : vector<8x8x8xf32>, vector<8x8x8xf32>, vector<8x8x8xf32> -> vector<8x8x8xf32>
    "tpu.trace_stop"() : () -> ()
    %31 = vector.broadcast %1 : vector<8x1x8xf32> to vector<8x8x8xf32>
    %32 = arith.addf %30, %31 : vector<8x8x8xf32>
    %cst_11 = arith.constant dense<0xFF800000> : vector<8x8xf32>
    %33 = vector.multi_reduction <maximumf>, %32, %cst_11 [2] : vector<8x8x8xf32> to vector<8x8xf32>
    %34 = vector.shape_cast %33 : vector<8x8xf32> to vector<8x8x1xf32>
    %35 = vector.broadcast %34 : vector<8x8x1xf32> to vector<8x8x8xf32>
    %36 = arith.subf %32, %35 : vector<8x8x8xf32>
    %37 = math.exp %36 : vector<8x8x8xf32>
    %cst_12 = arith.constant dense<0.000000e+00> : vector<8x8xf32>
    %38 = vector.multi_reduction <add>, %37, %cst_12 [2] : vector<8x8x8xf32> to vector<8x8xf32>
    %39 = vector.shape_cast %38 : vector<8x8xf32> to vector<8x8x1xf32>
    %40 = tpu.reciprocal %39 {approx = true} : vector<8x8x1xf32> -> vector<8x8x1xf32>
    %41 = vector.broadcast %40 : vector<8x8x1xf32> to vector<8x8x8xf32>
    %42 = arith.mulf %37, %41 : vector<8x8x8xf32>
    "tpu.trace_start"() <{level = 10 : i32, message = "bqk,bkd->bqd"}> : () -> ()
    %cst_13 = arith.constant dense<0.000000e+00> : vector<8x8x8xf32>
    %43 = tpu.matmul %42, %29, %cst_13 {dimension_numbers = #tpu.dot_dimension_numbers<[2], [1], [1], [2], [0, 0, 0, 1, 1, 2], [0], [0]>} : vector<8x8x8xf32>, vector<8x8x8xf32>, vector<8x8x8xf32> -> vector<8x8x8xf32>
    "tpu.trace_stop"() : () -> ()
    %44 = vector.extract_strided_slice %43 {offsets = [0, 0, 0], sizes = [2, 8, 8], strides = [1, 1, 1]} : vector<8x8x8xf32> to vector<2x8x8xf32>
    %45 = vector.extract_strided_slice %43 {offsets = [2, 0, 0], sizes = [2, 8, 8], strides = [1, 1, 1]} : vector<8x8x8xf32> to vector<2x8x8xf32>
    %46 = vector.extract_strided_slice %43 {offsets = [4, 0, 0], sizes = [2, 8, 8], strides = [1, 1, 1]} : vector<8x8x8xf32> to vector<2x8x8xf32>
    %47 = vector.extract_strided_slice %43 {offsets = [6, 0, 0], sizes = [2, 8, 8], strides = [1, 1, 1]} : vector<8x8x8xf32> to vector<2x8x8xf32>
    %48 = tpu.concatenate %44, %45, %46, %47 in 2 : vector<2x8x8xf32>, vector<2x8x8xf32>, vector<2x8x8xf32>, vector<2x8x8xf32> -> vector<2x8x32xf32>
    %49 = vector.shape_cast %48 : vector<2x8x32xf32> to vector<16x32xf32>
    %c0_14 = arith.constant 0 : index
    %c0_15 = arith.constant 0 : index
    %c0_16 = arith.constant 0 : index
    %50 = vector.load %arg4[%c0_14, %c0_15, %c0_16] : memref<2x32x32xf32, #tpu.memory_space<vmem>>, vector<1x32x32xf32>
    %51 = vector.shape_cast %50 : vector<1x32x32xf32> to vector<32x32xf32>
    %cst_17 = arith.constant dense<0.000000e+00> : vector<16x32xf32>
    %52 = tpu.matmul %49, %51, %cst_17 {dimension_numbers = #tpu.dot_dimension_numbers<[1], [0], [0], [1], [0, 0, 1, 1], [], []>} : vector<16x32xf32>, vector<32x32xf32>, vector<16x32xf32> -> vector<16x32xf32>
    %c0_18 = arith.constant 0 : index
    %c0_19 = arith.constant 0 : index
    %c0_20 = arith.constant 0 : index
    %53 = vector.load %arg5[%c0_18, %c0_19, %c0_20] : memref<2x1x32xf32, #tpu.memory_space<vmem>>, vector<1x1x32xf32>
    %54 = vector.shape_cast %53 : vector<1x1x32xf32> to vector<1x32xf32>
    %55 = vector.broadcast %54 : vector<1x32xf32> to vector<16x32xf32>
    %56 = arith.addf %52, %55 : vector<16x32xf32>
    %c0_21 = arith.constant 0 : index
    %c0_22 = arith.constant 0 : index
    %c0_23 = arith.constant 0 : index
    %57 = vector.load %arg10[%c0_21, %c0_22, %c0_23] : memref<2x32x8xf32, #tpu.memory_space<vmem>>, vector<1x32x8xf32>
    %58 = vector.shape_cast %57 : vector<1x32x8xf32> to vector<32x8xf32>
    %cst_24 = arith.constant dense<0.000000e+00> : vector<16x8xf32>
    %59 = tpu.matmul %56, %58, %cst_24 {dimension_numbers = #tpu.dot_dimension_numbers<[1], [0], [0], [1], [0, 0, 1, 1], [], []>} : vector<16x32xf32>, vector<32x8xf32>, vector<16x8xf32> -> vector<16x8xf32>
    %c0_25 = arith.constant 0 : index
    %c0_26 = arith.constant 0 : index
    %c0_27 = arith.constant 0 : index
    %60 = vector.load %arg11[%c0_25, %c0_26, %c0_27] : memref<2x1x8xf32, #tpu.memory_space<vmem>>, vector<1x1x8xf32>
    %61 = vector.shape_cast %60 : vector<1x1x8xf32> to vector<1x8xf32>
    %62 = vector.broadcast %61 : vector<1x8xf32> to vector<16x8xf32>
    %63 = arith.addf %59, %62 : vector<16x8xf32>
    %64 = arith.mulf %63, %63 : vector<16x8xf32>
    %65 = arith.mulf %63, %64 : vector<16x8xf32>
    %cst_28 = arith.constant 4.471500e-02 : f32
    %66 = vector.broadcast %cst_28 : f32 to vector<16x8xf32>
    %67 = arith.mulf %66, %65 : vector<16x8xf32>
    %68 = arith.addf %63, %67 : vector<16x8xf32>
    %cst_29 = arith.constant 0.797884583 : f32
    %69 = vector.broadcast %cst_29 : f32 to vector<16x8xf32>
    %70 = arith.mulf %69, %68 : vector<16x8xf32>
    %71 = math.tanh %70 : vector<16x8xf32>
    %cst_30 = arith.constant 1.000000e+00 : f32
    %72 = vector.broadcast %cst_30 : f32 to vector<16x8xf32>
    %73 = arith.addf %72, %71 : vector<16x8xf32>
    %cst_31 = arith.constant 5.000000e-01 : f32
    %74 = vector.broadcast %cst_31 : f32 to vector<16x8xf32>
    %75 = arith.mulf %74, %73 : vector<16x8xf32>
    %76 = arith.mulf %63, %75 : vector<16x8xf32>
    %c0_32 = arith.constant 0 : index
    %c0_33 = arith.constant 0 : index
    %c0_34 = arith.constant 0 : index
    %77 = vector.load %arg12[%c0_32, %c0_33, %c0_34] : memref<2x8x32xf32, #tpu.memory_space<vmem>>, vector<1x8x32xf32>
    %78 = vector.shape_cast %77 : vector<1x8x32xf32> to vector<8x32xf32>
    %cst_35 = arith.constant dense<0.000000e+00> : vector<16x32xf32>
    %79 = tpu.matmul %76, %78, %cst_35 {dimension_numbers = #tpu.dot_dimension_numbers<[1], [0], [0], [1], [0, 0, 1, 1], [], []>} : vector<16x8xf32>, vector<8x32xf32>, vector<16x32xf32> -> vector<16x32xf32>
    %80 = arith.addf %56, %79 : vector<16x32xf32>
    %c0_36 = arith.constant 0 : index
    %c0_37 = arith.constant 0 : index
    %c0_38 = arith.constant 0 : index
    %81 = vector.load %arg13[%c0_36, %c0_37, %c0_38] : memref<2x1x32xf32, #tpu.memory_space<vmem>>, vector<1x1x32xf32>
    %82 = vector.shape_cast %81 : vector<1x1x32xf32> to vector<1x32xf32>
    %83 = vector.broadcast %82 : vector<1x32xf32> to vector<16x32xf32>
    %84 = arith.addf %80, %83 : vector<16x32xf32>
    %85 = arith.addf %0, %84 : vector<16x32xf32>
    %c0_39 = arith.constant 0 : index
    %c0_40 = arith.constant 0 : index
    %c0_41 = arith.constant 0 : index
    %86 = vector.load %arg18[%c0_39, %c0_40, %c0_41] : memref<2x1x32xf32, #tpu.memory_space<vmem>>, vector<1x1x32xf32>
    %87 = vector.shape_cast %86 : vector<1x1x32xf32> to vector<1x32xf32>
    %c0_42 = arith.constant 0 : index
    %c0_43 = arith.constant 0 : index
    %c0_44 = arith.constant 0 : index
    %88 = vector.load %arg19[%c0_42, %c0_43, %c0_44] : memref<2x1x32xf32, #tpu.memory_space<vmem>>, vector<1x1x32xf32>
    %89 = vector.shape_cast %88 : vector<1x1x32xf32> to vector<1x32xf32>
    %cst_45 = arith.constant dense<0.000000e+00> : vector<16xf32>
    %90 = vector.multi_reduction <add>, %85, %cst_45 [1] : vector<16x32xf32> to vector<16xf32>
    %91 = vector.shape_cast %90 : vector<16xf32> to vector<16x1xf32>
    %cst_46 = arith.constant 3.200000e+01 : f32
    %92 = vector.broadcast %cst_46 : f32 to vector<16x1xf32>
    %93 = arith.divf %91, %92 : vector<16x1xf32>
    %94 = vector.broadcast %93 : vector<16x1xf32> to vector<16x32xf32>
    %95 = arith.subf %85, %94 : vector<16x32xf32>
    %96 = arith.mulf %95, %95 : vector<16x32xf32>
    %cst_47 = arith.constant dense<0.000000e+00> : vector<16xf32>
    %97 = vector.multi_reduction <add>, %96, %cst_47 [1] : vector<16x32xf32> to vector<16xf32>
    %98 = vector.shape_cast %97 : vector<16xf32> to vector<16x1xf32>
    %cst_48 = arith.constant 3.200000e+01 : f32
    %99 = vector.broadcast %cst_48 : f32 to vector<16x1xf32>
    %100 = arith.divf %98, %99 : vector<16x1xf32>
    %101 = vector.broadcast %93 : vector<16x1xf32> to vector<16x32xf32>
    %102 = arith.subf %85, %101 : vector<16x32xf32>
    %cst_49 = arith.constant 9.99999974E-6 : f32
    %103 = vector.broadcast %cst_49 : f32 to vector<16x1xf32>
    %104 = arith.addf %100, %103 : vector<16x1xf32>
    %105 = math.rsqrt %104 : vector<16x1xf32>
    %106 = vector.broadcast %105 : vector<16x1xf32> to vector<16x32xf32>
    %107 = arith.mulf %102, %106 : vector<16x32xf32>
    %108 = vector.broadcast %87 : vector<1x32xf32> to vector<16x32xf32>
    %109 = arith.mulf %107, %108 : vector<16x32xf32>
    %110 = vector.broadcast %89 : vector<1x32xf32> to vector<16x32xf32>
    %111 = arith.addf %109, %110 : vector<16x32xf32>
    %c0_50 = arith.constant 0 : index
    %c0_51 = arith.constant 0 : index
    %c0_52 = arith.constant 0 : index
    %112 = vector.load %arg6[%c0_50, %c0_51, %c0_52] : memref<2x32x128xf32, #tpu.memory_space<vmem>>, vector<1x32x128xf32>
    %113 = vector.shape_cast %112 : vector<1x32x128xf32> to vector<32x128xf32>
    %cst_53 = arith.constant dense<0.000000e+00> : vector<16x128xf32>
    %114 = tpu.matmul %111, %113, %cst_53 {dimension_numbers = #tpu.dot_dimension_numbers<[1], [0], [0], [1], [0, 0, 1, 1], [], []>} : vector<16x32xf32>, vector<32x128xf32>, vector<16x128xf32> -> vector<16x128xf32>
    %c0_54 = arith.constant 0 : index
    %c0_55 = arith.constant 0 : index
    %c0_56 = arith.constant 0 : index
    %115 = vector.load %arg7[%c0_54, %c0_55, %c0_56] : memref<2x1x128xf32, #tpu.memory_space<vmem>>, vector<1x1x128xf32>
    %116 = vector.shape_cast %115 : vector<1x1x128xf32> to vector<1x128xf32>
    %117 = vector.broadcast %116 : vector<1x128xf32> to vector<16x128xf32>
    %118 = arith.addf %114, %117 : vector<16x128xf32>
    %119 = arith.mulf %118, %118 : vector<16x128xf32>
    %120 = arith.mulf %118, %119 : vector<16x128xf32>
    %cst_57 = arith.constant 4.471500e-02 : f32
    %121 = vector.broadcast %cst_57 : f32 to vector<16x128xf32>
    %122 = arith.mulf %121, %120 : vector<16x128xf32>
    %123 = arith.addf %118, %122 : vector<16x128xf32>
    %cst_58 = arith.constant 0.797884583 : f32
    %124 = vector.broadcast %cst_58 : f32 to vector<16x128xf32>
    %125 = arith.mulf %124, %123 : vector<16x128xf32>
    %126 = math.tanh %125 : vector<16x128xf32>
    %cst_59 = arith.constant 1.000000e+00 : f32
    %127 = vector.broadcast %cst_59 : f32 to vector<16x128xf32>
    %128 = arith.addf %127, %126 : vector<16x128xf32>
    %cst_60 = arith.constant 5.000000e-01 : f32
    %129 = vector.broadcast %cst_60 : f32 to vector<16x128xf32>
    %130 = arith.mulf %129, %128 : vector<16x128xf32>
    %131 = arith.mulf %118, %130 : vector<16x128xf32>
    %c0_61 = arith.constant 0 : index
    %c0_62 = arith.constant 0 : index
    %c0_63 = arith.constant 0 : index
    %132 = vector.load %arg8[%c0_61, %c0_62, %c0_63] : memref<2x128x32xf32, #tpu.memory_space<vmem>>, vector<1x128x32xf32>
    %133 = vector.shape_cast %132 : vector<1x128x32xf32> to vector<128x32xf32>
    %cst_64 = arith.constant dense<0.000000e+00> : vector<16x32xf32>
    %134 = tpu.matmul %131, %133, %cst_64 {dimension_numbers = #tpu.dot_dimension_numbers<[1], [0], [0], [1], [0, 0, 1, 1], [], []>} : vector<16x128xf32>, vector<128x32xf32>, vector<16x32xf32> -> vector<16x32xf32>
    %c0_65 = arith.constant 0 : index
    %c0_66 = arith.constant 0 : index
    %c0_67 = arith.constant 0 : index
    %135 = vector.load %arg9[%c0_65, %c0_66, %c0_67] : memref<2x1x32xf32, #tpu.memory_space<vmem>>, vector<1x1x32xf32>
    %136 = vector.shape_cast %135 : vector<1x1x32xf32> to vector<1x32xf32>
    %137 = vector.broadcast %136 : vector<1x32xf32> to vector<16x32xf32>
    %138 = arith.addf %134, %137 : vector<16x32xf32>
    %c0_68 = arith.constant 0 : index
    %c0_69 = arith.constant 0 : index
    %c0_70 = arith.constant 0 : index
    %139 = vector.load %arg14[%c0_68, %c0_69, %c0_70] : memref<2x32x8xf32, #tpu.memory_space<vmem>>, vector<1x32x8xf32>
    %140 = vector.shape_cast %139 : vector<1x32x8xf32> to vector<32x8xf32>
    %cst_71 = arith.constant dense<0.000000e+00> : vector<16x8xf32>
    %141 = tpu.matmul %138, %140, %cst_71 {dimension_numbers = #tpu.dot_dimension_numbers<[1], [0], [0], [1], [0, 0, 1, 1], [], []>} : vector<16x32xf32>, vector<32x8xf32>, vector<16x8xf32> -> vector<16x8xf32>
    %c0_72 = arith.constant 0 : index
    %c0_73 = arith.constant 0 : index
    %c0_74 = arith.constant 0 : index
    %142 = vector.load %arg15[%c0_72, %c0_73, %c0_74] : memref<2x1x8xf32, #tpu.memory_space<vmem>>, vector<1x1x8xf32>
    %143 = vector.shape_cast %142 : vector<1x1x8xf32> to vector<1x8xf32>
    %144 = vector.broadcast %143 : vector<1x8xf32> to vector<16x8xf32>
    %145 = arith.addf %141, %144 : vector<16x8xf32>
    %146 = arith.mulf %145, %145 : vector<16x8xf32>
    %147 = arith.mulf %145, %146 : vector<16x8xf32>
    %cst_75 = arith.constant 4.471500e-02 : f32
    %148 = vector.broadcast %cst_75 : f32 to vector<16x8xf32>
    %149 = arith.mulf %148, %147 : vector<16x8xf32>
    %150 = arith.addf %145, %149 : vector<16x8xf32>
    %cst_76 = arith.constant 0.797884583 : f32
    %151 = vector.broadcast %cst_76 : f32 to vector<16x8xf32>
    %152 = arith.mulf %151, %150 : vector<16x8xf32>
    %153 = math.tanh %152 : vector<16x8xf32>
    %cst_77 = arith.constant 1.000000e+00 : f32
    %154 = vector.broadcast %cst_77 : f32 to vector<16x8xf32>
    %155 = arith.addf %154, %153 : vector<16x8xf32>
    %cst_78 = arith.constant 5.000000e-01 : f32
    %156 = vector.broadcast %cst_78 : f32 to vector<16x8xf32>
    %157 = arith.mulf %156, %155 : vector<16x8xf32>
    %158 = arith.mulf %145, %157 : vector<16x8xf32>
    %c0_79 = arith.constant 0 : index
    %c0_80 = arith.constant 0 : index
    %c0_81 = arith.constant 0 : index
    %159 = vector.load %arg16[%c0_79, %c0_80, %c0_81] : memref<2x8x32xf32, #tpu.memory_space<vmem>>, vector<1x8x32xf32>
    %160 = vector.shape_cast %159 : vector<1x8x32xf32> to vector<8x32xf32>
    %cst_82 = arith.constant dense<0.000000e+00> : vector<16x32xf32>
    %161 = tpu.matmul %158, %160, %cst_82 {dimension_numbers = #tpu.dot_dimension_numbers<[1], [0], [0], [1], [0, 0, 1, 1], [], []>} : vector<16x8xf32>, vector<8x32xf32>, vector<16x32xf32> -> vector<16x32xf32>
    %162 = arith.addf %138, %161 : vector<16x32xf32>
    %c0_83 = arith.constant 0 : index
    %c0_84 = arith.constant 0 : index
    %c0_85 = arith.constant 0 : index
    %163 = vector.load %arg17[%c0_83, %c0_84, %c0_85] : memref<2x1x32xf32, #tpu.memory_space<vmem>>, vector<1x1x32xf32>
    %164 = vector.shape_cast %163 : vector<1x1x32xf32> to vector<1x32xf32>
    %165 = vector.broadcast %164 : vector<1x32xf32> to vector<16x32xf32>
    %166 = arith.addf %162, %165 : vector<16x32xf32>
    %167 = arith.addf %111, %166 : vector<16x32xf32>
    %c0_86 = arith.constant 0 : index
    %c0_87 = arith.constant 0 : index
    %c0_88 = arith.constant 0 : index
    %168 = vector.load %arg20[%c0_86, %c0_87, %c0_88] : memref<2x1x32xf32, #tpu.memory_space<vmem>>, vector<1x1x32xf32>
    %169 = vector.shape_cast %168 : vector<1x1x32xf32> to vector<1x32xf32>
    %c0_89 = arith.constant 0 : index
    %c0_90 = arith.constant 0 : index
    %c0_91 = arith.constant 0 : index
    %170 = vector.load %arg21[%c0_89, %c0_90, %c0_91] : memref<2x1x32xf32, #tpu.memory_space<vmem>>, vector<1x1x32xf32>
    %171 = vector.shape_cast %170 : vector<1x1x32xf32> to vector<1x32xf32>
    %cst_92 = arith.constant dense<0.000000e+00> : vector<16xf32>
    %172 = vector.multi_reduction <add>, %167, %cst_92 [1] : vector<16x32xf32> to vector<16xf32>
    %173 = vector.shape_cast %172 : vector<16xf32> to vector<16x1xf32>
    %cst_93 = arith.constant 3.200000e+01 : f32
    %174 = vector.broadcast %cst_93 : f32 to vector<16x1xf32>
    %175 = arith.divf %173, %174 : vector<16x1xf32>
    %176 = vector.broadcast %175 : vector<16x1xf32> to vector<16x32xf32>
    %177 = arith.subf %167, %176 : vector<16x32xf32>
    %178 = arith.mulf %177, %177 : vector<16x32xf32>
    %cst_94 = arith.constant dense<0.000000e+00> : vector<16xf32>
    %179 = vector.multi_reduction <add>, %178, %cst_94 [1] : vector<16x32xf32> to vector<16xf32>
    %180 = vector.shape_cast %179 : vector<16xf32> to vector<16x1xf32>
    %cst_95 = arith.constant 3.200000e+01 : f32
    %181 = vector.broadcast %cst_95 : f32 to vector<16x1xf32>
    %182 = arith.divf %180, %181 : vector<16x1xf32>
    %183 = vector.broadcast %175 : vector<16x1xf32> to vector<16x32xf32>
    %184 = arith.subf %167, %183 : vector<16x32xf32>
    %cst_96 = arith.constant 9.99999974E-6 : f32
    %185 = vector.broadcast %cst_96 : f32 to vector<16x1xf32>
    %186 = arith.addf %182, %185 : vector<16x1xf32>
    %187 = math.rsqrt %186 : vector<16x1xf32>
    %188 = vector.broadcast %187 : vector<16x1xf32> to vector<16x32xf32>
    %189 = arith.mulf %184, %188 : vector<16x32xf32>
    %190 = vector.broadcast %169 : vector<1x32xf32> to vector<16x32xf32>
    %191 = arith.mulf %189, %190 : vector<16x32xf32>
    %192 = vector.broadcast %171 : vector<1x32xf32> to vector<16x32xf32>
    %193 = arith.addf %191, %192 : vector<16x32xf32>
    %c1 = arith.constant 1 : index
    %c0_97 = arith.constant 0 : index
    %c0_98 = arith.constant 0 : index
    %194 = vector.load %arg2[%c1, %c0_97, %c0_98] : memref<2x32x384xf32, #tpu.memory_space<vmem>>, vector<1x32x384xf32>
    %195 = vector.shape_cast %194 : vector<1x32x384xf32> to vector<32x384xf32>
    %cst_99 = arith.constant dense<0.000000e+00> : vector<16x384xf32>
    %196 = tpu.matmul %193, %195, %cst_99 {dimension_numbers = #tpu.dot_dimension_numbers<[1], [0], [0], [1], [0, 0, 1, 1], [], []>} : vector<16x32xf32>, vector<32x384xf32>, vector<16x384xf32> -> vector<16x384xf32>
    %c1_100 = arith.constant 1 : index
    %c0_101 = arith.constant 0 : index
    %c0_102 = arith.constant 0 : index
    %197 = vector.load %arg3[%c1_100, %c0_101, %c0_102] : memref<2x1x384xf32, #tpu.memory_space<vmem>>, vector<1x1x384xf32>
    %198 = vector.shape_cast %197 : vector<1x1x384xf32> to vector<1x384xf32>
    %199 = vector.broadcast %198 : vector<1x384xf32> to vector<16x384xf32>
    %200 = arith.addf %196, %199 : vector<16x384xf32>
    %201 = vector.extract_strided_slice %200 {offsets = [0, 0], sizes = [16, 32], strides = [1, 1]} : vector<16x384xf32> to vector<16x32xf32>
    %202 = vector.shape_cast %201 : vector<16x32xf32> to vector<2x8x32xf32>
    %203 = vector.extract_strided_slice %200 {offsets = [0, 128], sizes = [16, 32], strides = [1, 1]} : vector<16x384xf32> to vector<16x32xf32>
    %204 = vector.shape_cast %203 : vector<16x32xf32> to vector<2x8x32xf32>
    %205 = vector.extract_strided_slice %200 {offsets = [0, 256], sizes = [16, 32], strides = [1, 1]} : vector<16x384xf32> to vector<16x32xf32>
    %206 = vector.shape_cast %205 : vector<16x32xf32> to vector<2x8x32xf32>
    %207 = vector.extract_strided_slice %202 {offsets = [0, 0, 0], sizes = [2, 8, 8], strides = [1, 1, 1]} : vector<2x8x32xf32> to vector<2x8x8xf32>
    %208 = vector.extract_strided_slice %202 {offsets = [0, 0, 8], sizes = [2, 8, 8], strides = [1, 1, 1]} : vector<2x8x32xf32> to vector<2x8x8xf32>
    %209 = vector.extract_strided_slice %202 {offsets = [0, 0, 16], sizes = [2, 8, 8], strides = [1, 1, 1]} : vector<2x8x32xf32> to vector<2x8x8xf32>
    %210 = vector.extract_strided_slice %202 {offsets = [0, 0, 24], sizes = [2, 8, 8], strides = [1, 1, 1]} : vector<2x8x32xf32> to vector<2x8x8xf32>
    %211 = tpu.concatenate %207, %208, %209, %210 in 0 : vector<2x8x8xf32>, vector<2x8x8xf32>, vector<2x8x8xf32>, vector<2x8x8xf32> -> vector<8x8x8xf32>
    %212 = vector.extract_strided_slice %204 {offsets = [0, 0, 0], sizes = [2, 8, 8], strides = [1, 1, 1]} : vector<2x8x32xf32> to vector<2x8x8xf32>
    %213 = vector.extract_strided_slice %204 {offsets = [0, 0, 8], sizes = [2, 8, 8], strides = [1, 1, 1]} : vector<2x8x32xf32> to vector<2x8x8xf32>
    %214 = vector.extract_strided_slice %204 {offsets = [0, 0, 16], sizes = [2, 8, 8], strides = [1, 1, 1]} : vector<2x8x32xf32> to vector<2x8x8xf32>
    %215 = vector.extract_strided_slice %204 {offsets = [0, 0, 24], sizes = [2, 8, 8], strides = [1, 1, 1]} : vector<2x8x32xf32> to vector<2x8x8xf32>
    %216 = tpu.concatenate %212, %213, %214, %215 in 0 : vector<2x8x8xf32>, vector<2x8x8xf32>, vector<2x8x8xf32>, vector<2x8x8xf32> -> vector<8x8x8xf32>
    %217 = vector.extract_strided_slice %206 {offsets = [0, 0, 0], sizes = [2, 8, 8], strides = [1, 1, 1]} : vector<2x8x32xf32> to vector<2x8x8xf32>
    %218 = vector.extract_strided_slice %206 {offsets = [0, 0, 8], sizes = [2, 8, 8], strides = [1, 1, 1]} : vector<2x8x32xf32> to vector<2x8x8xf32>
    %219 = vector.extract_strided_slice %206 {offsets = [0, 0, 16], sizes = [2, 8, 8], strides = [1, 1, 1]} : vector<2x8x32xf32> to vector<2x8x8xf32>
    %220 = vector.extract_strided_slice %206 {offsets = [0, 0, 24], sizes = [2, 8, 8], strides = [1, 1, 1]} : vector<2x8x32xf32> to vector<2x8x8xf32>
    %221 = tpu.concatenate %217, %218, %219, %220 in 0 : vector<2x8x8xf32>, vector<2x8x8xf32>, vector<2x8x8xf32>, vector<2x8x8xf32> -> vector<8x8x8xf32>
    "tpu.trace_start"() <{level = 10 : i32, message = "bqd,bkd->bqk"}> : () -> ()
    %cst_103 = arith.constant dense<0.000000e+00> : vector<8x8x8xf32>
    %222 = tpu.matmul %211, %216, %cst_103 {dimension_numbers = #tpu.dot_dimension_numbers<[2], [2], [1], [1], [0, 0, 0, 1, 1, 1], [0], [0]>} : vector<8x8x8xf32>, vector<8x8x8xf32>, vector<8x8x8xf32> -> vector<8x8x8xf32>
    "tpu.trace_stop"() : () -> ()
    %223 = vector.broadcast %1 : vector<8x1x8xf32> to vector<8x8x8xf32>
    %224 = arith.addf %222, %223 : vector<8x8x8xf32>
    %cst_104 = arith.constant dense<0xFF800000> : vector<8x8xf32>
    %225 = vector.multi_reduction <maximumf>, %224, %cst_104 [2] : vector<8x8x8xf32> to vector<8x8xf32>
    %226 = vector.shape_cast %225 : vector<8x8xf32> to vector<8x8x1xf32>
    %227 = vector.broadcast %226 : vector<8x8x1xf32> to vector<8x8x8xf32>
    %228 = arith.subf %224, %227 : vector<8x8x8xf32>
    %229 = math.exp %228 : vector<8x8x8xf32>
    %cst_105 = arith.constant dense<0.000000e+00> : vector<8x8xf32>
    %230 = vector.multi_reduction <add>, %229, %cst_105 [2] : vector<8x8x8xf32> to vector<8x8xf32>
    %231 = vector.shape_cast %230 : vector<8x8xf32> to vector<8x8x1xf32>
    %232 = tpu.reciprocal %231 {approx = true} : vector<8x8x1xf32> -> vector<8x8x1xf32>
    %233 = vector.broadcast %232 : vector<8x8x1xf32> to vector<8x8x8xf32>
    %234 = arith.mulf %229, %233 : vector<8x8x8xf32>
    "tpu.trace_start"() <{level = 10 : i32, message = "bqk,bkd->bqd"}> : () -> ()
    %cst_106 = arith.constant dense<0.000000e+00> : vector<8x8x8xf32>
    %235 = tpu.matmul %234, %221, %cst_106 {dimension_numbers = #tpu.dot_dimension_numbers<[2], [1], [1], [2], [0, 0, 0, 1, 1, 2], [0], [0]>} : vector<8x8x8xf32>, vector<8x8x8xf32>, vector<8x8x8xf32> -> vector<8x8x8xf32>
    "tpu.trace_stop"() : () -> ()
    %236 = vector.extract_strided_slice %235 {offsets = [0, 0, 0], sizes = [2, 8, 8], strides = [1, 1, 1]} : vector<8x8x8xf32> to vector<2x8x8xf32>
    %237 = vector.extract_strided_slice %235 {offsets = [2, 0, 0], sizes = [2, 8, 8], strides = [1, 1, 1]} : vector<8x8x8xf32> to vector<2x8x8xf32>
    %238 = vector.extract_strided_slice %235 {offsets = [4, 0, 0], sizes = [2, 8, 8], strides = [1, 1, 1]} : vector<8x8x8xf32> to vector<2x8x8xf32>
    %239 = vector.extract_strided_slice %235 {offsets = [6, 0, 0], sizes = [2, 8, 8], strides = [1, 1, 1]} : vector<8x8x8xf32> to vector<2x8x8xf32>
    %240 = tpu.concatenate %236, %237, %238, %239 in 2 : vector<2x8x8xf32>, vector<2x8x8xf32>, vector<2x8x8xf32>, vector<2x8x8xf32> -> vector<2x8x32xf32>
    %241 = vector.shape_cast %240 : vector<2x8x32xf32> to vector<16x32xf32>
    %c1_107 = arith.constant 1 : index
    %c0_108 = arith.constant 0 : index
    %c0_109 = arith.constant 0 : index
    %242 = vector.load %arg4[%c1_107, %c0_108, %c0_109] : memref<2x32x32xf32, #tpu.memory_space<vmem>>, vector<1x32x32xf32>
    %243 = vector.shape_cast %242 : vector<1x32x32xf32> to vector<32x32xf32>
    %cst_110 = arith.constant dense<0.000000e+00> : vector<16x32xf32>
    %244 = tpu.matmul %241, %243, %cst_110 {dimension_numbers = #tpu.dot_dimension_numbers<[1], [0], [0], [1], [0, 0, 1, 1], [], []>} : vector<16x32xf32>, vector<32x32xf32>, vector<16x32xf32> -> vector<16x32xf32>
    %c1_111 = arith.constant 1 : index
    %c0_112 = arith.constant 0 : index
    %c0_113 = arith.constant 0 : index
    %245 = vector.load %arg5[%c1_111, %c0_112, %c0_113] : memref<2x1x32xf32, #tpu.memory_space<vmem>>, vector<1x1x32xf32>
    %246 = vector.shape_cast %245 : vector<1x1x32xf32> to vector<1x32xf32>
    %247 = vector.broadcast %246 : vector<1x32xf32> to vector<16x32xf32>
    %248 = arith.addf %244, %247 : vector<16x32xf32>
    %c1_114 = arith.constant 1 : index
    %c0_115 = arith.constant 0 : index
    %c0_116 = arith.constant 0 : index
    %249 = vector.load %arg10[%c1_114, %c0_115, %c0_116] : memref<2x32x8xf32, #tpu.memory_space<vmem>>, vector<1x32x8xf32>
    %250 = vector.shape_cast %249 : vector<1x32x8xf32> to vector<32x8xf32>
    %cst_117 = arith.constant dense<0.000000e+00> : vector<16x8xf32>
    %251 = tpu.matmul %248, %250, %cst_117 {dimension_numbers = #tpu.dot_dimension_numbers<[1], [0], [0], [1], [0, 0, 1, 1], [], []>} : vector<16x32xf32>, vector<32x8xf32>, vector<16x8xf32> -> vector<16x8xf32>
    %c1_118 = arith.constant 1 : index
    %c0_119 = arith.constant 0 : index
    %c0_120 = arith.constant 0 : index
    %252 = vector.load %arg11[%c1_118, %c0_119, %c0_120] : memref<2x1x8xf32, #tpu.memory_space<vmem>>, vector<1x1x8xf32>
    %253 = vector.shape_cast %252 : vector<1x1x8xf32> to vector<1x8xf32>
    %254 = vector.broadcast %253 : vector<1x8xf32> to vector<16x8xf32>
    %255 = arith.addf %251, %254 : vector<16x8xf32>
    %256 = arith.mulf %255, %255 : vector<16x8xf32>
    %257 = arith.mulf %255, %256 : vector<16x8xf32>
    %cst_121 = arith.constant 4.471500e-02 : f32
    %258 = vector.broadcast %cst_121 : f32 to vector<16x8xf32>
    %259 = arith.mulf %258, %257 : vector<16x8xf32>
    %260 = arith.addf %255, %259 : vector<16x8xf32>
    %cst_122 = arith.constant 0.797884583 : f32
    %261 = vector.broadcast %cst_122 : f32 to vector<16x8xf32>
    %262 = arith.mulf %261, %260 : vector<16x8xf32>
    %263 = math.tanh %262 : vector<16x8xf32>
    %cst_123 = arith.constant 1.000000e+00 : f32
    %264 = vector.broadcast %cst_123 : f32 to vector<16x8xf32>
    %265 = arith.addf %264, %263 : vector<16x8xf32>
    %cst_124 = arith.constant 5.000000e-01 : f32
    %266 = vector.broadcast %cst_124 : f32 to vector<16x8xf32>
    %267 = arith.mulf %266, %265 : vector<16x8xf32>
    %268 = arith.mulf %255, %267 : vector<16x8xf32>
    %c1_125 = arith.constant 1 : index
    %c0_126 = arith.constant 0 : index
    %c0_127 = arith.constant 0 : index
    %269 = vector.load %arg12[%c1_125, %c0_126, %c0_127] : memref<2x8x32xf32, #tpu.memory_space<vmem>>, vector<1x8x32xf32>
    %270 = vector.shape_cast %269 : vector<1x8x32xf32> to vector<8x32xf32>
    %cst_128 = arith.constant dense<0.000000e+00> : vector<16x32xf32>
    %271 = tpu.matmul %268, %270, %cst_128 {dimension_numbers = #tpu.dot_dimension_numbers<[1], [0], [0], [1], [0, 0, 1, 1], [], []>} : vector<16x8xf32>, vector<8x32xf32>, vector<16x32xf32> -> vector<16x32xf32>
    %272 = arith.addf %248, %271 : vector<16x32xf32>
    %c1_129 = arith.constant 1 : index
    %c0_130 = arith.constant 0 : index
    %c0_131 = arith.constant 0 : index
    %273 = vector.load %arg13[%c1_129, %c0_130, %c0_131] : memref<2x1x32xf32, #tpu.memory_space<vmem>>, vector<1x1x32xf32>
    %274 = vector.shape_cast %273 : vector<1x1x32xf32> to vector<1x32xf32>
    %275 = vector.broadcast %274 : vector<1x32xf32> to vector<16x32xf32>
    %276 = arith.addf %272, %275 : vector<16x32xf32>
    %277 = arith.addf %193, %276 : vector<16x32xf32>
    %c1_132 = arith.constant 1 : index
    %c0_133 = arith.constant 0 : index
    %c0_134 = arith.constant 0 : index
    %278 = vector.load %arg18[%c1_132, %c0_133, %c0_134] : memref<2x1x32xf32, #tpu.memory_space<vmem>>, vector<1x1x32xf32>
    %279 = vector.shape_cast %278 : vector<1x1x32xf32> to vector<1x32xf32>
    %c1_135 = arith.constant 1 : index
    %c0_136 = arith.constant 0 : index
    %c0_137 = arith.constant 0 : index
    %280 = vector.load %arg19[%c1_135, %c0_136, %c0_137] : memref<2x1x32xf32, #tpu.memory_space<vmem>>, vector<1x1x32xf32>
    %281 = vector.shape_cast %280 : vector<1x1x32xf32> to vector<1x32xf32>
    %cst_138 = arith.constant dense<0.000000e+00> : vector<16xf32>
    %282 = vector.multi_reduction <add>, %277, %cst_138 [1] : vector<16x32xf32> to vector<16xf32>
    %283 = vector.shape_cast %282 : vector<16xf32> to vector<16x1xf32>
    %cst_139 = arith.constant 3.200000e+01 : f32
    %284 = vector.broadcast %cst_139 : f32 to vector<16x1xf32>
    %285 = arith.divf %283, %284 : vector<16x1xf32>
    %286 = vector.broadcast %285 : vector<16x1xf32> to vector<16x32xf32>
    %287 = arith.subf %277, %286 : vector<16x32xf32>
    %288 = arith.mulf %287, %287 : vector<16x32xf32>
    %cst_140 = arith.constant dense<0.000000e+00> : vector<16xf32>
    %289 = vector.multi_reduction <add>, %288, %cst_140 [1] : vector<16x32xf32> to vector<16xf32>
    %290 = vector.shape_cast %289 : vector<16xf32> to vector<16x1xf32>
    %cst_141 = arith.constant 3.200000e+01 : f32
    %291 = vector.broadcast %cst_141 : f32 to vector<16x1xf32>
    %292 = arith.divf %290, %291 : vector<16x1xf32>
    %293 = vector.broadcast %285 : vector<16x1xf32> to vector<16x32xf32>
    %294 = arith.subf %277, %293 : vector<16x32xf32>
    %cst_142 = arith.constant 9.99999974E-6 : f32
    %295 = vector.broadcast %cst_142 : f32 to vector<16x1xf32>
    %296 = arith.addf %292, %295 : vector<16x1xf32>
    %297 = math.rsqrt %296 : vector<16x1xf32>
    %298 = vector.broadcast %297 : vector<16x1xf32> to vector<16x32xf32>
    %299 = arith.mulf %294, %298 : vector<16x32xf32>
    %300 = vector.broadcast %279 : vector<1x32xf32> to vector<16x32xf32>
    %301 = arith.mulf %299, %300 : vector<16x32xf32>
    %302 = vector.broadcast %281 : vector<1x32xf32> to vector<16x32xf32>
    %303 = arith.addf %301, %302 : vector<16x32xf32>
    %c1_143 = arith.constant 1 : index
    %c0_144 = arith.constant 0 : index
    %c0_145 = arith.constant 0 : index
    %304 = vector.load %arg6[%c1_143, %c0_144, %c0_145] : memref<2x32x128xf32, #tpu.memory_space<vmem>>, vector<1x32x128xf32>
    %305 = vector.shape_cast %304 : vector<1x32x128xf32> to vector<32x128xf32>
    %cst_146 = arith.constant dense<0.000000e+00> : vector<16x128xf32>
    %306 = tpu.matmul %303, %305, %cst_146 {dimension_numbers = #tpu.dot_dimension_numbers<[1], [0], [0], [1], [0, 0, 1, 1], [], []>} : vector<16x32xf32>, vector<32x128xf32>, vector<16x128xf32> -> vector<16x128xf32>
    %c1_147 = arith.constant 1 : index
    %c0_148 = arith.constant 0 : index
    %c0_149 = arith.constant 0 : index
    %307 = vector.load %arg7[%c1_147, %c0_148, %c0_149] : memref<2x1x128xf32, #tpu.memory_space<vmem>>, vector<1x1x128xf32>
    %308 = vector.shape_cast %307 : vector<1x1x128xf32> to vector<1x128xf32>
    %309 = vector.broadcast %308 : vector<1x128xf32> to vector<16x128xf32>
    %310 = arith.addf %306, %309 : vector<16x128xf32>
    %311 = arith.mulf %310, %310 : vector<16x128xf32>
    %312 = arith.mulf %310, %311 : vector<16x128xf32>
    %cst_150 = arith.constant 4.471500e-02 : f32
    %313 = vector.broadcast %cst_150 : f32 to vector<16x128xf32>
    %314 = arith.mulf %313, %312 : vector<16x128xf32>
    %315 = arith.addf %310, %314 : vector<16x128xf32>
    %cst_151 = arith.constant 0.797884583 : f32
    %316 = vector.broadcast %cst_151 : f32 to vector<16x128xf32>
    %317 = arith.mulf %316, %315 : vector<16x128xf32>
    %318 = math.tanh %317 : vector<16x128xf32>
    %cst_152 = arith.constant 1.000000e+00 : f32
    %319 = vector.broadcast %cst_152 : f32 to vector<16x128xf32>
    %320 = arith.addf %319, %318 : vector<16x128xf32>
    %cst_153 = arith.constant 5.000000e-01 : f32
    %321 = vector.broadcast %cst_153 : f32 to vector<16x128xf32>
    %322 = arith.mulf %321, %320 : vector<16x128xf32>
    %323 = arith.mulf %310, %322 : vector<16x128xf32>
    %c1_154 = arith.constant 1 : index
    %c0_155 = arith.constant 0 : index
    %c0_156 = arith.constant 0 : index
    %324 = vector.load %arg8[%c1_154, %c0_155, %c0_156] : memref<2x128x32xf32, #tpu.memory_space<vmem>>, vector<1x128x32xf32>
    %325 = vector.shape_cast %324 : vector<1x128x32xf32> to vector<128x32xf32>
    %cst_157 = arith.constant dense<0.000000e+00> : vector<16x32xf32>
    %326 = tpu.matmul %323, %325, %cst_157 {dimension_numbers = #tpu.dot_dimension_numbers<[1], [0], [0], [1], [0, 0, 1, 1], [], []>} : vector<16x128xf32>, vector<128x32xf32>, vector<16x32xf32> -> vector<16x32xf32>
    %c1_158 = arith.constant 1 : index
    %c0_159 = arith.constant 0 : index
    %c0_160 = arith.constant 0 : index
    %327 = vector.load %arg9[%c1_158, %c0_159, %c0_160] : memref<2x1x32xf32, #tpu.memory_space<vmem>>, vector<1x1x32xf32>
    %328 = vector.shape_cast %327 : vector<1x1x32xf32> to vector<1x32xf32>
    %329 = vector.broadcast %328 : vector<1x32xf32> to vector<16x32xf32>
    %330 = arith.addf %326, %329 : vector<16x32xf32>
    %c1_161 = arith.constant 1 : index
    %c0_162 = arith.constant 0 : index
    %c0_163 = arith.constant 0 : index
    %331 = vector.load %arg14[%c1_161, %c0_162, %c0_163] : memref<2x32x8xf32, #tpu.memory_space<vmem>>, vector<1x32x8xf32>
    %332 = vector.shape_cast %331 : vector<1x32x8xf32> to vector<32x8xf32>
    %cst_164 = arith.constant dense<0.000000e+00> : vector<16x8xf32>
    %333 = tpu.matmul %330, %332, %cst_164 {dimension_numbers = #tpu.dot_dimension_numbers<[1], [0], [0], [1], [0, 0, 1, 1], [], []>} : vector<16x32xf32>, vector<32x8xf32>, vector<16x8xf32> -> vector<16x8xf32>
    %c1_165 = arith.constant 1 : index
    %c0_166 = arith.constant 0 : index
    %c0_167 = arith.constant 0 : index
    %334 = vector.load %arg15[%c1_165, %c0_166, %c0_167] : memref<2x1x8xf32, #tpu.memory_space<vmem>>, vector<1x1x8xf32>
    %335 = vector.shape_cast %334 : vector<1x1x8xf32> to vector<1x8xf32>
    %336 = vector.broadcast %335 : vector<1x8xf32> to vector<16x8xf32>
    %337 = arith.addf %333, %336 : vector<16x8xf32>
    %338 = arith.mulf %337, %337 : vector<16x8xf32>
    %339 = arith.mulf %337, %338 : vector<16x8xf32>
    %cst_168 = arith.constant 4.471500e-02 : f32
    %340 = vector.broadcast %cst_168 : f32 to vector<16x8xf32>
    %341 = arith.mulf %340, %339 : vector<16x8xf32>
    %342 = arith.addf %337, %341 : vector<16x8xf32>
    %cst_169 = arith.constant 0.797884583 : f32
    %343 = vector.broadcast %cst_169 : f32 to vector<16x8xf32>
    %344 = arith.mulf %343, %342 : vector<16x8xf32>
    %345 = math.tanh %344 : vector<16x8xf32>
    %cst_170 = arith.constant 1.000000e+00 : f32
    %346 = vector.broadcast %cst_170 : f32 to vector<16x8xf32>
    %347 = arith.addf %346, %345 : vector<16x8xf32>
    %cst_171 = arith.constant 5.000000e-01 : f32
    %348 = vector.broadcast %cst_171 : f32 to vector<16x8xf32>
    %349 = arith.mulf %348, %347 : vector<16x8xf32>
    %350 = arith.mulf %337, %349 : vector<16x8xf32>
    %c1_172 = arith.constant 1 : index
    %c0_173 = arith.constant 0 : index
    %c0_174 = arith.constant 0 : index
    %351 = vector.load %arg16[%c1_172, %c0_173, %c0_174] : memref<2x8x32xf32, #tpu.memory_space<vmem>>, vector<1x8x32xf32>
    %352 = vector.shape_cast %351 : vector<1x8x32xf32> to vector<8x32xf32>
    %cst_175 = arith.constant dense<0.000000e+00> : vector<16x32xf32>
    %353 = tpu.matmul %350, %352, %cst_175 {dimension_numbers = #tpu.dot_dimension_numbers<[1], [0], [0], [1], [0, 0, 1, 1], [], []>} : vector<16x8xf32>, vector<8x32xf32>, vector<16x32xf32> -> vector<16x32xf32>
    %354 = arith.addf %330, %353 : vector<16x32xf32>
    %c1_176 = arith.constant 1 : index
    %c0_177 = arith.constant 0 : index
    %c0_178 = arith.constant 0 : index
    %355 = vector.load %arg17[%c1_176, %c0_177, %c0_178] : memref<2x1x32xf32, #tpu.memory_space<vmem>>, vector<1x1x32xf32>
    %356 = vector.shape_cast %355 : vector<1x1x32xf32> to vector<1x32xf32>
    %357 = vector.broadcast %356 : vector<1x32xf32> to vector<16x32xf32>
    %358 = arith.addf %354, %357 : vector<16x32xf32>
    %359 = arith.addf %303, %358 : vector<16x32xf32>
    %c1_179 = arith.constant 1 : index
    %c0_180 = arith.constant 0 : index
    %c0_181 = arith.constant 0 : index
    %360 = vector.load %arg20[%c1_179, %c0_180, %c0_181] : memref<2x1x32xf32, #tpu.memory_space<vmem>>, vector<1x1x32xf32>
    %361 = vector.shape_cast %360 : vector<1x1x32xf32> to vector<1x32xf32>
    %c1_182 = arith.constant 1 : index
    %c0_183 = arith.constant 0 : index
    %c0_184 = arith.constant 0 : index
    %362 = vector.load %arg21[%c1_182, %c0_183, %c0_184] : memref<2x1x32xf32, #tpu.memory_space<vmem>>, vector<1x1x32xf32>
    %363 = vector.shape_cast %362 : vector<1x1x32xf32> to vector<1x32xf32>
    %cst_185 = arith.constant dense<0.000000e+00> : vector<16xf32>
    %364 = vector.multi_reduction <add>, %359, %cst_185 [1] : vector<16x32xf32> to vector<16xf32>
    %365 = vector.shape_cast %364 : vector<16xf32> to vector<16x1xf32>
    %cst_186 = arith.constant 3.200000e+01 : f32
    %366 = vector.broadcast %cst_186 : f32 to vector<16x1xf32>
    %367 = arith.divf %365, %366 : vector<16x1xf32>
    %368 = vector.broadcast %367 : vector<16x1xf32> to vector<16x32xf32>
    %369 = arith.subf %359, %368 : vector<16x32xf32>
    %370 = arith.mulf %369, %369 : vector<16x32xf32>
    %cst_187 = arith.constant dense<0.000000e+00> : vector<16xf32>
    %371 = vector.multi_reduction <add>, %370, %cst_187 [1] : vector<16x32xf32> to vector<16xf32>
    %372 = vector.shape_cast %371 : vector<16xf32> to vector<16x1xf32>
    %cst_188 = arith.constant 3.200000e+01 : f32
    %373 = vector.broadcast %cst_188 : f32 to vector<16x1xf32>
    %374 = arith.divf %372, %373 : vector<16x1xf32>
    %375 = vector.broadcast %367 : vector<16x1xf32> to vector<16x32xf32>
    %376 = arith.subf %359, %375 : vector<16x32xf32>
    %cst_189 = arith.constant 9.99999974E-6 : f32
    %377 = vector.broadcast %cst_189 : f32 to vector<16x1xf32>
    %378 = arith.addf %374, %377 : vector<16x1xf32>
    %379 = math.rsqrt %378 : vector<16x1xf32>
    %380 = vector.broadcast %379 : vector<16x1xf32> to vector<16x32xf32>
    %381 = arith.mulf %376, %380 : vector<16x32xf32>
    %382 = vector.broadcast %361 : vector<1x32xf32> to vector<16x32xf32>
    %383 = arith.mulf %381, %382 : vector<16x32xf32>
    %384 = vector.broadcast %363 : vector<1x32xf32> to vector<16x32xf32>
    %385 = arith.addf %383, %384 : vector<16x32xf32>
    %386 = vector.shape_cast %385 : vector<16x32xf32> to vector<2x8x32xf32>
    %387 = vector.extract_strided_slice %386 {offsets = [0, 0, 0], sizes = [2, 1, 32], strides = [1, 1, 1]} : vector<2x8x32xf32> to vector<2x1x32xf32>
    %388 = vector.shape_cast %387 : vector<2x1x32xf32> to vector<2x32xf32>
    %c0_190 = arith.constant 0 : index
    %c0_191 = arith.constant 0 : index
    %389 = vector.load %arg22[%c0_190, %c0_191] : memref<32x32xf32, #tpu.memory_space<vmem>>, vector<32x32xf32>
    %cst_192 = arith.constant dense<0.000000e+00> : vector<2x32xf32>
    %390 = tpu.matmul %388, %389, %cst_192 {dimension_numbers = #tpu.dot_dimension_numbers<[1], [0], [0], [1], [0, 0, 1, 1], [], []>} : vector<2x32xf32>, vector<32x32xf32>, vector<2x32xf32> -> vector<2x32xf32>
    %c0_193 = arith.constant 0 : index
    %c0_194 = arith.constant 0 : index
    %391 = vector.load %arg23[%c0_193, %c0_194] : memref<1x32xf32, #tpu.memory_space<vmem>>, vector<1x32xf32>
    %392 = vector.broadcast %391 : vector<1x32xf32> to vector<2x32xf32>
    %393 = arith.addf %390, %392 : vector<2x32xf32>
    %394 = math.tanh %393 : vector<2x32xf32>
    %c0_195 = arith.constant 0 : index
    %c0_196 = arith.constant 0 : index
    %395 = vector.load %arg24[%c0_195, %c0_196] : memref<32x128xf32, #tpu.memory_space<vmem>>, vector<32x128xf32>
    %cst_197 = arith.constant dense<0.000000e+00> : vector<2x128xf32>
    %396 = tpu.matmul %394, %395, %cst_197 {dimension_numbers = #tpu.dot_dimension_numbers<[1], [0], [0], [1], [0, 0, 1, 1], [], []>} : vector<2x32xf32>, vector<32x128xf32>, vector<2x128xf32> -> vector<2x128xf32>
    %c0_198 = arith.constant 0 : index
    %c0_199 = arith.constant 0 : index
    %397 = vector.load %arg25[%c0_198, %c0_199] : memref<1x128xf32, #tpu.memory_space<vmem>>, vector<1x128xf32>
    %398 = vector.broadcast %397 : vector<1x128xf32> to vector<2x128xf32>
    %399 = arith.addf %396, %398 : vector<2x128xf32>
    %c0_200 = arith.constant 0 : index
    %c0_201 = arith.constant 0 : index
    %400 = vector.load %arg26[%c0_200, %c0_201] : memref<2x128xf32, #tpu.memory_space<vmem>>, vector<2x128xf32>
    tpu.vector_store %arg26[%c0_200, %c0_201], %399 {strides = array<i32>} : memref<2x128xf32, #tpu.memory_space<vmem>>, vector<2x128xf32>,
    return
  }
}

</mosaic_0001>

<bundles_post_ra>
// kernel: adapter_roberta_classifier.1
= control target key start
LH: loop header
LB: loop body
LE: loop exit
PB: predicated region body
PF: predicated region fallthrough
CT: control target
= control target key end

     0   :  { %s8013_s0 = inlined_call_operand.hbm [shape: f32[16,32], index: 0, kind: input, shape index: {}]   ;;  %s8014_s1 = inlined_call_operand.hbm [shape: f32[8,1,8], index: 1, kind: input, shape index: {}]   ;;  %s8015_s2 = inlined_call_operand.hbm [shape: f32[2,32,384], index: 2, kind: input, shape index: {}]   ;;  %s8016_s3 = inlined_call_operand.hbm [shape: f32[2,1,384], index: 3, kind: input, shape index: {}]   ;;  %s8017_s4 = inlined_call_operand.hbm [shape: f32[2,32,32], index: 4, kind: input, shape index: {}]   ;;  %s8018_s5 = inlined_call_operand.hbm [shape: f32[2,1,32], index: 5, kind: input, shape index: {}]   ;;  %s8019_s6 = inlined_call_operand.hbm [shape: f32[2,32,128], index: 6, kind: input, shape index: {}]   ;;  %s8020_s7 = inlined_call_operand.hbm [shape: f32[2,1,128], index: 7, kind: input, shape index: {}]   ;;  %s8021_s8 = inlined_call_operand.hbm [shape: f32[2,128,32], index: 8, kind: input, shape index: {}]   ;;  %s8022_s9 = inlined_call_operand.hbm [shape: f32[2,1,32], index: 9, kind: input, shape index: {}]   ;;  %s8023_s10 = inlined_call_operand.hbm [shape: f32[2,32,8], index: 10, kind: input, shape index: {}]   ;;  %s8024_s11 = inlined_call_operand.hbm [shape: f32[2,1,8], index: 11, kind: input, shape index: {}]   ;;  %s8025_s12 = inlined_call_operand.hbm [shape: f32[2,8,32], index: 12, kind: input, shape index: {}]   ;;  %s8026_s13 = inlined_call_operand.hbm [shape: f32[2,1,32], index: 13, kind: input, shape index: {}]   ;;  %s8027_s14 = inlined_call_operand.hbm [shape: f32[2,32,8], index: 14, kind: input, shape index: {}]   ;;  %s8028_s15 = inlined_call_operand.hbm [shape: f32[2,1,8], index: 15, kind: input, shape index: {}]   ;;  %s8029_s16 = inlined_call_operand.hbm [shape: f32[2,8,32], index: 16, kind: input, shape index: {}]   ;;  %s8030_s17 = inlined_call_operand.hbm [shape: f32[2,1,32], index: 17, kind: input, shape index: {}]   ;;  %s8031_s18 = inlined_call_operand.hbm [shape: f32[2,1,32], index: 18, kind: input, shape index: {}]   ;;  %s8032_s19 = inlined_call_operand.hbm [shape: f32[2,1,32], index: 19, kind: input, shape index: {}]   ;;  %s8033_s20 = inlined_call_operand.hbm [shape: f32[2,1,32], index: 20, kind: input, shape index: {}]   ;;  %s8034_s21 = inlined_call_operand.hbm [shape: f32[2,1,32], index: 21, kind: input, shape index: {}]   ;;  %s8035_s22 = inlined_call_operand.hbm [shape: f32[32,32], index: 22, kind: input, shape index: {}]   ;;  %s8036_s23 = inlined_call_operand.hbm [shape: f32[1,32], index: 23, kind: input, shape index: {}]   ;;  %s8037_s24 = inlined_call_operand.hbm [shape: f32[32,128], index: 24, kind: input, shape index: {}]   ;;  %s8038_s25 = inlined_call_operand.hbm [shape: f32[1,128], index: 25, kind: input, shape index: {}]   ;;  %s8039_s26 = inlined_call_operand.hbm [shape: f32[2,128], index: 26, kind: output, shape index: {}]  }
   0x1   :  { %8058 = sst [smem:[#allocation59_spill]] %s8013_s0 }
   0x2   :  { %8059 = sst [smem:[#allocation60_spill]] %s8014_s1 }
   0x3   :  { %8060 = sst [smem:[#allocation61_spill]] %s8015_s2 }
   0x4   :  { %8061 = sst [smem:[#allocation62_spill]] %s8016_s3 }
   0x5   :  { %8062 = sst [smem:[#allocation63_spill]] %s8017_s4 }
   0x6   :  { %8063 = sst [smem:[#allocation64_spill]] %s8018_s5 }
   0x7   :  { %8064 = sst [smem:[#allocation65_spill]] %s8019_s6 }
   0x8   :  { %8065 = sst [smem:[#allocation66_spill]] %s8020_s7 }
   0x9   :  { %8066 = sst [smem:[#allocation67_spill]] %s8021_s8 }
   0xa   :  { %8067 = sst [smem:[#allocation68_spill]] %s8022_s9 }
   0xb   :  { %8068 = sst [smem:[#allocation69_spill]] %s8023_s10 }
   0xc   :  { %8069 = sst [smem:[#allocation70_spill]] %s8037_s24 }
   0xd   :  { %8070 = sst [smem:[#allocation71_spill]] %s8038_s25 }
   0xe   :  { %8071 = sst [smem:[#allocation72_spill]] %s8039_s26 }
   0xf   :  { %31 = vsyncpa [#allocation3], 0 }
  0x10   :  { %32 = vsyncpa [#allocation6], 0 }
  0x11   :  { %33 = vsyncpa [#allocation9], 0 }
  0x12   :  { %34 = vsyncpa [#allocation12], 0 }
  0x13   :  { %35 = vsyncpa [#allocation15], 0 }
  0x14   :  { %36 = vsyncpa [#allocation18], 0 }
  0x15   :  { %37 = vsyncpa [#allocation21], 0 }
  0x16   :  { %38 = vsyncpa [#allocation24], 0 }
  0x17   :  { %39 = vsyncpa [#allocation27], 0 }
  0x18   :  { %40 = vsyncpa [#allocation30], 0 }
  0x19   :  { %41 = vsyncpa [#allocation33], 0 }
  0x1a   :  { %42 = vsyncpa [#allocation36], 0 }
  0x1b   :  { %43 = vsyncpa [#allocation39], 0 }
  0x1c   :  { %44 = vsyncpa [#allocation42], 0 }
  0x1d   :  { %45 = vsyncpa [#allocation4], 0  ;;  %s7000_s27 = smov [#allocation5]   ;;  %s8072_s8 = sld [smem:[#allocation60_spill]] }
  0x1e   :  { %s63_s3 = sshll.u32 %s7000_s27, 4  ;;  %s64_s3 = int_to_ptr.vmem [resolvable:$true] %s63_s3 }
  0x23   :  { %s6376_s4 = scalar_lea.hbm %s8072_s8, 128 }
  0x24   :  { %p6377_p0 = scmp.ne.s32.totalorder %s8072_s8, %s6376_s4  ;;  %p6380_p1 = scmp.lt.u32.totalorder %s6376_s4, %s8072_s8 }
  0x26   :  { %p6382_p2 = pnand %p6380_p1, %p6377_p0 }
  0x28   :  { %6385 = shalt.err (!%p6382_p2)
}
  0x29   :  { %s6386_s2 = scalar_lea.vmem %s64_s3, 128  ;;  %p6391_p4 = scmp.lt.s32.totalorder %s64_s3, %s64_s3 }
  0x2a   :  { %p6387_p3 = scmp.ne.s32.totalorder %s64_s3, %s6386_s2  ;;  %p6392_p5 = scmp.lt.s32.totalorder %s6386_s2, %s6386_s2 }
  0x2c   :  { %p6393_p6 = por %p6392_p5, %p6391_p4 }
  0x2e   :  { %p6394_p7 = pnand %p6393_p6, %p6387_p3 }
  0x30   :  { %6397 = shalt.err (!%p6394_p7)
}
  0x31   :  { %s8053_s5 = smov 16   ;;  %s8055_s10 = smov 1  }
  0x32   :  { %69 = dma.hbm_to_vmem [thread:$0]  %s8072_s8, 128, %s64_s3, [#allocation6], %s8053_s5, %s8053_s5, %s8055_s10  }
  0x33   :  { %s7003_s27 = smov [#allocation8]   ;;  %s8073_s29 = sld [smem:[#allocation62_spill]] }
  0x34   :  { %s87_s7 = sshll.u32 %s7003_s27, 4  ;;  %s88_s7 = int_to_ptr.vmem [resolvable:$true] %s87_s7 }
  0x39   :  { %s6398_s0 = scalar_lea.hbm %s8073_s29, 96 }
  0x3a   :  { %p6399_p8 = scmp.ne.s32.totalorder %s8073_s29, %s6398_s0  ;;  %p6402_p9 = scmp.lt.u32.totalorder %s6398_s0, %s8073_s29 }
  0x3c   :  { %p6404_p10 = pnand %p6402_p9, %p6399_p8 }
  0x3e   :  { %6407 = shalt.err (!%p6404_p10)
}
  0x3f   :  { %s6408_s25 = scalar_lea.vmem %s88_s7, 96  ;;  %p6413_p12 = scmp.lt.s32.totalorder %s88_s7, %s88_s7 }
  0x40   :  { %p6409_p11 = scmp.ne.s32.totalorder %s88_s7, %s6408_s25  ;;  %p6414_p13 = scmp.lt.s32.totalorder %s6408_s25, %s6408_s25 }
  0x42   :  { %p6415_p0 = por %p6414_p13, %p6413_p12 }
  0x44   :  { %p6416_p1 = pnand %p6415_p0, %p6409_p11 }
  0x46   :  { %6419 = shalt.err (!%p6416_p1)
}
  0x47   :  { %s7004_s3 = smov 48   ;;  %s7005_s8 = smov 3  }
  0x48   :  { %93 = dma.hbm_to_vmem [thread:$0]  %s8073_s29, 96, %s88_s7, [#allocation9], %s7004_s3, %s7004_s3, %s7005_s8  }
  0x49   :  { %s7006_s27 = smov [#allocation11]   ;;  %s7007_s4 = smov [#allocation14]  }
  0x4a   :  { %s111_s28 = sshll.u32 %s7006_s27, 4  ;;  %s135_s26 = sshll.u32 %s7007_s4, 4  ;;  %s112_s28 = int_to_ptr.vmem [resolvable:$true] %s111_s28  ;;  %s7203_s26 = int_to_ptr.vmem [resolvable:$true] %s135_s26 }
  0x4b   :  { %s8074_s30 = sld [smem:[#allocation64_spill]] }
  0x51   :  { %s6420_s25 = scalar_lea.hbm %s8074_s30, 32 }
  0x52   :  { %p6421_p2 = scmp.ne.s32.totalorder %s8074_s30, %s6420_s25  ;;  %p6424_p3 = scmp.lt.u32.totalorder %s6420_s25, %s8074_s30 }
  0x54   :  { %p6426_p4 = pnand %p6424_p3, %p6421_p2 }
  0x56   :  { %6429 = shalt.err (!%p6426_p4)
}
  0x57   :  { %s6430_s7 = scalar_lea.vmem %s112_s28, 32  ;;  %p6435_p6 = scmp.lt.s32.totalorder %s112_s28, %s112_s28 }
  0x58   :  { %p6431_p5 = scmp.ne.s32.totalorder %s112_s28, %s6430_s7  ;;  %p6436_p7 = scmp.lt.s32.totalorder %s6430_s7, %s6430_s7 }
  0x5a   :  { %p6437_p8 = por %p6436_p7, %p6435_p6 }
  0x5c   :  { %p6438_p9 = pnand %p6437_p8, %p6431_p5 }
  0x5e   :  { %6441 = shalt.err (!%p6438_p9)
}
  0x5f   :  { %s8075_s29 = smov 1   ;;  %s8076_s3 = smov 16  }
  0x60   :  { %117 = dma.hbm_to_vmem [thread:$0]  %s8074_s30, 32, %s112_s28, [#allocation12], %s8076_s3, %s8076_s3, %s8075_s29  }
  0x61   :  { %s8077_s24 = sld [smem:[#allocation66_spill]] }
  0x67   :  { %s6442_s10 = scalar_lea.hbm %s8077_s24, 32 }
  0x68   :  { %p6443_p10 = scmp.ne.s32.totalorder %s8077_s24, %s6442_s10  ;;  %p6446_p11 = scmp.lt.u32.totalorder %s6442_s10, %s8077_s24 }
  0x6a   :  { %p6448_p12 = pnand %p6446_p11, %p6443_p10 }
  0x6c   :  { %6451 = shalt.err (!%p6448_p12)
}
  0x6d   :  { %s6452_s25 = scalar_lea.vmem %s7203_s26, 32  ;;  %p6457_p0 = scmp.lt.s32.totalorder %s7203_s26, %s7203_s26 }
  0x6e   :  { %p6453_p13 = scmp.ne.s32.totalorder %s7203_s26, %s6452_s25  ;;  %p6458_p1 = scmp.lt.s32.totalorder %s6452_s25, %s6452_s25 }
  0x70   :  { %p6459_p2 = por %p6458_p1, %p6457_p0 }
  0x72   :  { %p6460_p3 = pnand %p6459_p2, %p6453_p13 }
  0x74   :  { %6463 = shalt.err (!%p6460_p3)
}
  0x75   :  { %141 = dma.hbm_to_vmem [thread:$0]  %s8077_s24, 32, %s7203_s26, [#allocation15], %s8076_s3, %s8076_s3, %s8075_s29  }
  0x76   :  { %s7008_s2 = smov [#allocation17]   ;;  %s7009_s8 = smov [#allocation20]  }
  0x77   :  { %s159_s7 = sshll.u32 %s7008_s2, 4  ;;  %s183_s6 = sshll.u32 %s7009_s8, 4  ;;  %s160_s7 = int_to_ptr.vmem [resolvable:$true] %s159_s7  ;;  %s7240_s6 = int_to_ptr.vmem [resolvable:$true] %s183_s6 }
  0x78   :  { %s8078_s10 = sld [smem:[#allocation68_spill]] }
  0x7e   :  { %s6464_s27 = scalar_lea.hbm %s8078_s10, 32 }
  0x7f   :  { %p6465_p4 = scmp.ne.s32.totalorder %s8078_s10, %s6464_s27  ;;  %p6468_p5 = scmp.lt.u32.totalorder %s6464_s27, %s8078_s10 }
  0x81   :  { %p6470_p6 = pnand %p6468_p5, %p6465_p4 }
  0x83   :  { %6473 = shalt.err (!%p6470_p6)
}
  0x84   :  { %s6474_s26 = scalar_lea.vmem %s160_s7, 32  ;;  %p6479_p8 = scmp.lt.s32.totalorder %s160_s7, %s160_s7 }
  0x85   :  { %p6475_p7 = scmp.ne.s32.totalorder %s160_s7, %s6474_s26  ;;  %p6480_p9 = scmp.lt.s32.totalorder %s6474_s26, %s6474_s26 }
  0x87   :  { %p6481_p10 = por %p6480_p9, %p6479_p8 }
  0x89   :  { %p6482_p11 = pnand %p6481_p10, %p6475_p7 }
  0x8b   :  { %6485 = shalt.err (!%p6482_p11)
}
  0x8c   :  { %165 = dma.hbm_to_vmem [thread:$0]  %s8078_s10, 32, %s160_s7, [#allocation18], %s8076_s3, %s8076_s3, %s8075_s29  }
  0x8d   :  { %s6486_s8 = scalar_lea.hbm %s8024_s11, 32 }
  0x8e   :  { %p6487_p12 = scmp.ne.s32.totalorder %s8024_s11, %s6486_s8  ;;  %p6490_p13 = scmp.lt.u32.totalorder %s6486_s8, %s8024_s11 }
  0x90   :  { %p6492_p0 = pnand %p6490_p13, %p6487_p12 }
  0x92   :  { %6495 = shalt.err (!%p6492_p0)
}
  0x93   :  { %s6496_s0 = scalar_lea.vmem %s7240_s6, 32  ;;  %p6501_p2 = scmp.lt.s32.totalorder %s7240_s6, %s7240_s6 }
  0x94   :  { %p6497_p1 = scmp.ne.s32.totalorder %s7240_s6, %s6496_s0  ;;  %p6502_p3 = scmp.lt.s32.totalorder %s6496_s0, %s6496_s0 }
  0x96   :  { %p6503_p4 = por %p6502_p3, %p6501_p2 }
  0x98   :  { %p6504_p5 = pnand %p6503_p4, %p6497_p1 }
  0x9a   :  { %6507 = shalt.err (!%p6504_p5)
}
  0x9b   :  { %189 = dma.hbm_to_vmem [thread:$0]  %s8024_s11, 32, %s7240_s6, [#allocation21], %s8076_s3, %s8076_s3, %s8075_s29  }
  0x9c   :  { %s7010_s9 = smov [#allocation23]   ;;  %s7011_s26 = smov [#allocation26]  }
  0x9d   :  { %s207_s25 = sshll.u32 %s7010_s9, 4  ;;  %s231_s24 = sshll.u32 %s7011_s26, 4  ;;  %s208_s25 = int_to_ptr.vmem [resolvable:$true] %s207_s25  ;;  %s7277_s24 = int_to_ptr.vmem [resolvable:$true] %s231_s24 }
  0x9e   :  { %s6508_s2 = scalar_lea.hbm %s8026_s13, 32 }
  0x9f   :  { %p6509_p6 = scmp.ne.s32.totalorder %s8026_s13, %s6508_s2  ;;  %p6512_p7 = scmp.lt.u32.totalorder %s6508_s2, %s8026_s13 }
  0xa1   :  { %p6514_p8 = pnand %p6512_p7, %p6509_p6 }
  0xa3   :  { %6517 = shalt.err (!%p6514_p8)
}
  0xa4   :  { %s6518_s11 = scalar_lea.vmem %s208_s25, 32  ;;  %p6523_p10 = scmp.lt.s32.totalorder %s208_s25, %s208_s25 }
  0xa5   :  { %p6519_p9 = scmp.ne.s32.totalorder %s208_s25, %s6518_s11  ;;  %p6524_p11 = scmp.lt.s32.totalorder %s6518_s11, %s6518_s11 }
  0xa7   :  { %p6525_p12 = por %p6524_p11, %p6523_p10 }
  0xa9   :  { %p6526_p13 = pnand %p6525_p12, %p6519_p9 }
  0xab   :  { %6529 = shalt.err (!%p6526_p13)
}
  0xac   :  { %213 = dma.hbm_to_vmem [thread:$0]  %s8026_s13, 32, %s208_s25, [#allocation24], %s8076_s3, %s8076_s3, %s8075_s29  }
  0xad   :  { %s6530_s10 = scalar_lea.hbm %s8028_s15, 32 }
  0xae   :  { %p6531_p0 = scmp.ne.s32.totalorder %s8028_s15, %s6530_s10  ;;  %p6534_p1 = scmp.lt.u32.totalorder %s6530_s10, %s8028_s15 }
  0xb0   :  { %p6536_p2 = pnand %p6534_p1, %p6531_p0 }
  0xb2   :  { %6539 = shalt.err (!%p6536_p2)
}
  0xb3   :  { %s6540_s2 = scalar_lea.vmem %s7277_s24, 32  ;;  %p6545_p4 = scmp.lt.s32.totalorder %s7277_s24, %s7277_s24 }
  0xb4   :  { %p6541_p3 = scmp.ne.s32.totalorder %s7277_s24, %s6540_s2  ;;  %p6546_p5 = scmp.lt.s32.totalorder %s6540_s2, %s6540_s2 }
  0xb6   :  { %p6547_p6 = por %p6546_p5, %p6545_p4 }
  0xb8   :  { %p6548_p7 = pnand %p6547_p6, %p6541_p3 }
  0xba   :  { %6551 = shalt.err (!%p6548_p7)
}
  0xbb   :  { %237 = dma.hbm_to_vmem [thread:$0]  %s8028_s15, 32, %s7277_s24, [#allocation27], %s8076_s3, %s8076_s3, %s8075_s29  }
  0xbc   :  { %s7012_s8 = smov [#allocation29]   ;;  %s7013_s1 = smov [#allocation32]  }
  0xbd   :  { %s255_s5 = sshll.u32 %s7012_s8, 4  ;;  %s279_s27 = sshll.u32 %s7013_s1, 4  ;;  %s256_s5 = int_to_ptr.vmem [resolvable:$true] %s255_s5  ;;  %s7314_s27 = int_to_ptr.vmem [resolvable:$true] %s279_s27 }
  0xbe   :  { %s6552_s4 = scalar_lea.hbm %s8030_s17, 32 }
  0xbf   :  { %p6553_p8 = scmp.ne.s32.totalorder %s8030_s17, %s6552_s4  ;;  %p6556_p9 = scmp.lt.u32.totalorder %s6552_s4, %s8030_s17 }
  0xc1   :  { %p6558_p10 = pnand %p6556_p9, %p6553_p8 }
  0xc3   :  { %6561 = shalt.err (!%p6558_p10)
}
  0xc4   :  { %s6562_s15 = scalar_lea.vmem %s256_s5, 32  ;;  %p6567_p12 = scmp.lt.s32.totalorder %s256_s5, %s256_s5 }
  0xc5   :  { %p6563_p11 = scmp.ne.s32.totalorder %s256_s5, %s6562_s15  ;;  %p6568_p13 = scmp.lt.s32.totalorder %s6562_s15, %s6562_s15 }
  0xc7   :  { %p6569_p0 = por %p6568_p13, %p6567_p12 }
  0xc9   :  { %p6570_p1 = pnand %p6569_p0, %p6563_p11 }
  0xcb   :  { %6573 = shalt.err (!%p6570_p1)
}
  0xcc   :  { %261 = dma.hbm_to_vmem [thread:$0]  %s8030_s17, 32, %s256_s5, [#allocation30], %s8076_s3, %s8076_s3, %s8075_s29  }
  0xcd   :  { %s6574_s2 = scalar_lea.hbm %s8032_s19, 32 }
  0xce   :  { %p6575_p2 = scmp.ne.s32.totalorder %s8032_s19, %s6574_s2  ;;  %p6578_p3 = scmp.lt.u32.totalorder %s6574_s2, %s8032_s19 }
  0xd0   :  { %p6580_p4 = pnand %p6578_p3, %p6575_p2 }
  0xd2   :  { %6583 = shalt.err (!%p6580_p4)
}
  0xd3   :  { %s6584_s11 = scalar_lea.vmem %s7314_s27, 32  ;;  %p6589_p6 = scmp.lt.s32.totalorder %s7314_s27, %s7314_s27 }
  0xd4   :  { %p6585_p5 = scmp.ne.s32.totalorder %s7314_s27, %s6584_s11  ;;  %p6590_p7 = scmp.lt.s32.totalorder %s6584_s11, %s6584_s11 }
  0xd6   :  { %p6591_p8 = por %p6590_p7, %p6589_p6 }
  0xd8   :  { %p6592_p9 = pnand %p6591_p8, %p6585_p5 }
  0xda   :  { %6595 = shalt.err (!%p6592_p9)
}
  0xdb   :  { %285 = dma.hbm_to_vmem [thread:$0]  %s8032_s19, 32, %s7314_s27, [#allocation33], %s8076_s3, %s8076_s3, %s8075_s29  }
  0xdc   :  { %s7014_s6 = smov [#allocation35]   ;;  %s7015_s0 = smov [#allocation38]  }
  0xdd   :  { %s303_s4 = sshll.u32 %s7014_s6, 4  ;;  %s328_s7 = sshll.u32 %s7015_s0, 4  ;;  %s304_s4 = int_to_ptr.vmem [resolvable:$true] %s303_s4  ;;  %s329_s7 = int_to_ptr.vmem [resolvable:$true] %s328_s7 }
  0xde   :  { %s6596_s15 = scalar_lea.hbm %s8034_s21, 32 }
  0xdf   :  { %p6597_p10 = scmp.ne.s32.totalorder %s8034_s21, %s6596_s15  ;;  %p6600_p11 = scmp.lt.u32.totalorder %s6596_s15, %s8034_s21 }
  0xe1   :  { %p6602_p12 = pnand %p6600_p11, %p6597_p10 }
  0xe3   :  { %6605 = shalt.err (!%p6602_p12)
}
  0xe4   :  { %s6606_s19 = scalar_lea.vmem %s304_s4, 32  ;;  %p6611_p0 = scmp.lt.s32.totalorder %s304_s4, %s304_s4 }
  0xe5   :  { %p6607_p13 = scmp.ne.s32.totalorder %s304_s4, %s6606_s19  ;;  %p6612_p1 = scmp.lt.s32.totalorder %s6606_s19, %s6606_s19 }
  0xe7   :  { %p6613_p2 = por %p6612_p1, %p6611_p0 }
  0xe9   :  { %p6614_p3 = pnand %p6613_p2, %p6607_p13 }
  0xeb   :  { %6617 = shalt.err (!%p6614_p3)
}
  0xec   :  { %309 = dma.hbm_to_vmem [thread:$0]  %s8034_s21, 32, %s304_s4, [#allocation36], %s8076_s3, %s8076_s3, %s8075_s29  }
  0xed   :  { %s6618_s8 = scalar_lea.hbm %s8036_s23, 16 }
  0xee   :  { %p6619_p4 = scmp.ne.s32.totalorder %s8036_s23, %s6618_s8  ;;  %p6622_p5 = scmp.lt.u32.totalorder %s6618_s8, %s8036_s23 }
  0xf0   :  { %p6624_p6 = pnand %p6622_p5, %p6619_p4 }
  0xf2   :  { %6627 = shalt.err (!%p6624_p6)
}
  0xf3   :  { %s6628_s6 = scalar_lea.vmem %s329_s7, 16  ;;  %s6632_s0 = scalar_lea.vmem %s329_s7, 32 }
  0xf4   :  { %p6629_p7 = scmp.ne.s32.totalorder %s329_s7, %s6628_s6  ;;  %p6633_p8 = scmp.lt.s32.totalorder %s329_s7, %s329_s7 }
  0xf5   :  { %p6634_p9 = scmp.lt.s32.totalorder %s6632_s0, %s6628_s6 }
  0xf7   :  { %p6635_p10 = por %p6634_p9, %p6633_p8 }
  0xf9   :  { %p6636_p11 = pnand %p6635_p10, %p6629_p7 }
  0xfb   :  { %6639 = shalt.err (!%p6636_p11)
}
  0xfc   :  { %331 = dma.hbm_to_vmem [thread:$0]  %s8036_s23, 16, %s329_s7, [#allocation39]  }
  0xfd   :  { %s7016_s10 = smov [#allocation2]   ;;  %s8079_s26 = sld [smem:[#allocation59_spill]] }
  0xfe   :  { %s51_s9 = sshll.u32 %s7016_s10, 4  ;;  %s52_s9 = int_to_ptr.vmem [resolvable:$true] %s51_s9 }
 0x103   :  { %s6640_s28 = scalar_lea.hbm %s8079_s26, 256 }
 0x104   :  { %p6641_p12 = scmp.ne.s32.totalorder %s8079_s26, %s6640_s28  ;;  %p6644_p13 = scmp.lt.u32.totalorder %s6640_s28, %s8079_s26 }
 0x106   :  { %p6646_p0 = pnand %p6644_p13, %p6641_p12 }
 0x108   :  { %6649 = shalt.err (!%p6646_p0)
}
 0x109   :  { %s6650_s13 = scalar_lea.vmem %s52_s9, 256  ;;  %p6655_p2 = scmp.lt.s32.totalorder %s52_s9, %s52_s9 }
 0x10a   :  { %p6651_p1 = scmp.ne.s32.totalorder %s52_s9, %s6650_s13  ;;  %p6656_p3 = scmp.lt.s32.totalorder %s6650_s13, %s6650_s13 }
 0x10c   :  { %p6657_p4 = por %p6656_p3, %p6655_p2 }
 0x10e   :  { %p6658_p5 = pnand %p6657_p4, %p6651_p1 }
 0x110   :  { %6661 = shalt.err (!%p6658_p5)
}
 0x111   :  { %s7017_s23 = smov 128   ;;  %s7018_s7 = smov 8  }
 0x112   :  { %57 = dma.hbm_to_vmem [thread:$0]  %s8079_s26, 256, %s52_s9, [#allocation3], %s7017_s23, %s7017_s23, %s7018_s7  }
 0x113   :  { %s7019_s1 = smov [#allocation7]   ;;  %s8080_s6 = sld [smem:[#allocation61_spill]] }
 0x114   :  { %s75_s11 = sshll.u32 %s7019_s1, 4  ;;  %s76_s11 = int_to_ptr.vmem [resolvable:$true] %s75_s11 }
 0x119   :  { %s6662_s0 = scalar_lea.hbm %s8080_s6, 3072 }
 0x11a   :  { %p6663_p6 = scmp.ne.s32.totalorder %s8080_s6, %s6662_s0  ;;  %p6666_p7 = scmp.lt.u32.totalorder %s6662_s0, %s8080_s6 }
 0x11c   :  { %p6668_p8 = pnand %p6666_p7, %p6663_p6 }
 0x11e   :  { %6671 = shalt.err (!%p6668_p8)
}
 0x11f   :  { %s6672_s24 = scalar_lea.vmem %s76_s11, 3072  ;;  %p6677_p10 = scmp.lt.s32.totalorder %s76_s11, %s76_s11 }
 0x120   :  { %p6673_p9 = scmp.ne.s32.totalorder %s76_s11, %s6672_s24  ;;  %p6678_p11 = scmp.lt.s32.totalorder %s6672_s24, %s6672_s24 }
 0x122   :  { %p6679_p12 = por %p6678_p11, %p6677_p10 }
 0x124   :  { %p6680_p13 = pnand %p6679_p12, %p6673_p9 }
 0x126   :  { %6683 = shalt.err (!%p6680_p13)
}
 0x127   :  { %s7020_s9 = smov 384   ;;  %s7021_s26 = smov 24  }
 0x128   :  { %81 = dma.hbm_to_vmem [thread:$0]  %s8080_s6, 3072, %s76_s11, [#allocation6], %s7020_s9, %s7020_s9, %s7021_s26  }
 0x129   :  { %s7022_s19 = smov [#allocation10]   ;;  %s7023_s2 = smov [#allocation13]  }
 0x12a   :  { %s99_s27 = sshll.u32 %s7022_s19, 4  ;;  %s123_s13 = sshll.u32 %s7023_s2, 4  ;;  %s100_s27 = int_to_ptr.vmem [resolvable:$true] %s99_s27  ;;  %s7406_s13 = int_to_ptr.vmem [resolvable:$true] %s123_s13 }
 0x12b   :  { %s8081_s1 = sld [smem:[#allocation63_spill]] }
 0x131   :  { %s6684_s17 = scalar_lea.hbm %s8081_s1, 1024 }
 0x132   :  { %p6685_p0 = scmp.ne.s32.totalorder %s8081_s1, %s6684_s17  ;;  %p6688_p1 = scmp.lt.u32.totalorder %s6684_s17, %s8081_s1 }
 0x134   :  { %p6690_p2 = pnand %p6688_p1, %p6685_p0 }
 0x136   :  { %6693 = shalt.err (!%p6690_p2)
}
 0x137   :  { %s6694_s11 = scalar_lea.vmem %s100_s27, 1024  ;;  %p6699_p4 = scmp.lt.s32.totalorder %s100_s27, %s100_s27 }
 0x138   :  { %p6695_p3 = scmp.ne.s32.totalorder %s100_s27, %s6694_s11  ;;  %p6700_p5 = scmp.lt.s32.totalorder %s6694_s11, %s6694_s11 }
 0x13a   :  { %p6701_p6 = por %p6700_p5, %p6699_p4 }
 0x13c   :  { %p6702_p7 = pnand %p6701_p6, %p6695_p3 }
 0x13e   :  { %6705 = shalt.err (!%p6702_p7)
}
 0x13f   :  { %105 = dma.hbm_to_vmem [thread:$0]  %s8081_s1, 1024, %s100_s27, [#allocation9], %s7017_s23, %s7017_s23, %s7018_s7  }
 0x140   :  { %s8082_s9 = sld [smem:[#allocation65_spill]] }
 0x146   :  { %s6706_s28 = scalar_lea.hbm %s8082_s9, 1024 }
 0x147   :  { %p6707_p8 = scmp.ne.s32.totalorder %s8082_s9, %s6706_s28  ;;  %p6710_p9 = scmp.lt.u32.totalorder %s6706_s28, %s8082_s9 }
 0x149   :  { %p6712_p10 = pnand %p6710_p9, %p6707_p8 }
 0x14b   :  { %6715 = shalt.err (!%p6712_p10)
}
 0x14c   :  { %s6716_s8 = scalar_lea.vmem %s7406_s13, 1024  ;;  %p6721_p12 = scmp.lt.s32.totalorder %s7406_s13, %s7406_s13 }
 0x14d   :  { %p6717_p11 = scmp.ne.s32.totalorder %s7406_s13, %s6716_s8  ;;  %p6722_p13 = scmp.lt.s32.totalorder %s6716_s8, %s6716_s8 }
 0x14f   :  { %p6723_p0 = por %p6722_p13, %p6721_p12 }
 0x151   :  { %p6724_p1 = pnand %p6723_p0, %p6717_p11 }
 0x153   :  { %6727 = shalt.err (!%p6724_p1)
}
 0x154   :  { %129 = dma.hbm_to_vmem [thread:$0]  %s8082_s9, 1024, %s7406_s13, [#allocation12], %s7017_s23, %s7017_s23, %s7018_s7  }
 0x155   :  { %s7024_s17 = smov [#allocation16]   ;;  %s7025_s0 = smov [#allocation19]  }
 0x156   :  { %s147_s5 = sshll.u32 %s7024_s17, 4  ;;  %s171_s21 = sshll.u32 %s7025_s0, 4  ;;  %s148_s5 = int_to_ptr.vmem [resolvable:$true] %s147_s5  ;;  %s7443_s21 = int_to_ptr.vmem [resolvable:$true] %s171_s21 }
 0x157   :  { %s8083_s6 = sld [smem:[#allocation67_spill]] }
 0x15d   :  { %s6728_s10 = scalar_lea.hbm %s8083_s6, 4096 }
 0x15e   :  { %p6729_p2 = scmp.ne.s32.totalorder %s8083_s6, %s6728_s10  ;;  %p6732_p3 = scmp.lt.u32.totalorder %s6728_s10, %s8083_s6 }
 0x160   :  { %p6734_p4 = pnand %p6732_p3, %p6729_p2 }
 0x162   :  { %6737 = shalt.err (!%p6734_p4)
}
 0x163   :  { %s6738_s13 = scalar_lea.vmem %s148_s5, 4096  ;;  %p6743_p6 = scmp.lt.s32.totalorder %s148_s5, %s148_s5 }
 0x164   :  { %p6739_p5 = scmp.ne.s32.totalorder %s148_s5, %s6738_s13  ;;  %p6744_p7 = scmp.lt.s32.totalorder %s6738_s13, %s6738_s13 }
 0x166   :  { %p6745_p8 = por %p6744_p7, %p6743_p6 }
 0x168   :  { %p6746_p9 = pnand %p6745_p8, %p6739_p5 }
 0x16a   :  { %6749 = shalt.err (!%p6746_p9)
}
 0x16b   :  { %153 = dma.hbm_to_vmem [thread:$0]  %s8083_s6, 4096, %s148_s5, [#allocation15], %s7017_s23, %s7017_s23, %s7018_s7  }
 0x16c   :  { %s8084_s8 = sld [smem:[#allocation69_spill]] }
 0x172   :  { %s6750_s27 = scalar_lea.hbm %s8084_s8, 1024 }
 0x173   :  { %p6751_p10 = scmp.ne.s32.totalorder %s8084_s8, %s6750_s27  ;;  %p6754_p11 = scmp.lt.u32.totalorder %s6750_s27, %s8084_s8 }
 0x175   :  { %p6756_p12 = pnand %p6754_p11, %p6751_p10 }
 0x177   :  { %6759 = shalt.err (!%p6756_p12)
}
 0x178   :  { %s6760_s11 = scalar_lea.vmem %s7443_s21, 1024  ;;  %p6765_p0 = scmp.lt.s32.totalorder %s7443_s21, %s7443_s21 }
 0x179   :  { %p6761_p13 = scmp.ne.s32.totalorder %s7443_s21, %s6760_s11  ;;  %p6766_p1 = scmp.lt.s32.totalorder %s6760_s11, %s6760_s11 }
 0x17b   :  { %p6767_p2 = por %p6766_p1, %p6765_p0 }
 0x17d   :  { %p6768_p3 = pnand %p6767_p2, %p6761_p13 }
 0x17f   :  { %6771 = shalt.err (!%p6768_p3)
}
 0x180   :  { %177 = dma.hbm_to_vmem [thread:$0]  %s8084_s8, 1024, %s7443_s21, [#allocation18], %s7017_s23, %s7017_s23, %s7018_s7  }
 0x181   :  { %s7026_s10 = smov [#allocation22]   ;;  %s7027_s24 = smov [#allocation25]  }
 0x182   :  { %s195_s15 = sshll.u32 %s7026_s10, 4  ;;  %s219_s28 = sshll.u32 %s7027_s24, 4  ;;  %s196_s15 = int_to_ptr.vmem [resolvable:$true] %s195_s15  ;;  %s7480_s28 = int_to_ptr.vmem [resolvable:$true] %s219_s28 }
 0x183   :  { %s6772_s9 = scalar_lea.hbm %s8025_s12, 256 }
 0x184   :  { %p6773_p4 = scmp.ne.s32.totalorder %s8025_s12, %s6772_s9  ;;  %p6776_p5 = scmp.lt.u32.totalorder %s6772_s9, %s8025_s12 }
 0x186   :  { %p6778_p6 = pnand %p6776_p5, %p6773_p4 }
 0x188   :  { %6781 = shalt.err (!%p6778_p6)
}
 0x189   :  { %s6782_s21 = scalar_lea.vmem %s196_s15, 256  ;;  %p6787_p8 = scmp.lt.s32.totalorder %s196_s15, %s196_s15 }
 0x18a   :  { %p6783_p7 = scmp.ne.s32.totalorder %s196_s15, %s6782_s21  ;;  %p6788_p9 = scmp.lt.s32.totalorder %s6782_s21, %s6782_s21 }
 0x18c   :  { %p6789_p10 = por %p6788_p9, %p6787_p8 }
 0x18e   :  { %p6790_p11 = pnand %p6789_p10, %p6783_p7 }
 0x190   :  { %6793 = shalt.err (!%p6790_p11)
}
 0x191   :  { %201 = dma.hbm_to_vmem [thread:$0]  %s8025_s12, 256, %s196_s15, [#allocation21], %s7017_s23, %s7017_s23, %s7018_s7  }
 0x192   :  { %s6794_s4 = scalar_lea.hbm %s8027_s14, 1024 }
 0x193   :  { %p6795_p12 = scmp.ne.s32.totalorder %s8027_s14, %s6794_s4  ;;  %p6798_p13 = scmp.lt.u32.totalorder %s6794_s4, %s8027_s14 }
 0x195   :  { %p6800_p0 = pnand %p6798_p13, %p6795_p12 }
 0x197   :  { %6803 = shalt.err (!%p6800_p0)
}
 0x198   :  { %s6804_s24 = scalar_lea.vmem %s7480_s28, 1024  ;;  %p6809_p2 = scmp.lt.s32.totalorder %s7480_s28, %s7480_s28 }
 0x199   :  { %p6805_p1 = scmp.ne.s32.totalorder %s7480_s28, %s6804_s24  ;;  %p6810_p3 = scmp.lt.s32.totalorder %s6804_s24, %s6804_s24 }
 0x19b   :  { %p6811_p4 = por %p6810_p3, %p6809_p2 }
 0x19d   :  { %p6812_p5 = pnand %p6811_p4, %p6805_p1 }
 0x19f   :  { %6815 = shalt.err (!%p6812_p5)
}
 0x1a0   :  { %225 = dma.hbm_to_vmem [thread:$0]  %s8027_s14, 1024, %s7480_s28, [#allocation24], %s7017_s23, %s7017_s23, %s7018_s7  }
 0x1a1   :  { %s7028_s30 = smov [#allocation28]   ;;  %s7029_s9 = smov [#allocation31]  }
 0x1a2   :  { %s243_s13 = sshll.u32 %s7028_s30, 4  ;;  %s267_s19 = sshll.u32 %s7029_s9, 4  ;;  %s244_s13 = int_to_ptr.vmem [resolvable:$true] %s243_s13  ;;  %s7517_s19 = int_to_ptr.vmem [resolvable:$true] %s267_s19 }
 0x1a3   :  { %s6816_s27 = scalar_lea.hbm %s8029_s16, 256 }
 0x1a4   :  { %p6817_p6 = scmp.ne.s32.totalorder %s8029_s16, %s6816_s27  ;;  %p6820_p7 = scmp.lt.u32.totalorder %s6816_s27, %s8029_s16 }
 0x1a6   :  { %p6822_p8 = pnand %p6820_p7, %p6817_p6 }
 0x1a8   :  { %6825 = shalt.err (!%p6822_p8)
}
 0x1a9   :  { %s6826_s14 = scalar_lea.vmem %s244_s13, 256  ;;  %p6831_p10 = scmp.lt.s32.totalorder %s244_s13, %s244_s13 }
 0x1aa   :  { %p6827_p9 = scmp.ne.s32.totalorder %s244_s13, %s6826_s14  ;;  %p6832_p11 = scmp.lt.s32.totalorder %s6826_s14, %s6826_s14 }
 0x1ac   :  { %p6833_p12 = por %p6832_p11, %p6831_p10 }
 0x1ae   :  { %p6834_p13 = pnand %p6833_p12, %p6827_p9 }
 0x1b0   :  { %6837 = shalt.err (!%p6834_p13)
}
 0x1b1   :  { %249 = dma.hbm_to_vmem [thread:$0]  %s8029_s16, 256, %s244_s13, [#allocation27], %s7017_s23, %s7017_s23, %s7018_s7  }
 0x1b2   :  { %s6838_s5 = scalar_lea.hbm %s8031_s18, 32 }
 0x1b3   :  { %p6839_p0 = scmp.ne.s32.totalorder %s8031_s18, %s6838_s5  ;;  %p6842_p1 = scmp.lt.u32.totalorder %s6838_s5, %s8031_s18 }
 0x1b5   :  { %p6844_p2 = pnand %p6842_p1, %p6839_p0 }
 0x1b7   :  { %6847 = shalt.err (!%p6844_p2)
}
 0x1b8   :  { %s6848_s15 = scalar_lea.vmem %s7517_s19, 32  ;;  %p6853_p4 = scmp.lt.s32.totalorder %s7517_s19, %s7517_s19 }
 0x1b9   :  { %p6849_p3 = scmp.ne.s32.totalorder %s7517_s19, %s6848_s15  ;;  %p6854_p5 = scmp.lt.s32.totalorder %s6848_s15, %s6848_s15 }
 0x1bb   :  { %p6855_p6 = por %p6854_p5, %p6853_p4 }
 0x1bd   :  { %p6856_p7 = pnand %p6855_p6, %p6849_p3 }
 0x1bf   :  { %6859 = shalt.err (!%p6856_p7)
}
 0x1c0   :  { %273 = dma.hbm_to_vmem [thread:$0]  %s8031_s18, 32, %s7517_s19, [#allocation30], %s8076_s3, %s8076_s3, %s8075_s29  }
 0x1c1   :  { %s7030_s13 = smov [#allocation34]   ;;  %s7031_s2 = smov [#allocation37]  }
 0x1c2   :  { %s291_s9 = sshll.u32 %s7030_s13, 4  ;;  %s315_s25 = sshll.u32 %s7031_s2, 4  ;;  %s292_s9 = int_to_ptr.vmem [resolvable:$true] %s291_s9  ;;  %s7554_s25 = int_to_ptr.vmem [resolvable:$true] %s315_s25 }
 0x1c3   :  { %s6860_s8 = scalar_lea.hbm %s8033_s20, 32 }
 0x1c4   :  { %p6861_p8 = scmp.ne.s32.totalorder %s8033_s20, %s6860_s8  ;;  %p6864_p9 = scmp.lt.u32.totalorder %s6860_s8, %s8033_s20 }
 0x1c6   :  { %p6866_p10 = pnand %p6864_p9, %p6861_p8 }
 0x1c8   :  { %6869 = shalt.err (!%p6866_p10)
}
 0x1c9   :  { %s6870_s18 = scalar_lea.vmem %s292_s9, 32  ;;  %p6875_p12 = scmp.lt.s32.totalorder %s292_s9, %s292_s9 }
 0x1ca   :  { %p6871_p11 = scmp.ne.s32.totalorder %s292_s9, %s6870_s18  ;;  %p6876_p13 = scmp.lt.s32.totalorder %s6870_s18, %s6870_s18 }
 0x1cc   :  { %p6877_p0 = por %p6876_p13, %p6875_p12 }
 0x1ce   :  { %p6878_p1 = pnand %p6877_p0, %p6871_p11 }
 0x1d0   :  { %6881 = shalt.err (!%p6878_p1)
}
 0x1d1   :  { %297 = dma.hbm_to_vmem [thread:$0]  %s8033_s20, 32, %s292_s9, [#allocation33], %s8076_s3, %s8076_s3, %s8075_s29  }
 0x1d2   :  { %s6882_s5 = scalar_lea.hbm %s8035_s22, 512 }
 0x1d3   :  { %p6883_p2 = scmp.ne.s32.totalorder %s8035_s22, %s6882_s5  ;;  %p6886_p3 = scmp.lt.u32.totalorder %s6882_s5, %s8035_s22 }
 0x1d5   :  { %p6888_p4 = pnand %p6886_p3, %p6883_p2 }
 0x1d7   :  { %6891 = shalt.err (!%p6888_p4)
}
 0x1d8   :  { %s6892_s15 = scalar_lea.vmem %s7554_s25, 512  ;;  %p6897_p6 = scmp.lt.s32.totalorder %s7554_s25, %s7554_s25 }
 0x1d9   :  { %p6893_p5 = scmp.ne.s32.totalorder %s7554_s25, %s6892_s15  ;;  %p6898_p7 = scmp.lt.s32.totalorder %s6892_s15, %s6892_s15 }
 0x1db   :  { %p6899_p8 = por %p6898_p7, %p6897_p6 }
 0x1dd   :  { %p6900_p9 = pnand %p6899_p8, %p6893_p5 }
 0x1df   :  { %6903 = shalt.err (!%p6900_p9)
}
 0x1e0   :  { %321 = dma.hbm_to_vmem [thread:$0]  %s8035_s22, 512, %s7554_s25, [#allocation36], %s7017_s23, %s7017_s23, %s7018_s7  }
 0x1e1   :  { %s7032_s16 = smov [#allocation40]   ;;  %s7033_s13 = smov [#allocation41]  }
 0x1e2   :  { %s337_s30 = sshll.u32 %s7032_s16, 4  ;;  %s350_s9 = sshll.u32 %s7033_s13, 4  ;;  %s338_s30 = int_to_ptr.vmem [resolvable:$true] %s337_s30  ;;  %s351_s9 = int_to_ptr.vmem [resolvable:$true] %s350_s9 }
 0x1e3   :  { %s8085_s21 = sld [smem:[#allocation70_spill]] }
 0x1e9   :  { %s6904_s8 = scalar_lea.hbm %s8085_s21, 512 }
 0x1ea   :  { %p6905_p10 = scmp.ne.s32.totalorder %s8085_s21, %s6904_s8  ;;  %p6908_p11 = scmp.lt.u32.totalorder %s6904_s8, %s8085_s21 }
 0x1ec   :  { %p6910_p12 = pnand %p6908_p11, %p6905_p10 }
 0x1ee   :  { %6913 = shalt.err (!%p6910_p12)
}
 0x1ef   :  { %s6914_s22 = scalar_lea.vmem %s338_s30, 512  ;;  %p6919_p0 = scmp.lt.s32.totalorder %s338_s30, %s338_s30 }
 0x1f0   :  { %p6915_p13 = scmp.ne.s32.totalorder %s338_s30, %s6914_s22  ;;  %p6920_p1 = scmp.lt.s32.totalorder %s6914_s22, %s6914_s22 }
 0x1f2   :  { %p6921_p2 = por %p6920_p1, %p6919_p0 }
 0x1f4   :  { %p6922_p3 = pnand %p6921_p2, %p6915_p13 }
 0x1f6   :  { %6925 = shalt.err (!%p6922_p3)
}
 0x1f7   :  { %343 = dma.hbm_to_vmem [thread:$0]  %s8085_s21, 512, %s338_s30, [#allocation39], %s7017_s23, %s7017_s23, %s7018_s7  }
 0x1f8   :  { %s8086_s4 = sld [smem:[#allocation71_spill]] }
 0x1fe   :  { %s6926_s11 = scalar_lea.hbm %s8086_s4, 16 }
 0x1ff   :  { %p6927_p4 = scmp.ne.s32.totalorder %s8086_s4, %s6926_s11  ;;  %p6930_p5 = scmp.lt.u32.totalorder %s6926_s11, %s8086_s4 }
 0x201   :  { %p6932_p6 = pnand %p6930_p5, %p6927_p4 }
 0x203   :  { %6935 = shalt.err (!%p6932_p6)
}
 0x204   :  { %s6936_s12 = scalar_lea.vmem %s351_s9, 16  ;;  %s6940_s15 = scalar_lea.vmem %s351_s9, 32 }
 0x205   :  { %p6937_p7 = scmp.ne.s32.totalorder %s351_s9, %s6936_s12  ;;  %p6941_p8 = scmp.lt.s32.totalorder %s351_s9, %s351_s9 }
 0x206   :  { %p6942_p9 = scmp.lt.s32.totalorder %s6940_s15, %s6936_s12 }
 0x208   :  { %p6943_p10 = por %p6942_p9, %p6941_p8 }
 0x20a   :  { %p6944_p11 = pnand %p6943_p10, %p6937_p7 }
 0x20c   :  { %6947 = shalt.err (!%p6944_p11)
}
 0x20d   :  { %353 = dma.hbm_to_vmem [thread:$0]  %s8086_s4, 16, %s351_s9, [#allocation42]  }
 0x20e   :  { %6970 = dma.done.wait [#allocation3], 256  }
 0x20f   :  { %6971 = vsyncadd [#allocation3], 4294967040 }
 0x210   :  { %6972 = dma.done.wait [#allocation6], 3200  }
 0x211   :  { %6973 = vsyncadd [#allocation6], 4294964096 }
 0x212   :  { %6974 = dma.done.wait [#allocation9], 1120  }
 0x213   :  { %6975 = vsyncadd [#allocation9], 4294966176 }
 0x214   :  { %6976 = dma.done.wait [#allocation12], 1056  }
 0x215   :  { %6977 = vsyncadd [#allocation12], 4294966240 }
 0x216   :  { %6978 = dma.done.wait [#allocation15], 4128  }
 0x217   :  { %6979 = vsyncadd [#allocation15], 4294963168 }
 0x218   :  { %6980 = dma.done.wait [#allocation18], 1056  }
 0x219   :  { %6981 = vsyncadd [#allocation18], 4294966240 }
 0x21a   :  { %6982 = dma.done.wait [#allocation21], 288  }
 0x21b   :  { %6983 = vsyncadd [#allocation21], 4294967008 }
 0x21c   :  { %6984 = dma.done.wait [#allocation24], 1056  }
 0x21d   :  { %6985 = vsyncadd [#allocation24], 4294966240 }
 0x21e   :  { %6986 = dma.done.wait [#allocation27], 288  }
 0x21f   :  { %6987 = vsyncadd [#allocation27], 4294967008 }
 0x220   :  { %6988 = dma.done.wait [#allocation30], 64  }
 0x221   :  { %6989 = vsyncadd [#allocation30], 4294967232 }
 0x222   :  { %6990 = dma.done.wait [#allocation33], 64  }
 0x223   :  { %6991 = vsyncadd [#allocation33], 4294967232 }
 0x224   :  { %6992 = dma.done.wait [#allocation36], 544  }
 0x225   :  { %6993 = vsyncadd [#allocation36], 4294966752 }
 0x226   :  { %6994 = dma.done.wait [#allocation39], 528  }
 0x227   :  { %6995 = vsyncadd [#allocation39], 4294966768 }
 0x228   :  { %6996 = dma.done.wait [#allocation42], 16  }
 0x229   :  { %6997 = vsyncadd [#allocation42], 4294967280  ;;  %v7034_v0 = vmov 0.0   ;;  %v443_v1 = vld [vmem:[#allocation7 + $0x8] sm:$0xff]  ;;  %v446_v2 = vld [vmem:[#allocation7 + $0x20] sm:$0xff]  ;;  %vm471_vm0 = vcmask 261120   ;;  %v456_v21 = vlaneseq }
 0x22a   :  { %542 = vmatprep.mubr.f32.mxu0 %v7034_v0  ;;  %v442_v3 = vld [vmem:[#allocation7] sm:$0xff]  ;;  %v6049_v4 = vpack.c.bf16 %v446_v2, %v443_v1  ;;  %v445_v5 = vld [vmem:[#allocation7 + $0x18] sm:$0xff]  ;;  %v452_v7 = vld [vmem:[#allocation7 + $0x50] sm:$0xff]  ;;  %vm7035_vm1 = vmmov 0   ;;  %vm726_vm2 = vcmask 64512   ;;  %s7036_s29 = smov 120  }
 0x22b   :  { %v449_v6 = vld [vmem:[#allocation7 + $0x38] sm:$0xff]  ;;  %v6051_v8 = vpack.c.bf16 %v445_v5, %v442_v3  ;;  %v448_v10 = vld [vmem:[#allocation7 + $0x30] sm:$0xff]  ;;  %v451_v11 = vld [vmem:[#allocation7 + $0x48] sm:$0xff]  ;;  %v7638_v22 = vshrl.u32 %v456_v21, 7  ;;  %s7037_s16 = smov 112   ;;  %s7038_s30 = smov 104  }
 0x22c   :  { %v6053_v9 = vpack.c.bf16 %v452_v7, %v449_v6  ;;  %v7619_v12 = vld [vmem:[#allocation2] sm:$0xff]  ;;  %6050 = vmatprep.subr.bf16.mxu0 %v6049_v4  ;;  %v444_v13 = vld [vmem:[#allocation7 + $0x10] sm:$0xff]  ;;  %v6055_v15 = vpack.c.bf16 %v451_v11, %v448_v10  ;;  %v450_v17 = vld [vmem:[#allocation7 + $0x40] sm:$0xff]  ;;  %vm2017_vm3 = vcmask 130048   ;;  %vm2020_vm4 = vcmask 195584  }
 0x22d   :  { %v447_v14 = vld [vmem:[#allocation7 + $0x28] sm:$0xff]  ;;  %5675 = vmatprep.mubr.msk.f32.mxu1 %vm471_vm0, %v7619_v12  ;;  %6052 = vmatpush1.bf16.msra.mxu0 %v6051_v8  ;;  %v453_v18 = vld [vmem:[#allocation7 + $0x58] sm:$0xff]  ;;  %v7627_v20 = vld [vmem:[#allocation2 + $0x8] sm:$0xff]  ;;  %v458_v23 = vsub.s32 0, %v7638_v22  ;;  %v462_v25 = vsub.s32 1, %v7638_v22  ;;  %v466_v44 = vsub.s32 2, %v7638_v22 }
 0x22e   :  { %v6057_v16 = vpack.c.bf16 %v447_v14, %v444_v13  ;;  %6054 = vmatprep.subr.bf16.mxu0 %v6053_v9  ;;  %v6061_v19 = vpack.c.bf16 %v453_v18, %v450_v17  ;;  %v454_v24 = vld [vmem:[#allocation8] sm:$0x7]  ;;  %v5375_v54 = vld [vmem:[#allocation5] ss:$0 sm:$0xff]  ;;  %v5376_v58 = vld [vmem:[#allocation5 + $0x1] ss:$0 sm:$0xff] }
 0x22f   :  { %v459_v26 = vrot.slane %v454_v24, %v458_v23  ;;  %v463_v27 = vrot.slane %v454_v24, %v462_v25  ;;  %v467_v47 = vrot.slane %v454_v24, %v466_v44  ;;  %v5377_v1 = vld [vmem:[#allocation5 + $0x2] ss:$0 sm:$0xff]  ;;  %v5378_v6 = vld [vmem:[#allocation5 + $0x3] ss:$0 sm:$0xff]  ;;  %v5379_v7 = vld [vmem:[#allocation5 + $0x4] ss:$0 sm:$0xff] }
 0x230   :  { %6058 = vmatprep.subr.bf16.mxu1 %v6057_v16  ;;  %v5382_v24 = vld [vmem:[#allocation5 + $0x7] ss:$0 sm:$0xff]  ;;  %vm5183_vm5 = vcmask 1041409  }
 0x231   :  { %6060 = vmatpush3.bf16.msra.mxu1 %v6057_v16  ;;  %6056 = vmatpush1.bf16.msra.mxu0 %v6055_v15  ;;  %v5380_v15 = vld [vmem:[#allocation5 + $0x5] ss:$0 sm:$0xff] }
 0x232   :  { %6062 = vmatprep.subr.bf16.mxu1 %v6061_v19  ;;  %5683 = vmatprep.subr.mxu0 %v7034_v0 }
 0x234   :  { %5371 = vmatmul.mubr.msk.f32.vlgmr.msra.gmra.mrb[0].mxu0 %vm471_vm0, %v7619_v12 }
 0x235   :  { %6064 = vmatpush3.bf16.msra.mxu1 %v6061_v19  ;;  %548 = vmatprep.mubr.f32.mxu0 %v7034_v0 }
 0x236   :  { %5678 = vmatprep.subr.mxu1 %v7034_v0 }
 0x238   :  { %5676 = vmatmul.mubr.msk.f32.vlgmr.msra.gmra.mrb[0].mxu1 %vm471_vm0, %v7627_v20  ;;  %5372 = vmatmul.mubr.msk.f32.gmra.mrb[2].mxu0 %vm471_vm0, %v7627_v20 }
 0x239   :  { %5680 = vmatprep.mubr.msk.f32.mxu1 %vm7035_vm1, %v7034_v0  ;;  %5685 = vmatprep.mubr.msk.f32.mxu0 %vm7035_vm1, %v7034_v0 }
 0x307   :  { %v544_v28 = vpop.f32.mrb[0].mxu0 }
 0x308   :  { %v545_v29 = vadd.f32 %v544_v28, %v459_v26  ;;  %v546_v30 = vpop.f32.mrb[1].mxu0 }
 0x309   :  { %v547_v31 = vadd.f32 %v546_v30, %v463_v27 }
 0x30a   :  { %632 = vrot.lane.b32.xlu1 %v545_v29, %s7036_s29 }
 0x30b   :  { %v550_v32 = vpop.f32.mrb[2].mxu0  ;;  %646 = vrot.lane.b32.xlu0 %v547_v31, %s7036_s29  ;;  %5679 = vmatpush3.xpose.msk.msra.mxu1 %vm726_vm2, %v547_v31  ;;  %v5677_v36 = vpop.f32.mrb[0].mxu1 }
 0x30c   :  { %v551_v33 = vadd.f32 %v550_v32, %v459_v26  ;;  %v552_v34 = vpop.f32.mrb[3].mxu0  ;;  %5688 = vmatprep.subr.mxu1 %v7034_v0  ;;  %v621_v37 = vpop.f32.mrb[1].mxu1  ;;  %v7691_v50 = vadd.f32 %v5677_v36, %v467_v47 }
 0x30d   :  { %v553_v35 = vadd.f32 %v552_v34, %v463_v27  ;;  %v7695_v51 = vadd.f32 %v621_v37, %v467_v47  ;;  %v5381_v27 = vld [vmem:[#allocation5 + $0x6] ss:$0 sm:$0xff] }
 0x30e   :  { %634 = vrot.lane.b32.xlu1 %v551_v33, %s7036_s29  ;;  %5681 = vmatmul.mubr.msk.f32.vlgmr.msra.gmra.mrb[2].mxu1 %vm726_vm2, %v545_v29 }
 0x30f   :  { %5684 = vmatpush3.xpose.msk.msra.mxu0 %vm726_vm2, %v553_v35  ;;  %650 = vrot.lane.b32.xlu0 %v547_v31, %s7037_s16 }
 0x310   :  { %5690 = vmatprep.mubr.msk.f32.mxu1 %vm7035_vm1, %v7034_v0  ;;  %5693 = vmatprep.subr.mxu0 %v7034_v0 }
 0x312   :  { %5686 = vmatmul.mubr.msk.f32.vlgmr.msra.gmra.mrb[4].mxu0 %vm726_vm2, %v551_v33  ;;  %638 = vrot.lane.b32.xlu1 %v551_v33, %s7037_s16 }
 0x313   :  { %648 = vrot.lane.b32.xlu0 %v553_v35, %s7036_s29  ;;  %5695 = vmatprep.mubr.msk.f32.mxu0 %vm7035_vm1, %v7034_v0 }
 0x316   :  { %652 = vrot.lane.b32.xlu1 %v553_v35, %s7037_s16 }
 0x317   :  { %636 = vrot.lane.b32.xlu0 %v545_v29, %s7037_s16 }
 0x31a   :  { %656 = vrot.lane.b32.xlu1 %v553_v35, %s7038_s30 }
 0x31b   :  { %654 = vrot.lane.b32.xlu0 %v547_v31, %s7038_s30 }
 0x31e   :  { %642 = vrot.lane.b32.xlu1 %v551_v33, %s7038_s30 }
 0x31f   :  { %640 = vrot.lane.b32.xlu0 %v545_v29, %s7038_s30 }
 0x37c   :  { %v633_v38 = vpop.permute.xlu1 %632 }
 0x37d   :  { %v647_v39 = vpop.permute.xlu0 %646 }
 0x37e   :  { %5689 = vmatpush3.xpose.msk.msra.mxu1 %vm726_vm2, %v647_v39 }
 0x37f   :  { %5698 = vmatprep.subr.mxu1 %v7034_v0 }
 0x380   :  { %v635_v40 = vpop.permute.xlu1 %634 }
 0x381   :  { %v651_v41 = vpop.permute.xlu0 %650  ;;  %5691 = vmatmul.mubr.msk.f32.vlgmr.msra.gmra.mrb[4].mxu1 %vm726_vm2, %v633_v38 }
 0x382   :  { %5699 = vmatpush3.xpose.msk.msra.mxu1 %vm726_vm2, %v651_v41  ;;  %5700 = vmatprep.mubr.msk.f32.mxu1 %vm7035_vm1, %v7034_v0 }
 0x383   :  { %5708 = vmatprep.subr.mxu1 %v7034_v0 }
 0x384   :  { %v639_v42 = vpop.permute.xlu1 %638 }
 0x385   :  { %v649_v43 = vpop.permute.xlu0 %648 }
 0x386   :  { %5694 = vmatpush3.xpose.msk.msra.mxu0 %vm726_vm2, %v649_v43 }
 0x387   :  { %5703 = vmatprep.subr.mxu0 %v7034_v0 }
 0x388   :  { %v653_v45 = vpop.permute.xlu1 %652 }
 0x389   :  { %v637_v46 = vpop.permute.xlu0 %636  ;;  %5696 = vmatmul.mubr.msk.f32.vlgmr.msra.gmra.mrb[6].mxu0 %vm726_vm2, %v635_v40 }
 0x38a   :  { %5701 = vmatmul.mubr.msk.f32.vlgmr.msra.gmra.mrb[6].mxu1 %vm726_vm2, %v637_v46  ;;  %5704 = vmatpush3.xpose.msk.msra.mxu0 %vm726_vm2, %v653_v45 }
 0x38b   :  { %5705 = vmatprep.mubr.msk.f32.mxu0 %vm7035_vm1, %v7034_v0  ;;  %5713 = vmatprep.subr.mxu0 %v7034_v0 }
 0x38c   :  { %v657_v48 = vpop.permute.xlu1 %656  ;;  %5710 = vmatprep.mubr.msk.f32.mxu1 %vm7035_vm1, %v7034_v0 }
 0x38d   :  { %v655_v49 = vpop.permute.xlu0 %654  ;;  %5706 = vmatmul.mubr.msk.f32.vlgmr.msra.gmra.mrb[8].mxu0 %vm726_vm2, %v639_v42 }
 0x38e   :  { %5709 = vmatpush3.xpose.msk.msra.mxu1 %vm726_vm2, %v655_v49  ;;  %5714 = vmatpush3.xpose.msk.msra.mxu0 %vm726_vm2, %v657_v48 }
 0x38f   :  { %5715 = vmatprep.mubr.msk.f32.mxu0 %vm7035_vm1, %v7034_v0  ;;  %5718 = vmatprep.subr.mxu1 %v7034_v0 }
 0x390   :  { %v643_v52 = vpop.permute.xlu1 %642  ;;  %5723 = vmatprep.subr.mxu0 %v7034_v0 }
 0x391   :  { %v641_v53 = vpop.permute.xlu0 %640  ;;  %5716 = vmatmul.mubr.msk.f32.vlgmr.msra.gmra.mrb[10].mxu0 %vm726_vm2, %v643_v52 }
 0x392   :  { %5711 = vmatmul.mubr.msk.f32.vlgmr.msra.gmra.mrb[8].mxu1 %vm726_vm2, %v641_v53  ;;  %5724 = vmatpush3.msra.mxu0 %v7691_v50 }
 0x393   :  { %5719 = vmatpush3.msra.mxu1 %v7695_v51  ;;  %5725 = vmatprep.mubr.msk.f32.mxu0 %vm7035_vm1, %v7034_v0 }
 0x394   :  { %5733 = vmatprep.subr.mxu0 %v7034_v0  ;;  %5720 = vmatprep.mubr.msk.f32.mxu1 %vm7035_vm1, %v7034_v0 }
 0x395   :  { %5728 = vmatprep.subr.mxu1 %v7034_v0 }
 0x3e1   :  { %v797_v55 = vpop.f32.mrb[2].mxu1 }
 0x3e2   :  { %v798_v56 = vadd.f32 %v5375_v54, %v797_v55  ;;  %v5682_v57 = vpop.f32.mrb[3].mxu1 }
 0x3e4   :  { %v1319_v59 = vsel %vm726_vm2, %v798_v56, -inf }
 0x3e5   :  { %v871_v60 = vpop.f32.mrb[4].mxu0  ;;  %1320 = vmax.xlane.f32.xlu0 %v1319_v59 }
 0x3e6   :  { %v872_v61 = vadd.f32 %v5376_v58, %v871_v60  ;;  %v5687_v62 = vpop.f32.mrb[5].mxu0 }
 0x3e8   :  { %v1322_v63 = vsel %vm726_vm2, %v872_v61, -inf }
 0x3e9   :  { %1323 = vmax.xlane.f32.xlu1 %v1322_v63 }
 0x454   :  { %v945_v2 = vpop.f32.mrb[4].mxu1 }
 0x455   :  { %v946_v3 = vadd.f32 %v5377_v1, %v945_v2  ;;  %v5692_v4 = vpop.f32.mrb[5].mxu1 }
 0x457   :  { %v1325_v5 = vsel %vm726_vm2, %v946_v3, -inf }
 0x458   :  { %1326 = vmax.xlane.f32.xlu0 %v1325_v5 }
 0x45c   :  { %v1019_v8 = vpop.f32.mrb[6].mxu0 }
 0x45d   :  { %v1020_v9 = vadd.f32 %v5378_v6, %v1019_v8  ;;  %v5697_v10 = vpop.f32.mrb[7].mxu0  ;;  %v1093_v11 = vpop.f32.mrb[6].mxu1 }
 0x45e   :  { %v1094_v13 = vadd.f32 %v5379_v7, %v1093_v11  ;;  %v5702_v14 = vpop.f32.mrb[7].mxu1 }
 0x45f   :  { %v1328_v16 = vsel %vm726_vm2, %v1020_v9, -inf }
 0x460   :  { %v1167_v17 = vpop.f32.mrb[8].mxu0  ;;  %1329 = vmax.xlane.f32.xlu0 %v1328_v16  ;;  %v1331_v18 = vsel %vm726_vm2, %v1094_v13, -inf }
 0x461   :  { %v1168_v19 = vadd.f32 %v5380_v15, %v1167_v17  ;;  %v5707_v21 = vpop.f32.mrb[9].mxu0  ;;  %1332 = vmax.xlane.f32.xlu1 %v1331_v18 }
 0x463   :  { %v1334_v26 = vsel %vm726_vm2, %v1168_v19, -inf }
 0x464   :  { %v1315_v28 = vpop.f32.mrb[10].mxu0  ;;  %1335 = vmax.xlane.f32.xlu0 %v1334_v26 }
 0x465   :  { %v1316_v29 = vadd.f32 %v5382_v24, %v1315_v28  ;;  %v1241_v30 = vpop.f32.mrb[8].mxu1  ;;  %v5717_v31 = vpop.f32.mrb[11].mxu0 }
 0x466   :  { %v1242_v32 = vadd.f32 %v5381_v27, %v1241_v30  ;;  %v5712_v33 = vpop.f32.mrb[9].mxu1 }
 0x467   :  { %v1340_v34 = vsel %vm726_vm2, %v1316_v29, -inf }
 0x468   :  { %1341 = vmax.xlane.f32.xlu0 %v1340_v34  ;;  %v1337_v35 = vsel %vm726_vm2, %v1242_v32, -inf }
 0x469   :  { %1338 = vmax.xlane.f32.xlu1 %v1337_v35 }
 0x472   :  { %v1321_v39 = vpop.xlane.xlu0 %1320 }
 0x473   :  { %v1343_v40 = vsub.f32 %v798_v56, %v1321_v39 }
 0x475   :  { %v1351_v41 = vmul.f32 1.442695, %v1343_v40 }
 0x476   :  { %v1324_v36 = vpop.xlane.xlu1 %1323 }
 0x477   :  { %v1344_v37 = vsub.f32 %v872_v61, %v1324_v36 }
 0x479   :  { %v1353_v38 = vmul.f32 1.442695, %v1344_v37 }
 0x47a   :  { %660 = vrot.lane.b32.xlu1 %v7695_v51, %s7036_s29 }
 0x47b   :  { %6262 = vpow2.f32 %v1353_v38 }
 0x47c   :  { %6264 = vpow2.f32 %v1351_v41 }
 0x47e   :  { %662 = vrot.lane.b32.xlu0 %v7691_v50, %s7036_s29  ;;  %666 = vrot.lane.b32.xlu1 %v7695_v51, %s7037_s16 }
 0x482   :  { %668 = vrot.lane.b32.xlu1 %v7691_v50, %s7037_s16 }
 0x485   :  { %v6263_v42 = vpop.eup %6262 }
 0x486   :  { %v1370_v43 = vsel %vm726_vm2, %v6263_v42, 0.0  ;;  %v6265_v45 = vpop.eup %6264 }
 0x487   :  { %v1367_v46 = vsel %vm726_vm2, %v6265_v45, 0.0 }
 0x49d   :  { %1371 = vadd.xlane.f32.xlu0 %v1370_v43 }
 0x4a6   :  { %1368 = vadd.xlane.f32.xlu1 %v1367_v46 }
 0x4e5   :  { %v1327_v47 = vpop.xlane.xlu0 %1326 }
 0x4e6   :  { %v1345_v48 = vsub.f32 %v946_v3, %v1327_v47 }
 0x4e8   :  { %v1355_v49 = vmul.f32 1.442695, %v1345_v48 }
 0x4ea   :  { %6266 = vpow2.f32 %v1355_v49 }
 0x4ed   :  { %v1330_v52 = vpop.xlane.xlu0 %1329 }
 0x4ee   :  { %v1346_v53 = vsub.f32 %v1020_v9, %v1330_v52  ;;  %v1333_v54 = vpop.xlane.xlu1 %1332 }
 0x4ef   :  { %v1347_v55 = vsub.f32 %v1094_v13, %v1333_v54 }
 0x4f0   :  { %v1357_v57 = vmul.f32 1.442695, %v1346_v53 }
 0x4f1   :  { %v1359_v56 = vmul.f32 1.442695, %v1347_v55  ;;  %v1336_v58 = vpop.xlane.xlu0 %1335 }
 0x4f2   :  { %6268 = vpow2.f32 %v1357_v57  ;;  %v1348_v59 = vsub.f32 %v1168_v19, %v1336_v58  ;;  %v2023_v57 = vld [vmem:[#allocation10] sm:$0xff] }
 0x4f3   :  { %6270 = vpow2.f32 %v1359_v56  ;;  %v2024_v56 = vld [vmem:[#allocation10 + $0x8] sm:$0xff] }
 0x4f4   :  { %v6267_v60 = vpop.eup %6266  ;;  %v1361_v61 = vmul.f32 1.442695, %v1348_v59  ;;  %v6065_v58 = vpack.c.bf16 %v2024_v56, %v2023_v57 }
 0x4f5   :  { %v1342_v62 = vpop.xlane.xlu0 %1341  ;;  %v1373_v63 = vsel %vm726_vm2, %v6267_v60, 0.0 }
 0x4f6   :  { %6272 = vpow2.f32 %v1361_v61  ;;  %v1350_v1 = vsub.f32 %v1316_v29, %v1342_v62  ;;  %1374 = vadd.xlane.f32.xlu1 %v1373_v63  ;;  %v1339_v2 = vpop.xlane.xlu1 %1338  ;;  %v2026_v61 = vld [vmem:[#allocation10 + $0x18] sm:$0xff] }
 0x4f7   :  { %v1349_v3 = vsub.f32 %v1242_v32, %v1339_v2  ;;  %v2116_v2 = vld [vmem:[#allocation19 + $0x8] sm:$0xff] }
 0x4f8   :  { %v1365_v4 = vmul.f32 1.442695, %v1350_v1  ;;  %v2115_v1 = vld [vmem:[#allocation19] sm:$0xff] }
 0x4f9   :  { %v1363_v5 = vmul.f32 1.442695, %v1349_v3  ;;  %v663_v18 = vpop.permute.xlu0 %662 }
 0x4fa   :  { %6274 = vpow2.f32 %v1365_v4  ;;  %v661_v17 = vpop.permute.xlu1 %660  ;;  %v6073_v4 = vpack.c.bf16 %v2116_v2, %v2115_v1  ;;  %v5415_v2 = vld [vmem:[#allocation23] ss:$0 sm:$0xff] }
 0x4fb   :  { %6276 = vpow2.f32 %v1363_v5 }
 0x4fc   :  { %v6269_v6 = vpop.eup %6268 }
 0x4fd   :  { %v6271_v7 = vpop.eup %6270  ;;  %v1376_v8 = vsel %vm726_vm2, %v6269_v6, 0.0 }
 0x4fe   :  { %1377 = vadd.xlane.f32.xlu0 %v1376_v8  ;;  %v1379_v9 = vsel %vm726_vm2, %v6271_v7, 0.0  ;;  %v667_v19 = vpop.permute.xlu1 %666 }
 0x4ff   :  { %1380 = vadd.xlane.f32.xlu1 %v1379_v9 }
 0x500   :  { %v6273_v10 = vpop.eup %6272 }
 0x501   :  { %v1382_v11 = vsel %vm726_vm2, %v6273_v10, 0.0 }
 0x502   :  { %1383 = vadd.xlane.f32.xlu0 %v1382_v11  ;;  %v669_v24 = vpop.permute.xlu1 %668 }
 0x504   :  { %v7731_v13 = vpop.eup %6274 }
 0x505   :  { %v7733_v14 = vpop.eup %6276  ;;  %v1388_v15 = vsel %vm726_vm2, %v7731_v13, 0.0 }
 0x506   :  { %1389 = vadd.xlane.f32.xlu0 %v1388_v15  ;;  %v1385_v16 = vsel %vm726_vm2, %v7733_v14, 0.0 }
 0x507   :  { %1386 = vadd.xlane.f32.xlu1 %v1385_v16 }
 0x518   :  { %674 = vrot.lane.b32.xlu1 %v7691_v50, %s7038_s30 }
 0x51c   :  { %672 = vrot.lane.b32.xlu0 %v7695_v51, %s7038_s30 }
 0x52a   :  { %v1372_v21 = vpop.xlane.xlu0 %1371 }
 0x52b   :  { %6278 = vrcp.f32 %v1372_v21 }
 0x533   :  { %v1369_v26 = vpop.xlane.xlu1 %1368 }
 0x534   :  { %6280 = vrcp.f32 %v1369_v26 }
 0x535   :  { %v6279_v27 = vpop.eup %6278 }
 0x536   :  { %v1400_v28 = vmul.f32 %v6279_v27, %v6263_v42 }
 0x538   :  { %5726 = vmatmul.mubr.msk.f32.vlgmr.msra.gmra.mrb[12].mxu0 %vm726_vm2, %v1400_v28 }
 0x539   :  { %5734 = vmatpush3.msra.mxu0 %v663_v18  ;;  %5735 = vmatprep.mubr.msk.f32.mxu0 %vm7035_vm1, %v7034_v0 }
 0x53a   :  { %5743 = vmatprep.subr.mxu0 %v7034_v0 }
 0x53e   :  { %v6281_v50 = vpop.eup %6280 }
 0x53f   :  { %v1399_v51 = vmul.f32 %v6281_v50, %v6265_v45 }
 0x541   :  { %5721 = vmatmul.mubr.msk.f32.vlgmr.msra.gmra.mrb[10].mxu1 %vm726_vm2, %v1399_v51 }
 0x542   :  { %5729 = vmatpush3.msra.mxu1 %v661_v17  ;;  %5730 = vmatprep.mubr.msk.f32.mxu1 %vm7035_vm1, %v7034_v0 }
 0x543   :  { %5738 = vmatprep.subr.mxu1 %v7034_v0 }
 0x583   :  { %v1375_v29 = vpop.xlane.xlu1 %1374 }
 0x584   :  { %6282 = vrcp.f32 %v1375_v29  ;;  %v2117_v29 = vld [vmem:[#allocation19 + $0x10] sm:$0xff] }
 0x58b   :  { %v1378_v30 = vpop.xlane.xlu0 %1377 }
 0x58c   :  { %6284 = vrcp.f32 %v1378_v30  ;;  %v1381_v31 = vpop.xlane.xlu1 %1380  ;;  %v2118_v30 = vld [vmem:[#allocation19 + $0x18] sm:$0xff] }
 0x58d   :  { %6286 = vrcp.f32 %v1381_v31  ;;  %v6077_v31 = vpack.c.bf16 %v2118_v30, %v2117_v29 }
 0x58e   :  { %v6283_v32 = vpop.eup %6282 }
 0x58f   :  { %v1401_v33 = vmul.f32 %v6283_v32, %v6267_v60  ;;  %v1384_v34 = vpop.xlane.xlu0 %1383  ;;  %v2025_v60 = vld [vmem:[#allocation10 + $0x10] sm:$0xff]  ;;  %v5407_v32 = vld [vmem:[#allocation11] ss:$0 sm:$0xff] }
 0x590   :  { %6288 = vrcp.f32 %v1384_v34  ;;  %v6069_v63 = vpack.c.bf16 %v2026_v61, %v2025_v60 }
 0x591   :  { %5731 = vmatmul.mubr.msk.f32.vlgmr.msra.gmra.mrb[12].mxu1 %vm726_vm2, %v1401_v33 }
 0x592   :  { %5739 = vmatpush3.msra.mxu1 %v667_v19  ;;  %5740 = vmatprep.mubr.msk.f32.mxu1 %vm7035_vm1, %v7034_v0 }
 0x593   :  { %v1390_v35 = vpop.xlane.xlu0 %1389  ;;  %5748 = vmatprep.subr.mxu1 %v7034_v0 }
 0x594   :  { %6290 = vrcp.f32 %v1390_v35  ;;  %v1387_v36 = vpop.xlane.xlu1 %1386 }
 0x595   :  { %6292 = vrcp.f32 %v1387_v36 }
 0x596   :  { %v6285_v37 = vpop.eup %6284 }
 0x597   :  { %v6287_v38 = vpop.eup %6286  ;;  %v1402_v39 = vmul.f32 %v6285_v37, %v6269_v6  ;;  %v673_v42 = vpop.permute.xlu0 %672  ;;  %v2225_v37 = vld [vmem:[#allocation22] sm:$0xff] }
 0x598   :  { %v1403_v40 = vmul.f32 %v6287_v38, %v6271_v7  ;;  %v675_v45 = vpop.permute.xlu1 %674  ;;  %v5410_v38 = vld [vmem:[#allocation20] ss:$0 sm:$0xff] }
 0x599   :  { %5736 = vmatmul.mubr.msk.f32.vlgmr.msra.gmra.mrb[14].mxu0 %vm726_vm2, %v1402_v39 }
 0x59a   :  { %v6289_v41 = vpop.eup %6288  ;;  %5744 = vmatpush3.msra.mxu0 %v669_v24  ;;  %5741 = vmatmul.mubr.msk.f32.vlgmr.msra.gmra.mrb[14].mxu1 %vm726_vm2, %v1403_v40 }
 0x59b   :  { %v1404_v43 = vmul.f32 %v6289_v41, %v6273_v10  ;;  %5749 = vmatpush3.msra.mxu1 %v673_v42  ;;  %5745 = vmatprep.mubr.msk.f32.mxu0 %vm7035_vm1, %v7034_v0 }
 0x59c   :  { %5753 = vmatprep.subr.mxu0 %v7034_v0  ;;  %5750 = vmatprep.mubr.msk.f32.mxu1 %vm7035_vm1, %v7034_v0 }
 0x59d   :  { %5746 = vmatmul.mubr.msk.f32.vlgmr.msra.gmra.mrb[16].mxu0 %vm726_vm2, %v1404_v43  ;;  %6066 = vmatprep.subr.bf16.mxu1 %v6065_v58 }
 0x59e   :  { %v6291_v46 = vpop.eup %6290  ;;  %5754 = vmatpush3.msra.mxu0 %v675_v45  ;;  %5755 = vmatprep.mubr.msk.f32.mxu0 %vm7035_vm1, %v7034_v0 }
 0x59f   :  { %v6293_v47 = vpop.eup %6292  ;;  %v1406_v48 = vmul.f32 %v6291_v46, %v7731_v13  ;;  %6074 = vmatprep.subr.bf16.mxu0 %v6073_v4 }
 0x5a0   :  { %v1405_v49 = vmul.f32 %v6293_v47, %v7733_v14 }
 0x5a1   :  { %5756 = vmatmul.mubr.msk.f32.vlgmr.msra.gmra.mrb[18].mxu0 %vm726_vm2, %v1406_v48 }
 0x5a2   :  { %5751 = vmatmul.mubr.msk.f32.vlgmr.msra.gmra.mrb[16].mxu1 %vm726_vm2, %v1405_v49  ;;  %6076 = vmatpush3.bf16.msra.mxu0 %v6073_v4 }
 0x5a3   :  { %6068 = vmatpush3.bf16.msra.mxu1 %v6065_v58  ;;  %6078 = vmatprep.subr.bf16.mxu0 %v6077_v31 }
 0x5a4   :  { %6070 = vmatprep.subr.bf16.mxu1 %v6069_v63 }
 0x5a6   :  { %6080 = vmatpush3.bf16.msra.mxu0 %v6077_v31 }
 0x5a7   :  { %6072 = vmatpush3.bf16.msra.mxu1 %v6069_v63 }
 0x5a8   :  { %5780 = vmatprep.subr.mxu1 %v2225_v37 }
 0x60b   :  { %v1549_v52 = vpop.f32.mrb[12].mxu0 }
 0x60c   :  { %v5727_v53 = vpop.f32.mrb[13].mxu0 }
 0x614   :  { %v1476_v54 = vpop.f32.mrb[10].mxu1 }
 0x615   :  { %v5722_v55 = vpop.f32.mrb[11].mxu1 }
 0x664   :  { %v1622_v59 = vpop.f32.mrb[12].mxu1 }
 0x665   :  { %1993 = vrot.lane.b32.xlu0 %v1622_v59, %s7018_s7  ;;  %v5732_v62 = vpop.f32.mrb[13].mxu1 }
 0x66c   :  { %v1695_v3 = vpop.f32.mrb[14].mxu0 }
 0x66d   :  { %v5737_v5 = vpop.f32.mrb[15].mxu0  ;;  %1995 = vrot.lane.b32.xlu1 %v1695_v3, %s7018_s7  ;;  %v1768_v6 = vpop.f32.mrb[14].mxu1 }
 0x66e   :  { %2001 = vrot.lane.b32.xlu0 %v1768_v6, %s8076_s3  ;;  %v5742_v7 = vpop.f32.mrb[15].mxu1 }
 0x670   :  { %v1841_v8 = vpop.f32.mrb[16].mxu0 }
 0x671   :  { %2003 = vrot.lane.b32.xlu1 %v1841_v8, %s8076_s3  ;;  %v5747_v9 = vpop.f32.mrb[17].mxu0 }
 0x674   :  { %v1987_v10 = vpop.f32.mrb[18].mxu0 }
 0x675   :  { %2011 = vrot.lane.b32.xlu1 %v1987_v10, %s7021_s26  ;;  %v1914_v11 = vpop.f32.mrb[16].mxu1  ;;  %v5757_v13 = vpop.f32.mrb[19].mxu0 }
 0x676   :  { %2009 = vrot.lane.b32.xlu0 %v1914_v11, %s7021_s26  ;;  %v5752_v14 = vpop.f32.mrb[17].mxu1 }
 0x6d7   :  { %v1994_v16 = vpop.permute.xlu0 %1993 }
 0x6d8   :  { %v2015_v19 = vsel %vm726_vm2, %v1476_v54, %v1994_v16 }
 0x6df   :  { %v1996_v15 = vpop.permute.xlu1 %1995 }
 0x6e0   :  { %v2002_v18 = vpop.permute.xlu0 %2001  ;;  %v2016_v24 = vsel %vm726_vm2, %v1549_v52, %v1996_v15 }
 0x6e1   :  { %v2018_v26 = vsel %vm2017_vm3, %v2015_v19, %v2002_v18 }
 0x6e3   :  { %v2004_v17 = vpop.permute.xlu1 %2003 }
 0x6e4   :  { %v2019_v28 = vsel %vm2017_vm3, %v2016_v24, %v2004_v17 }
 0x6e7   :  { %v2012_v21 = vpop.permute.xlu1 %2011 }
 0x6e8   :  { %v2010_v27 = vpop.permute.xlu0 %2009  ;;  %v2022_v51 = vsel %vm2020_vm4, %v2019_v28, %v2012_v21  ;;  %v2367_v28 = vld [vmem:[#allocation13 + $0x10] sm:$0xff] }
 0x6e9   :  { %v2021_v50 = vsel %vm2020_vm4, %v2018_v26, %v2010_v27  ;;  %v2366_v26 = vld [vmem:[#allocation13 + $0x8] sm:$0xff] }
 0x6ea   :  { %5766 = vmatprep.mubr.msk.f32.mxu1 %vm471_vm0, %v2021_v50  ;;  %v2368_v50 = vld [vmem:[#allocation13 + $0x18] sm:$0xff] }
 0x6eb   :  { %5767 = vmatmul.mubr.msk.f32.vlgmr.msra.gmra.mrb[18].mxu1 %vm471_vm0, %v2022_v51  ;;  %v6085_v51 = vpack.c.bf16 %v2368_v50, %v2367_v28 }
 0x6ec   :  { %5781 = vmatpush3.msra.mxu1 %v2225_v37 }
 0x7be   :  { %v5768_v33 = vpop.f32.mrb[18].mxu1 }
 0x7bf   :  { %v2106_v34 = vpop.f32.mrb[19].mxu1  ;;  %v2112_v36 = vadd.f32 %v5768_v33, %v5407_v32 }
 0x7c0   :  { %v2107_v35 = vadd.f32 %v5407_v32, %v2106_v34 }
 0x7c2   :  { %5777 = vmatprep.mubr.msk.f32.mxu0 %vm471_vm0, %v2107_v35 }
 0x7c3   :  { %5778 = vmatmul.mubr.msk.f32.vlgmr.msra.gmra.mrb[20].mxu0 %vm471_vm0, %v2112_v36 }
 0x896   :  { %v5779_v39 = vpop.f32.mrb[20].mxu0 }
 0x897   :  { %v2204_v40 = vadd.f32 %v5779_v39, %v5410_v38  ;;  %v2198_v41 = vpop.f32.mrb[21].mxu0 }
 0x898   :  { %v2199_v42 = vadd.f32 %v5410_v38, %v2198_v41  ;;  %v5417_v38 = vld [vmem:[#allocation32] ss:$0 sm:$0xff] }
 0x899   :  { %v2208_v43 = vmul.f32 %v2204_v40, %v2204_v40 }
 0x89a   :  { %v2207_v45 = vmul.f32 %v2199_v42, %v2199_v42 }
 0x89b   :  { %v2210_v46 = vmul.f32 %v2208_v43, %v2204_v40 }
 0x89c   :  { %v2209_v47 = vmul.f32 %v2207_v45, %v2199_v42 }
 0x89d   :  { %v2212_v48 = vmul.f32 0.044715, %v2210_v46  ;;  %v2475_v46 = vld [vmem:[#allocation16] sm:$0xff] }
 0x89e   :  { %v2211_v49 = vmul.f32 0.044715, %v2209_v47  ;;  %v2476_v47 = vld [vmem:[#allocation16 + $0x8] sm:$0xff] }
 0x89f   :  { %v2214_v52 = vadd.f32 %v2212_v48, %v2204_v40  ;;  %v6089_v48 = vpack.c.bf16 %v2476_v47, %v2475_v46  ;;  %v2683_v47 = vld [vmem:[#allocation28] sm:$0xff] }
 0x8a0   :  { %v2213_v53 = vadd.f32 %v2211_v49, %v2199_v42  ;;  %v2477_v49 = vld [vmem:[#allocation16 + $0x10] sm:$0xff] }
 0x8a1   :  { %v2216_v54 = vmul.f32 0.7978846, %v2214_v52  ;;  %6090 = vmatprep.subr.bf16.mxu1 %v6089_v48  ;;  %v2478_v52 = vld [vmem:[#allocation16 + $0x18] sm:$0xff] }
 0x8a2   :  { %v2215_v55 = vmul.f32 0.7978846, %v2213_v53  ;;  %v6093_v53 = vpack.c.bf16 %v2478_v52, %v2477_v49 }
 0x8a3   :  { %6294 = vtanh.f32 %v2216_v54  ;;  %v2479_v54 = vld [vmem:[#allocation16 + $0x20] sm:$0xff] }
 0x8a4   :  { %6296 = vtanh.f32 %v2215_v55  ;;  %v2480_v55 = vld [vmem:[#allocation16 + $0x28] sm:$0xff] }
 0x8ad   :  { %v6295_v57 = vpop.eup %6294 }
 0x8ae   :  { %v6297_v56 = vpop.eup %6296  ;;  %v2220_v58 = vadd.f32 1.0, %v6295_v57  ;;  %v6097_v57 = vpack.c.bf16 %v2480_v55, %v2479_v54 }
 0x8af   :  { %v2219_v59 = vadd.f32 1.0, %v6297_v56  ;;  %v2481_v56 = vld [vmem:[#allocation16 + $0x30] sm:$0xff] }
 0x8b0   :  { %v2222_v60 = vmul.f32 0.5, %v2220_v58  ;;  %v2482_v58 = vld [vmem:[#allocation16 + $0x38] sm:$0xff] }
 0x8b1   :  { %v2221_v61 = vmul.f32 0.5, %v2219_v59  ;;  %v6101_v59 = vpack.c.bf16 %v2482_v58, %v2481_v56 }
 0x8b2   :  { %v2224_v63 = vmul.f32 %v2222_v60, %v2204_v40  ;;  %v2483_v60 = vld [vmem:[#allocation16 + $0x40] sm:$0xff] }
 0x8b3   :  { %v2223_v62 = vmul.f32 %v2221_v61, %v2199_v42  ;;  %v2484_v61 = vld [vmem:[#allocation16 + $0x48] sm:$0xff] }
 0x8b5   :  { %5782 = vmatprep.mubr.msk.f32.mxu1 %vm726_vm2, %v2223_v62  ;;  %v2485_v62 = vld [vmem:[#allocation16 + $0x50] sm:$0xff] }
 0x8b6   :  { %5783 = vmatmul.mubr.msk.f32.vlgmr.msra.gmra.mrb[20].mxu1 %vm726_vm2, %v2224_v63  ;;  %v6105_v63 = vpack.c.bf16 %v2484_v61, %v2483_v60 }
 0x8b7   :  { %6092 = vmatpush3.bf16.msra.mxu1 %v6089_v48  ;;  %v5422_v48 = vld [vmem:[#allocation26] ss:$0 sm:$0xff] }
 0x8b8   :  { %6094 = vmatprep.subr.bf16.mxu1 %v6093_v53 }
 0x8bb   :  { %6096 = vmatpush3.bf16.msra.mxu1 %v6093_v53 }
 0x8bc   :  { %6098 = vmatprep.subr.bf16.mxu1 %v6097_v57 }
 0x8bf   :  { %6100 = vmatpush3.bf16.msra.mxu1 %v6097_v57 }
 0x8c0   :  { %6102 = vmatprep.subr.bf16.mxu1 %v6101_v59 }
 0x8c3   :  { %6104 = vmatpush3.bf16.msra.mxu1 %v6101_v59 }
 0x8c4   :  { %6106 = vmatprep.subr.bf16.mxu1 %v6105_v63 }
 0x8c7   :  { %6108 = vmatpush3.bf16.msra.mxu1 %v6105_v63 }
 0x989   :  { %v5784_v1 = vpop.f32.mrb[20].mxu1 }
 0x98a   :  { %v2308_v3 = vadd.f32 %v5784_v1, %v2112_v36  ;;  %v2298_v4 = vpop.f32.mrb[21].mxu1  ;;  %v5416_v36 = vld [vmem:[#allocation31] ss:$0 sm:$0xff]  ;;  %v2486_v1 = vld [vmem:[#allocation16 + $0x58] sm:$0xff] }
 0x98b   :  { %v2307_v5 = vadd.f32 %v2298_v4, %v2107_v35  ;;  %v2488_v4 = vld [vmem:[#allocation16 + $0x68] sm:$0xff] }
 0x98c   :  { %v2317_v6 = vadd.f32 %v5415_v2, %v2308_v3  ;;  %v2487_v3 = vld [vmem:[#allocation16 + $0x60] sm:$0xff] }
 0x98d   :  { %v2316_v7 = vadd.f32 %v5415_v2, %v2307_v5  ;;  %v6109_v2 = vpack.c.bf16 %v2486_v1, %v2485_v62  ;;  %v6113_v5 = vpack.c.bf16 %v2488_v4, %v2487_v3 }
 0x98e   :  { %v2319_v8 = vadd.f32 %v2317_v6, %v7627_v20  ;;  %v2489_v6 = vld [vmem:[#allocation16 + $0x70] sm:$0xff] }
 0x98f   :  { %v2318_v9 = vadd.f32 %v2316_v7, %v7619_v12  ;;  %v2365_v12 = vld [vmem:[#allocation13] sm:$0xff]  ;;  %6110 = vmatprep.subr.bf16.mxu1 %v6109_v2 }
 0x990   :  { %v2325_v10 = vsel %vm471_vm0, %v2319_v8, 0.0  ;;  %v6081_v27 = vpack.c.bf16 %v2366_v26, %v2365_v12  ;;  %v2490_v7 = vld [vmem:[#allocation16 + $0x78] sm:$0xff]  ;;  %6112 = vmatpush3.bf16.msra.mxu1 %v6109_v2 }
 0x991   :  { %2326 = vadd.xlane.f32.xlu1 %v2325_v10  ;;  %v2322_v11 = vsel %vm471_vm0, %v2318_v9, 0.0  ;;  %6114 = vmatprep.subr.bf16.mxu1 %v6113_v5  ;;  %v2574_v10 = vld [vmem:[#allocation25 + $0x8] sm:$0xff] }
 0x992   :  { %2323 = vadd.xlane.f32.xlu0 %v2322_v11  ;;  %6082 = vmatprep.subr.bf16.mxu0 %v6081_v27 }
 0x993   :  { %6084 = vmatpush3.bf16.msra.mxu0 %v6081_v27 }
 0x994   :  { %6086 = vmatprep.subr.bf16.mxu0 %v6085_v51  ;;  %6116 = vmatpush3.bf16.msra.mxu1 %v6113_v5 }
 0x997   :  { %6088 = vmatpush3.bf16.msra.mxu0 %v6085_v51 }
 0xa1e   :  { %v2327_v13 = vpop.xlane.xlu1 %2326 }
 0xa1f   :  { %v2330_v14 = vmul.f32 0.03125, %v2327_v13  ;;  %v2324_v15 = vpop.xlane.xlu0 %2323  ;;  %v5418_v13 = vld [vmem:[#allocation14] ss:$0 sm:$0xff] }
 0xa20   :  { %v2329_v16 = vmul.f32 0.03125, %v2324_v15 }
 0xa21   :  { %v2332_v17 = vsub.f32 %v2319_v8, %v2330_v14  ;;  %v6117_v8 = vpack.c.bf16 %v2490_v7, %v2489_v6 }
 0xa22   :  { %v2331_v18 = vsub.f32 %v2318_v9, %v2329_v16  ;;  %v2573_v9 = vld [vmem:[#allocation25] sm:$0xff] }
 0xa23   :  { %v2334_v24 = vmul.f32 %v2332_v17, %v2332_v17  ;;  %6118 = vmatprep.subr.bf16.mxu1 %v6117_v8  ;;  %v6121_v11 = vpack.c.bf16 %v2574_v10, %v2573_v9 }
 0xa24   :  { %v2333_v19 = vmul.f32 %v2331_v18, %v2331_v18  ;;  %6120 = vmatpush3.bf16.msra.mxu1 %v6117_v8 }
 0xa25   :  { %v2338_v20 = vsel %vm471_vm0, %v2334_v24, 0.0  ;;  %5858 = vmatprep.subr.mxu1 %v7034_v0  ;;  %6122 = vmatprep.subr.bf16.mxu0 %v6121_v11 }
 0xa26   :  { %v2335_v21 = vsel %vm471_vm0, %v2333_v19, 0.0 }
 0xa27   :  { %2336 = vadd.xlane.f32.xlu0 %v2335_v21 }
 0xa2b   :  { %2339 = vadd.xlane.f32.xlu0 %v2338_v20 }
 0xab4   :  { %v2337_v29 = vpop.xlane.xlu0 %2336 }
 0xab5   :  { %v2341_v30 = vmul.f32 0.03125, %v2337_v29 }
 0xab7   :  { %v2343_v31 = vadd.f32 1e-05, %v2341_v30 }
 0xab8   :  { %v2340_v32 = vpop.xlane.xlu0 %2339 }
 0xab9   :  { %6298 = vrsqrt.f32 %v2343_v31  ;;  %v2342_v33 = vmul.f32 0.03125, %v2340_v32 }
 0xabb   :  { %v2344_v34 = vadd.f32 1e-05, %v2342_v33 }
 0xabd   :  { %6300 = vrsqrt.f32 %v2344_v34 }
 0xac3   :  { %v6299_v35 = vpop.eup %6298 }
 0xac4   :  { %v2347_v37 = vmul.f32 %v6299_v35, %v2331_v18 }
 0xac6   :  { %v2355_v39 = vmul.f32 %v5416_v36, %v2347_v37  ;;  %v2576_v37 = vld [vmem:[#allocation25 + $0x18] sm:$0xff] }
 0xac7   :  { %v6301_v40 = vpop.eup %6300 }
 0xac8   :  { %v2348_v41 = vmul.f32 %v6301_v40, %v2332_v17  ;;  %v7793_v42 = vadd.f32 %v5417_v38, %v2355_v39  ;;  %v5421_v39 = vld [vmem:[#allocation17] ss:$0 sm:$0xff] }
 0xaca   :  { %v2356_v43 = vmul.f32 %v5416_v36, %v2348_v41  ;;  %5793 = vmatprep.mubr.msk.f32.mxu0 %vm471_vm0, %v7793_v42  ;;  %v2575_v36 = vld [vmem:[#allocation25 + $0x10] sm:$0xff] }
 0xacc   :  { %v7797_v45 = vadd.f32 %v5417_v38, %v2356_v43  ;;  %v6125_v38 = vpack.c.bf16 %v2576_v37, %v2575_v36  ;;  %v2830_v36 = vld [vmem:[#allocation7 + $0x98] sm:$0xff]  ;;  %v2833_v37 = vld [vmem:[#allocation7 + $0xb0] sm:$0xff] }
 0xace   :  { %5794 = vmatmul.mubr.msk.f32.vlgmr.msra.gmra.mrb[22].mxu0 %vm471_vm0, %v7797_v45 }
 0xacf   :  { %6124 = vmatpush3.bf16.msra.mxu0 %v6121_v11  ;;  %v5427_v11 = vld [vmem:[#allocation29] ss:$0 sm:$0xff] }
 0xad0   :  { %6126 = vmatprep.subr.bf16.mxu0 %v6125_v38 }
 0xad3   :  { %6128 = vmatpush3.bf16.msra.mxu0 %v6125_v38  ;;  %v2829_v38 = vld [vmem:[#allocation7 + $0x90] sm:$0xff] }
 0xad4   :  { %5842 = vmatprep.subr.mxu0 %v2683_v47 }
 0xba1   :  { %v5795_v14 = vpop.f32.mrb[22].mxu0 }
 0xba2   :  { %v2454_v15 = vadd.f32 %v5795_v14, %v5418_v13  ;;  %v2448_v16 = vpop.f32.mrb[23].mxu0 }
 0xba3   :  { %v2449_v17 = vadd.f32 %v5418_v13, %v2448_v16 }
 0xba4   :  { %v2458_v18 = vmul.f32 %v2454_v15, %v2454_v15 }
 0xba5   :  { %v2457_v19 = vmul.f32 %v2449_v17, %v2449_v17 }
 0xba6   :  { %v2460_v21 = vmul.f32 %v2458_v18, %v2454_v15 }
 0xba7   :  { %v2459_v24 = vmul.f32 %v2457_v19, %v2449_v17 }
 0xba8   :  { %v2462_v20 = vmul.f32 0.044715, %v2460_v21 }
 0xba9   :  { %v2461_v12 = vmul.f32 0.044715, %v2459_v24 }
 0xbaa   :  { %v2464_v26 = vadd.f32 %v2462_v20, %v2454_v15 }
 0xbab   :  { %v2463_v27 = vadd.f32 %v2461_v12, %v2449_v17 }
 0xbac   :  { %v2466_v28 = vmul.f32 0.7978846, %v2464_v26 }
 0xbad   :  { %v2465_v50 = vmul.f32 0.7978846, %v2463_v27 }
 0xbae   :  { %6302 = vtanh.f32 %v2466_v28 }
 0xbaf   :  { %6304 = vtanh.f32 %v2465_v50 }
 0xbb8   :  { %v6303_v51 = vpop.eup %6302 }
 0xbb9   :  { %v6305_v29 = vpop.eup %6304  ;;  %v2470_v30 = vadd.f32 1.0, %v6303_v51 }
 0xbba   :  { %v2469_v31 = vadd.f32 1.0, %v6305_v29 }
 0xbbb   :  { %v2472_v32 = vmul.f32 0.5, %v2470_v30 }
 0xbbc   :  { %v2471_v33 = vmul.f32 0.5, %v2469_v31  ;;  %v2827_v31 = vld [vmem:[#allocation7 + $0x80] sm:$0xff] }
 0xbbd   :  { %v2474_v35 = vmul.f32 %v2472_v32, %v2454_v15 }
 0xbbe   :  { %v2473_v34 = vmul.f32 %v2471_v33, %v2449_v17  ;;  %v2823_v33 = vld [vmem:[#allocation7 + $0x60] sm:$0xff] }
 0xbc0   :  { %5828 = vmatprep.mubr.f32.mxu1 %v2473_v34  ;;  %v2826_v34 = vld [vmem:[#allocation7 + $0x78] sm:$0xff] }
 0xbc1   :  { %5829 = vmatmul.mubr.f32.vlgmr.msra.gmra.mrb[22].mxu1 %v2474_v35  ;;  %v6131_v35 = vpack.c.bf16 %v2826_v34, %v2823_v33 }
 0xbc2   :  { %5860 = vmatprep.mubr.msk.f32.mxu1 %vm7035_vm1, %v7034_v0 }
 0xc94   :  { %v5830_v40 = vpop.f32.mrb[22].mxu1 }
 0xc95   :  { %v2564_v41 = vpop.f32.mrb[23].mxu1  ;;  %v2570_v46 = vadd.f32 %v5830_v40, %v5421_v39  ;;  %v2832_v40 = vld [vmem:[#allocation7 + $0xa8] sm:$0xff] }
 0xc96   :  { %v2565_v43 = vadd.f32 %v5421_v39, %v2564_v41  ;;  %v6133_v39 = vpack.c.bf16 %v2833_v37, %v2830_v36  ;;  %v6135_v41 = vpack.c.bf16 %v2832_v40, %v2829_v38  ;;  %v6370_v40 = vld [vmem:[#allocation5 + $0x2] ss:$0 sm:$0xff] }
 0xc98   :  { %5839 = vmatprep.mubr.msk.f32.mxu0 %vm471_vm0, %v2565_v43 }
 0xc99   :  { %5840 = vmatmul.mubr.msk.f32.vlgmr.msra.gmra.mrb[24].mxu0 %vm471_vm0, %v2570_v46 }
 0xc9a   :  { %5843 = vmatpush3.msra.mxu0 %v2683_v47 }
 0xd6c   :  { %v5841_v49 = vpop.f32.mrb[24].mxu0 }
 0xd6d   :  { %v2662_v52 = vadd.f32 %v5841_v49, %v5422_v48  ;;  %v2656_v53 = vpop.f32.mrb[25].mxu0 }
 0xd6e   :  { %v2657_v54 = vadd.f32 %v5422_v48, %v2656_v53 }
 0xd6f   :  { %v2666_v55 = vmul.f32 %v2662_v52, %v2662_v52 }
 0xd70   :  { %v2665_v57 = vmul.f32 %v2657_v54, %v2657_v54 }
 0xd71   :  { %v2668_v56 = vmul.f32 %v2666_v55, %v2662_v52 }
 0xd72   :  { %v2667_v58 = vmul.f32 %v2665_v57, %v2657_v54 }
 0xd73   :  { %v2670_v59 = vmul.f32 0.044715, %v2668_v56 }
 0xd74   :  { %v2669_v60 = vmul.f32 0.044715, %v2667_v58  ;;  %v5428_v58 = vld [vmem:[#allocation34] ss:$0 sm:$0xff] }
 0xd75   :  { %v2672_v61 = vadd.f32 %v2670_v59, %v2662_v52 }
 0xd76   :  { %v2671_v62 = vadd.f32 %v2669_v60, %v2657_v54 }
 0xd77   :  { %v2674_v63 = vmul.f32 0.7978846, %v2672_v61  ;;  %v5429_v61 = vld [vmem:[#allocation35] ss:$0 sm:$0xff] }
 0xd78   :  { %v2673_v1 = vmul.f32 0.7978846, %v2671_v62  ;;  %v2831_v62 = vld [vmem:[#allocation7 + $0xa0] sm:$0xff] }
 0xd79   :  { %6306 = vtanh.f32 %v2674_v63  ;;  %v2834_v63 = vld [vmem:[#allocation7 + $0xb8] sm:$0xff] }
 0xd7a   :  { %6308 = vtanh.f32 %v2673_v1 }
 0xd83   :  { %v6307_v2 = vpop.eup %6306 }
 0xd84   :  { %v6309_v3 = vpop.eup %6308  ;;  %v2678_v4 = vadd.f32 1.0, %v6307_v2 }
 0xd85   :  { %v2677_v5 = vadd.f32 1.0, %v6309_v3 }
 0xd86   :  { %v2680_v6 = vmul.f32 0.5, %v2678_v4  ;;  %v6141_v4 = vpack.c.bf16 %v2834_v63, %v2831_v62 }
 0xd87   :  { %v2679_v7 = vmul.f32 0.5, %v2677_v5 }
 0xd88   :  { %v2682_v9 = vmul.f32 %v2680_v6, %v2662_v52  ;;  %v2836_v6 = vld [vmem:[#allocation8 + $0x3] sm:$0x7] }
 0xd89   :  { %v2681_v8 = vmul.f32 %v2679_v7, %v2657_v54  ;;  %v2841_v7 = vrot.slane %v2836_v6, %v458_v23 }
 0xd8b   :  { %5844 = vmatprep.mubr.msk.f32.mxu0 %vm726_vm2, %v2681_v8  ;;  %v2845_v8 = vrot.slane %v2836_v6, %v462_v25 }
 0xd8c   :  { %5845 = vmatmul.mubr.msk.f32.vlgmr.msra.gmra.mrb[26].mxu0 %vm726_vm2, %v2682_v9 }
 0xd8d   :  { %2923 = vmatprep.mubr.f32.mxu0 %v7034_v0 }
 0xe5f   :  { %v5846_v10 = vpop.f32.mrb[26].mxu0 }
 0xe60   :  { %v2766_v13 = vadd.f32 %v5846_v10, %v2570_v46  ;;  %v2756_v14 = vpop.f32.mrb[27].mxu0  ;;  %v2828_v46 = vld [vmem:[#allocation7 + $0x88] sm:$0xff] }
 0xe61   :  { %v2765_v15 = vadd.f32 %v2756_v14, %v2565_v43  ;;  %v2825_v43 = vld [vmem:[#allocation7 + $0x70] sm:$0xff] }
 0xe62   :  { %v2775_v16 = vadd.f32 %v5427_v11, %v2766_v13  ;;  %v6137_v47 = vpack.c.bf16 %v2828_v46, %v2825_v43 }
 0xe63   :  { %v2774_v17 = vadd.f32 %v5427_v11, %v2765_v15 }
 0xe64   :  { %v2777_v18 = vadd.f32 %v2775_v16, %v7797_v45 }
 0xe65   :  { %v2776_v19 = vadd.f32 %v2774_v17, %v7793_v42  ;;  %v2824_v42 = vld [vmem:[#allocation7 + $0x68] sm:$0xff] }
 0xe66   :  { %v2783_v21 = vsel %vm471_vm0, %v2777_v18, 0.0  ;;  %v6129_v32 = vpack.c.bf16 %v2827_v31, %v2824_v42  ;;  %v6368_v42 = vld [vmem:[#allocation5] ss:$0 sm:$0xff] }
 0xe67   :  { %2784 = vadd.xlane.f32.xlu0 %v2783_v21  ;;  %v2780_v24 = vsel %vm471_vm0, %v2776_v19, 0.0 }
 0xe68   :  { %2781 = vadd.xlane.f32.xlu1 %v2780_v24  ;;  %6130 = vmatprep.subr.bf16.mxu0 %v6129_v32 }
 0xe69   :  { %6132 = vmatpush1.bf16.msra.mxu0 %v6131_v35  ;;  %v6369_v35 = vld [vmem:[#allocation5 + $0x1] ss:$0 sm:$0xff] }
 0xe6a   :  { %6134 = vmatprep.subr.bf16.mxu0 %v6133_v39 }
 0xe6d   :  { %6136 = vmatpush1.bf16.msra.mxu0 %v6135_v41 }
 0xe6e   :  { %6138 = vmatprep.subr.bf16.mxu0 %v6137_v47 }
 0xef4   :  { %v2785_v20 = vpop.xlane.xlu0 %2784 }
 0xef5   :  { %v2787_v12 = vmul.f32 0.03125, %v2785_v20  ;;  %v2782_v26 = vpop.xlane.xlu1 %2781 }
 0xef6   :  { %v2786_v27 = vmul.f32 0.03125, %v2782_v26 }
 0xef7   :  { %v2789_v28 = vsub.f32 %v2777_v18, %v2787_v12 }
 0xef8   :  { %v2788_v50 = vsub.f32 %v2776_v19, %v2786_v27  ;;  %v2849_v27 = vrot.slane %v2836_v6, %v466_v44 }
 0xef9   :  { %v2791_v51 = vmul.f32 %v2789_v28, %v2789_v28 }
 0xefa   :  { %v2790_v29 = vmul.f32 %v2788_v50, %v2788_v50 }
 0xefb   :  { %v2795_v30 = vsel %vm471_vm0, %v2791_v51, 0.0 }
 0xefc   :  { %2796 = vadd.xlane.f32.xlu0 %v2795_v30  ;;  %v2792_v45 = vsel %vm471_vm0, %v2790_v29, 0.0 }
 0xefd   :  { %2793 = vadd.xlane.f32.xlu1 %v2792_v45 }
 0xf89   :  { %v2797_v48 = vpop.xlane.xlu0 %2796 }
 0xf8a   :  { %v2799_v49 = vmul.f32 0.03125, %v2797_v48  ;;  %v2794_v52 = vpop.xlane.xlu1 %2793  ;;  %v6371_v48 = vld [vmem:[#allocation5 + $0x3] ss:$0 sm:$0xff] }
 0xf8b   :  { %v2798_v53 = vmul.f32 0.03125, %v2794_v52 }
 0xf8c   :  { %v2801_v54 = vadd.f32 1e-05, %v2799_v49 }
 0xf8d   :  { %v2800_v55 = vadd.f32 1e-05, %v2798_v53 }
 0xf8e   :  { %6310 = vrsqrt.f32 %v2801_v54  ;;  %v6372_v54 = vld [vmem:[#allocation5 + $0x4] ss:$0 sm:$0xff] }
 0xf8f   :  { %6312 = vrsqrt.f32 %v2800_v55 }
 0xf98   :  { %v6311_v57 = vpop.eup %6310 }
 0xf99   :  { %v6313_v56 = vpop.eup %6312  ;;  %v2805_v60 = vmul.f32 %v6311_v57, %v2789_v28 }
 0xf9a   :  { %v2804_v59 = vmul.f32 %v6313_v56, %v2788_v50 }
 0xf9b   :  { %v2813_v3 = vmul.f32 %v5428_v58, %v2805_v60  ;;  %v6373_v60 = vld [vmem:[#allocation5 + $0x6] ss:$0 sm:$0xff] }
 0xf9c   :  { %v2812_v1 = vmul.f32 %v5428_v58, %v2804_v59 }
 0xf9d   :  { %v7820_v5 = vadd.f32 %v5429_v61, %v2813_v3 }
 0xf9e   :  { %v7815_v2 = vadd.f32 %v5429_v61, %v2812_v1  ;;  %v6374_v1 = vld [vmem:[#allocation5 + $0x5] ss:$0 sm:$0xff] }
 0xfa0   :  { %5430 = vmatmul.mubr.msk.f32.vlgmr.msra.gmra.mrb[28].mxu0 %vm471_vm0, %v7815_v2 }
 0xfa1   :  { %6140 = vmatpush3.bf16.msra.mxu0 %v6137_v47  ;;  %2929 = vmatprep.mubr.f32.mxu0 %v7034_v0 }
 0xfa2   :  { %6142 = vmatprep.subr.bf16.mxu0 %v6141_v4 }
 0xfa4   :  { %5431 = vmatmul.mubr.msk.f32.gmra.mrb[30].mxu0 %vm471_vm0, %v7820_v5 }
 0xfa5   :  { %6144 = vmatpush3.bf16.msra.mxu0 %v6141_v4  ;;  %5855 = vmatprep.mubr.msk.f32.mxu0 %vm471_vm0, %v7815_v2 }
 0xfa6   :  { %5863 = vmatprep.subr.mxu0 %v7034_v0 }
 0xfa8   :  { %5856 = vmatmul.mubr.msk.f32.vlgmr.msra.gmra.mrb[32].mxu0 %vm471_vm0, %v7820_v5 }
 0xfa9   :  { %5865 = vmatprep.mubr.msk.f32.mxu0 %vm7035_vm1, %v7034_v0 }
0x1073   :  { %v2925_v9 = vpop.f32.mrb[28].mxu0 }
0x1074   :  { %v2926_v10 = vadd.f32 %v2925_v9, %v2841_v7  ;;  %v2927_v11 = vpop.f32.mrb[29].mxu0  ;;  %v6375_v9 = vld [vmem:[#allocation5 + $0x7] ss:$0 sm:$0xff] }
0x1075   :  { %v2928_v13 = vadd.f32 %v2927_v11, %v2845_v8 }
0x1076   :  { %3013 = vrot.lane.b32.xlu1 %v2926_v10, %s7036_s29 }
0x1077   :  { %v2931_v14 = vpop.f32.mrb[30].mxu0  ;;  %3031 = vrot.lane.b32.xlu0 %v2928_v13, %s7037_s16  ;;  %5859 = vmatpush3.xpose.msk.msra.mxu1 %vm726_vm2, %v2928_v13 }
0x1078   :  { %v2933_v15 = vpop.f32.mrb[31].mxu0  ;;  %5868 = vmatprep.subr.mxu1 %v7034_v0  ;;  %v2932_v25 = vadd.f32 %v2931_v14, %v2841_v7 }
0x1079   :  { %v2934_v16 = vadd.f32 %v2933_v15, %v2845_v8 }
0x107a   :  { %3027 = vrot.lane.b32.xlu1 %v2928_v13, %s7036_s29  ;;  %5861 = vmatmul.mubr.msk.f32.vlgmr.msra.gmra.mrb[24].mxu1 %vm726_vm2, %v2926_v10 }
0x107b   :  { %v5857_v23 = vpop.f32.mrb[32].mxu0  ;;  %5864 = vmatpush3.xpose.msk.msra.mxu0 %vm726_vm2, %v2934_v16  ;;  %3029 = vrot.lane.b32.xlu0 %v2934_v16, %s7036_s29 }
0x107c   :  { %v3002_v17 = vpop.f32.mrb[33].mxu0  ;;  %5873 = vmatprep.subr.mxu0 %v7034_v0  ;;  %5870 = vmatprep.mubr.msk.f32.mxu1 %vm7035_vm1, %v7034_v0  ;;  %v7890_v44 = vadd.f32 %v5857_v23, %v2849_v27 }
0x107d   :  { %v7876_v51 = vadd.f32 %v3002_v17, %v2849_v27 }
0x107e   :  { %5866 = vmatmul.mubr.msk.f32.vlgmr.msra.gmra.mrb[34].mxu0 %vm726_vm2, %v2932_v25  ;;  %3015 = vrot.lane.b32.xlu1 %v2932_v25, %s7036_s29 }
0x107f   :  { %3017 = vrot.lane.b32.xlu0 %v2926_v10, %s7037_s16  ;;  %5875 = vmatprep.mubr.msk.f32.mxu0 %vm7035_vm1, %v7034_v0 }
0x1082   :  { %3019 = vrot.lane.b32.xlu1 %v2932_v25, %s7037_s16 }
0x1083   :  { %3035 = vrot.lane.b32.xlu0 %v2928_v13, %s7038_s30 }
0x1086   :  { %3033 = vrot.lane.b32.xlu1 %v2934_v16, %s7037_s16 }
0x1087   :  { %3021 = vrot.lane.b32.xlu0 %v2926_v10, %s7038_s30 }
0x108a   :  { %3037 = vrot.lane.b32.xlu1 %v2934_v16, %s7038_s30 }
0x108e   :  { %3023 = vrot.lane.b32.xlu1 %v2932_v25, %s7038_s30 }
0x10e8   :  { %v3014_v18 = vpop.permute.xlu1 %3013 }
0x10e9   :  { %v3032_v19 = vpop.permute.xlu0 %3031 }
0x10ec   :  { %v3028_v21 = vpop.permute.xlu1 %3027 }
0x10ed   :  { %v3030_v24 = vpop.permute.xlu0 %3029  ;;  %5869 = vmatpush3.xpose.msk.msra.mxu1 %vm726_vm2, %v3028_v21 }
0x10ee   :  { %5874 = vmatpush3.xpose.msk.msra.mxu0 %vm726_vm2, %v3030_v24  ;;  %5878 = vmatprep.subr.mxu1 %v7034_v0 }
0x10ef   :  { %5883 = vmatprep.subr.mxu0 %v7034_v0 }
0x10f0   :  { %v3016_v20 = vpop.permute.xlu1 %3015  ;;  %5871 = vmatmul.mubr.msk.f32.vlgmr.msra.gmra.mrb[26].mxu1 %vm726_vm2, %v3014_v18 }
0x10f1   :  { %v3018_v12 = vpop.permute.xlu0 %3017  ;;  %5876 = vmatmul.mubr.msk.f32.vlgmr.msra.gmra.mrb[36].mxu0 %vm726_vm2, %v3016_v20  ;;  %5879 = vmatpush3.xpose.msk.msra.mxu1 %vm726_vm2, %v3032_v19 }
0x10f2   :  { %5880 = vmatprep.mubr.msk.f32.mxu1 %vm7035_vm1, %v7034_v0  ;;  %5888 = vmatprep.subr.mxu1 %v7034_v0 }
0x10f3   :  { %5885 = vmatprep.mubr.msk.f32.mxu0 %vm7035_vm1, %v7034_v0 }
0x10f4   :  { %v3020_v26 = vpop.permute.xlu1 %3019  ;;  %5881 = vmatmul.mubr.msk.f32.vlgmr.msra.gmra.mrb[28].mxu1 %vm726_vm2, %v3018_v12 }
0x10f5   :  { %v3036_v28 = vpop.permute.xlu0 %3035  ;;  %5890 = vmatprep.mubr.msk.f32.mxu1 %vm7035_vm1, %v7034_v0 }
0x10f6   :  { %5889 = vmatpush3.xpose.msk.msra.mxu1 %vm726_vm2, %v3036_v28 }
0x10f7   :  { %5898 = vmatprep.subr.mxu1 %v7034_v0 }
0x10f8   :  { %v3034_v50 = vpop.permute.xlu1 %3033 }
0x10f9   :  { %v3022_v29 = vpop.permute.xlu0 %3021  ;;  %5884 = vmatpush3.xpose.msk.msra.mxu0 %vm726_vm2, %v3034_v50 }
0x10fa   :  { %5891 = vmatmul.mubr.msk.f32.vlgmr.msra.gmra.mrb[30].mxu1 %vm726_vm2, %v3022_v29  ;;  %5893 = vmatprep.subr.mxu0 %v7034_v0 }
0x10fb   :  { %5899 = vmatpush3.msra.mxu1 %v7876_v51  ;;  %5900 = vmatprep.mubr.msk.f32.mxu1 %vm7035_vm1, %v7034_v0 }
0x10fc   :  { %5886 = vmatmul.mubr.msk.f32.vlgmr.msra.gmra.mrb[38].mxu0 %vm726_vm2, %v3020_v26  ;;  %v3038_v22 = vpop.permute.xlu1 %3037  ;;  %5908 = vmatprep.subr.mxu1 %v7034_v0 }
0x10fd   :  { %5894 = vmatpush3.xpose.msk.msra.mxu0 %vm726_vm2, %v3038_v22  ;;  %5895 = vmatprep.mubr.msk.f32.mxu0 %vm7035_vm1, %v7034_v0 }
0x10fe   :  { %5903 = vmatprep.subr.mxu0 %v7034_v0 }
0x1100   :  { %v3024_v30 = vpop.permute.xlu1 %3023 }
0x1101   :  { %5896 = vmatmul.mubr.msk.f32.vlgmr.msra.gmra.mrb[40].mxu0 %vm726_vm2, %v3024_v30 }
0x1102   :  { %5904 = vmatpush3.msra.mxu0 %v7890_v44  ;;  %5905 = vmatprep.mubr.msk.f32.mxu0 %vm7035_vm1, %v7034_v0 }
0x1103   :  { %5913 = vmatprep.subr.mxu0 %v7034_v0 }
0x114d   :  { %v3129_v45 = vpop.f32.mrb[24].mxu1 }
0x114e   :  { %v3130_v31 = vadd.f32 %v6368_v42, %v3129_v45  ;;  %v5862_v32 = vpop.f32.mrb[25].mxu1 }
0x1150   :  { %v3651_v33 = vsel %vm726_vm2, %v3130_v31, -inf }
0x1151   :  { %v3203_v34 = vpop.f32.mrb[34].mxu0  ;;  %3652 = vmax.xlane.f32.xlu0 %v3651_v33 }
0x1152   :  { %v3204_v36 = vadd.f32 %v6369_v35, %v3203_v34  ;;  %v5867_v37 = vpop.f32.mrb[35].mxu0 }
0x1154   :  { %v3654_v38 = vsel %vm726_vm2, %v3204_v36, -inf }
0x1155   :  { %3655 = vmax.xlane.f32.xlu1 %v3654_v38 }
0x11c3   :  { %v3277_v39 = vpop.f32.mrb[26].mxu1 }
0x11c4   :  { %v3278_v41 = vadd.f32 %v6370_v40, %v3277_v39  ;;  %v5872_v43 = vpop.f32.mrb[27].mxu1  ;;  %v3351_v46 = vpop.f32.mrb[36].mxu0 }
0x11c5   :  { %v5877_v47 = vpop.f32.mrb[37].mxu0  ;;  %v3352_v49 = vadd.f32 %v6371_v48, %v3351_v46 }
0x11c6   :  { %v3657_v52 = vsel %vm726_vm2, %v3278_v41, -inf }
0x11c7   :  { %3658 = vmax.xlane.f32.xlu0 %v3657_v52  ;;  %v3425_v53 = vpop.f32.mrb[28].mxu1  ;;  %v3660_v56 = vsel %vm726_vm2, %v3352_v49, -inf }
0x11c8   :  { %v3426_v55 = vadd.f32 %v6372_v54, %v3425_v53  ;;  %v5882_v57 = vpop.f32.mrb[29].mxu1 }
0x11ca   :  { %v3663_v58 = vsel %vm726_vm2, %v3426_v55, -inf }
0x11cb   :  { %3661 = vmax.xlane.f32.xlu0 %v3660_v56  ;;  %3664 = vmax.xlane.f32.xlu1 %v3663_v58 }
0x11cd   :  { %v3573_v59 = vpop.f32.mrb[30].mxu1 }
0x11ce   :  { %v3574_v61 = vadd.f32 %v6373_v60, %v3573_v59  ;;  %v5892_v62 = vpop.f32.mrb[31].mxu1 }
0x11cf   :  { %v3499_v63 = vpop.f32.mrb[38].mxu0 }
0x11d0   :  { %v3500_v3 = vadd.f32 %v6374_v1, %v3499_v63  ;;  %v5887_v4 = vpop.f32.mrb[39].mxu0  ;;  %v3669_v6 = vsel %vm726_vm2, %v3574_v61, -inf }
0x11d1   :  { %3670 = vmax.xlane.f32.xlu1 %v3669_v6 }
0x11d2   :  { %v3666_v7 = vsel %vm726_vm2, %v3500_v3, -inf }
0x11d3   :  { %3667 = vmax.xlane.f32.xlu0 %v3666_v7 }
0x11d4   :  { %v3647_v8 = vpop.f32.mrb[40].mxu0 }
0x11d5   :  { %v3648_v10 = vadd.f32 %v6375_v9, %v3647_v8  ;;  %v5897_v11 = vpop.f32.mrb[41].mxu0 }
0x11d7   :  { %v3672_v13 = vsel %vm726_vm2, %v3648_v10, -inf }
0x11d8   :  { %3673 = vmax.xlane.f32.xlu0 %v3672_v13 }
0x11de   :  { %v3653_v15 = vpop.xlane.xlu0 %3652 }
0x11df   :  { %v3675_v23 = vsub.f32 %v3130_v31, %v3653_v15 }
0x11e1   :  { %v3683_v17 = vmul.f32 1.442695, %v3675_v23 }
0x11e2   :  { %3041 = vrot.lane.b32.xlu1 %v7876_v51, %s7036_s29  ;;  %v3656_v14 = vpop.xlane.xlu1 %3655 }
0x11e3   :  { %v3676_v16 = vsub.f32 %v3204_v36, %v3656_v14 }
0x11e5   :  { %v3685_v25 = vmul.f32 1.442695, %v3676_v16 }
0x11e6   :  { %3047 = vrot.lane.b32.xlu1 %v7876_v51, %s7037_s16 }
0x11e7   :  { %6314 = vpow2.f32 %v3685_v25 }
0x11e8   :  { %6316 = vpow2.f32 %v3683_v17 }
0x11ea   :  { %3049 = vrot.lane.b32.xlu1 %v7890_v44, %s7037_s16 }
0x11ee   :  { %3043 = vrot.lane.b32.xlu0 %v7890_v44, %s7036_s29 }
0x11f1   :  { %v6315_v18 = vpop.eup %6314 }
0x11f2   :  { %v6317_v19 = vpop.eup %6316  ;;  %v3702_v21 = vsel %vm726_vm2, %v6315_v18, 0.0 }
0x11f3   :  { %v3699_v24 = vsel %vm726_vm2, %v6317_v19, 0.0 }
0x120d   :  { %3703 = vadd.xlane.f32.xlu0 %v3702_v21 }
0x120e   :  { %3700 = vadd.xlane.f32.xlu1 %v3699_v24 }
0x1254   :  { %v3659_v20 = vpop.xlane.xlu0 %3658 }
0x1255   :  { %v3677_v12 = vsub.f32 %v3278_v41, %v3659_v20 }
0x1257   :  { %v3687_v26 = vmul.f32 1.442695, %v3677_v12 }
0x1258   :  { %v3662_v27 = vpop.xlane.xlu0 %3661  ;;  %v3665_v28 = vpop.xlane.xlu1 %3664 }
0x1259   :  { %6318 = vpow2.f32 %v3687_v26  ;;  %v3678_v50 = vsub.f32 %v3352_v49, %v3662_v27  ;;  %v3679_v29 = vsub.f32 %v3426_v55, %v3665_v28  ;;  %v4354_v27 = vld [vmem:[#allocation10 + $0x20] sm:$0xff]  ;;  %v4355_v28 = vld [vmem:[#allocation10 + $0x28] sm:$0xff] }
0x125b   :  { %v3689_v22 = vmul.f32 1.442695, %v3678_v50  ;;  %v3691_v30 = vmul.f32 1.442695, %v3679_v29  ;;  %v6145_v50 = vpack.c.bf16 %v4355_v28, %v4354_v27 }
0x125d   :  { %6320 = vpow2.f32 %v3689_v22  ;;  %v4356_v22 = vld [vmem:[#allocation10 + $0x30] sm:$0xff] }
0x125e   :  { %6322 = vpow2.f32 %v3691_v30  ;;  %v3671_v45 = vpop.xlane.xlu1 %3670  ;;  %v4357_v30 = vld [vmem:[#allocation10 + $0x38] sm:$0xff] }
0x125f   :  { %v3681_v42 = vsub.f32 %v3574_v61, %v3671_v45 }
0x1260   :  { %v3668_v31 = vpop.xlane.xlu0 %3667 }
0x1261   :  { %v3695_v32 = vmul.f32 1.442695, %v3681_v42  ;;  %v3680_v33 = vsub.f32 %v3500_v3, %v3668_v31  ;;  %v6149_v42 = vpack.c.bf16 %v4357_v30, %v4356_v22  ;;  %v5466_v30 = vld [vmem:[#allocation23 + $0x1] ss:$0 sm:$0xff] }
0x1262   :  { %v3042_v55 = vpop.permute.xlu1 %3041 }
0x1263   :  { %v6319_v34 = vpop.eup %6318  ;;  %6324 = vpow2.f32 %v3695_v32  ;;  %v3693_v35 = vmul.f32 1.442695, %v3680_v33 }
0x1264   :  { %v3705_v36 = vsel %vm726_vm2, %v6319_v34, 0.0 }
0x1265   :  { %6326 = vpow2.f32 %v3693_v35  ;;  %v3674_v37 = vpop.xlane.xlu0 %3673  ;;  %3706 = vadd.xlane.f32.xlu1 %v3705_v36  ;;  %v4448_v35 = vld [vmem:[#allocation19 + $0x20] sm:$0xff]  ;;  %v4449_v36 = vld [vmem:[#allocation19 + $0x28] sm:$0xff] }
0x1266   :  { %v3682_v38 = vsub.f32 %v3648_v10, %v3674_v37  ;;  %v3048_v57 = vpop.permute.xlu1 %3047  ;;  %v6153_v37 = vpack.c.bf16 %v4449_v36, %v4448_v35 }
0x1267   :  { %v6321_v39 = vpop.eup %6320 }
0x1268   :  { %v6323_v40 = vpop.eup %6322  ;;  %v3697_v41 = vmul.f32 1.442695, %v3682_v38  ;;  %v3708_v43 = vsel %vm726_vm2, %v6321_v39, 0.0 }
0x1269   :  { %3709 = vadd.xlane.f32.xlu0 %v3708_v43  ;;  %v3711_v46 = vsel %vm726_vm2, %v6323_v40, 0.0  ;;  %v3044_v56 = vpop.permute.xlu0 %3043 }
0x126a   :  { %6328 = vpow2.f32 %v3697_v41  ;;  %3712 = vadd.xlane.f32.xlu1 %v3711_v46  ;;  %v3050_v58 = vpop.permute.xlu1 %3049 }
0x126d   :  { %v6325_v47 = vpop.eup %6324 }
0x126e   :  { %v3717_v48 = vsel %vm726_vm2, %v6325_v47, 0.0 }
0x126f   :  { %v6327_v49 = vpop.eup %6326  ;;  %3718 = vadd.xlane.f32.xlu1 %v3717_v48 }
0x1270   :  { %v3714_v52 = vsel %vm726_vm2, %v6327_v49, 0.0 }
0x1271   :  { %3715 = vadd.xlane.f32.xlu0 %v3714_v52 }
0x1274   :  { %v7920_v53 = vpop.eup %6328 }
0x1275   :  { %v3720_v54 = vsel %vm726_vm2, %v7920_v53, 0.0 }
0x1276   :  { %3721 = vadd.xlane.f32.xlu0 %v3720_v54 }
0x1280   :  { %3055 = vrot.lane.b32.xlu1 %v7890_v44, %s7038_s30 }
0x128c   :  { %3053 = vrot.lane.b32.xlu0 %v7876_v51, %s7038_s30 }
0x129a   :  { %v3704_v59 = vpop.xlane.xlu0 %3703 }
0x129b   :  { %6330 = vrcp.f32 %v3704_v59  ;;  %v3701_v60 = vpop.xlane.xlu1 %3700 }
0x129c   :  { %6332 = vrcp.f32 %v3701_v60 }
0x12a5   :  { %v6331_v61 = vpop.eup %6330 }
0x12a6   :  { %v6333_v62 = vpop.eup %6332  ;;  %v3732_v63 = vmul.f32 %v6331_v61, %v6315_v18  ;;  %v4450_v61 = vld [vmem:[#allocation19 + $0x30] sm:$0xff] }
0x12a7   :  { %v3731_v1 = vmul.f32 %v6333_v62, %v6317_v19  ;;  %v4451_v62 = vld [vmem:[#allocation19 + $0x38] sm:$0xff] }
0x12a8   :  { %5906 = vmatmul.mubr.msk.f32.vlgmr.msra.gmra.mrb[42].mxu0 %vm726_vm2, %v3732_v63  ;;  %v6157_v63 = vpack.c.bf16 %v4451_v62, %v4450_v61 }
0x12a9   :  { %5914 = vmatpush3.msra.mxu0 %v3044_v56  ;;  %5901 = vmatmul.mubr.msk.f32.vlgmr.msra.gmra.mrb[32].mxu1 %vm726_vm2, %v3731_v1  ;;  %v5458_v1 = vld [vmem:[#allocation11 + $0x1] ss:$0 sm:$0xff] }
0x12aa   :  { %5909 = vmatpush3.msra.mxu1 %v3042_v55  ;;  %5910 = vmatprep.mubr.msk.f32.mxu1 %vm7035_vm1, %v7034_v0 }
0x12ab   :  { %5918 = vmatprep.subr.mxu1 %v7034_v0  ;;  %5915 = vmatprep.mubr.msk.f32.mxu0 %vm7035_vm1, %v7034_v0 }
0x12ac   :  { %5923 = vmatprep.subr.mxu0 %v7034_v0 }
0x12f2   :  { %v3707_v51 = vpop.xlane.xlu1 %3706 }
0x12f3   :  { %6334 = vrcp.f32 %v3707_v51 }
0x12f6   :  { %v3710_v44 = vpop.xlane.xlu0 %3709 }
0x12f7   :  { %6336 = vrcp.f32 %v3710_v44  ;;  %v3713_v3 = vpop.xlane.xlu1 %3712 }
0x12f8   :  { %6338 = vrcp.f32 %v3713_v3 }
0x12fc   :  { %v3719_v4 = vpop.xlane.xlu1 %3718 }
0x12fd   :  { %v6335_v6 = vpop.eup %6334  ;;  %6340 = vrcp.f32 %v3719_v4 }
0x12fe   :  { %v3733_v7 = vmul.f32 %v6335_v6, %v6319_v34  ;;  %v3716_v8 = vpop.xlane.xlu0 %3715  ;;  %v4560_v6 = vld [vmem:[#allocation22 + $0x8] sm:$0xff] }
0x12ff   :  { %6342 = vrcp.f32 %v3716_v8 }
0x1300   :  { %5911 = vmatmul.mubr.msk.f32.vlgmr.msra.gmra.mrb[34].mxu1 %vm726_vm2, %v3733_v7  ;;  %v3056_v18 = vpop.permute.xlu1 %3055  ;;  %v5461_v7 = vld [vmem:[#allocation20 + $0x1] ss:$0 sm:$0xff] }
0x1301   :  { %v6337_v9 = vpop.eup %6336  ;;  %5919 = vmatpush3.msra.mxu1 %v3048_v57  ;;  %5920 = vmatprep.mubr.msk.f32.mxu1 %vm7035_vm1, %v7034_v0 }
0x1302   :  { %v6339_v10 = vpop.eup %6338  ;;  %v3734_v11 = vmul.f32 %v6337_v9, %v6321_v39  ;;  %5928 = vmatprep.subr.mxu1 %v7034_v0 }
0x1303   :  { %v3735_v13 = vmul.f32 %v6339_v10, %v6323_v40  ;;  %v3722_v14 = vpop.xlane.xlu0 %3721 }
0x1304   :  { %6344 = vrcp.f32 %v3722_v14  ;;  %5916 = vmatmul.mubr.msk.f32.vlgmr.msra.gmra.mrb[44].mxu0 %vm726_vm2, %v3734_v11 }
0x1305   :  { %5921 = vmatmul.mubr.msk.f32.vlgmr.msra.gmra.mrb[36].mxu1 %vm726_vm2, %v3735_v13  ;;  %5924 = vmatpush3.msra.mxu0 %v3050_v58 }
0x1306   :  { %5930 = vmatprep.mubr.msk.f32.mxu1 %vm7035_vm1, %v7034_v0  ;;  %5925 = vmatprep.mubr.msk.f32.mxu0 %vm7035_vm1, %v7034_v0 }
0x1307   :  { %v6341_v15 = vpop.eup %6340  ;;  %v3054_v16 = vpop.permute.xlu0 %3053  ;;  %5933 = vmatprep.subr.mxu0 %v7034_v0 }
0x1308   :  { %v3737_v23 = vmul.f32 %v6341_v15, %v6325_v47  ;;  %5929 = vmatpush3.msra.mxu1 %v3054_v16 }
0x1309   :  { %v6343_v25 = vpop.eup %6342  ;;  %6146 = vmatprep.subr.bf16.mxu1 %v6145_v50 }
0x130a   :  { %v3736_v17 = vmul.f32 %v6343_v25, %v6327_v49  ;;  %5931 = vmatmul.mubr.msk.f32.vlgmr.msra.gmra.mrb[38].mxu1 %vm726_vm2, %v3737_v23 }
0x130b   :  { %6148 = vmatpush3.bf16.msra.mxu1 %v6145_v50 }
0x130c   :  { %5926 = vmatmul.mubr.msk.f32.vlgmr.msra.gmra.mrb[46].mxu0 %vm726_vm2, %v3736_v17  ;;  %6150 = vmatprep.subr.bf16.mxu1 %v6149_v42 }
0x130d   :  { %5934 = vmatpush3.msra.mxu0 %v3056_v18  ;;  %5935 = vmatprep.mubr.msk.f32.mxu0 %vm7035_vm1, %v7034_v0 }
0x130e   :  { %v6345_v19 = vpop.eup %6344  ;;  %6154 = vmatprep.subr.bf16.mxu0 %v6153_v37 }
0x130f   :  { %v3738_v21 = vmul.f32 %v6345_v19, %v7920_v53  ;;  %6152 = vmatpush3.bf16.msra.mxu1 %v6149_v42 }
0x1310   :  { %5960 = vmatprep.subr.mxu1 %v4560_v6 }
0x1311   :  { %5936 = vmatmul.mubr.msk.f32.vlgmr.msra.gmra.mrb[48].mxu0 %vm726_vm2, %v3738_v21 }
0x1312   :  { %6156 = vmatpush3.bf16.msra.mxu0 %v6153_v37 }
0x1313   :  { %6158 = vmatprep.subr.bf16.mxu0 %v6157_v63 }
0x1316   :  { %6160 = vmatpush3.bf16.msra.mxu0 %v6157_v63 }
0x137b   :  { %v3881_v24 = vpop.f32.mrb[42].mxu0 }
0x137c   :  { %v3808_v20 = vpop.f32.mrb[32].mxu1  ;;  %v5907_v12 = vpop.f32.mrb[43].mxu0 }
0x137d   :  { %v5902_v26 = vpop.f32.mrb[33].mxu1 }
0x13d3   :  { %v3954_v29 = vpop.f32.mrb[34].mxu1 }
0x13d4   :  { %4325 = vrot.lane.b32.xlu0 %v3954_v29, %s7018_s7  ;;  %v5912_v45 = vpop.f32.mrb[35].mxu1 }
0x13d7   :  { %v4027_v31 = vpop.f32.mrb[44].mxu0 }
0x13d8   :  { %v4100_v32 = vpop.f32.mrb[36].mxu1  ;;  %v5917_v33 = vpop.f32.mrb[45].mxu0  ;;  %4327 = vrot.lane.b32.xlu1 %v4027_v31, %s7018_s7 }
0x13d9   :  { %4333 = vrot.lane.b32.xlu0 %v4100_v32, %s8076_s3  ;;  %v5922_v34 = vpop.f32.mrb[37].mxu1 }
0x13dd   :  { %v4246_v38 = vpop.f32.mrb[38].mxu1 }
0x13de   :  { %4341 = vrot.lane.b32.xlu0 %v4246_v38, %s7021_s26  ;;  %v5932_v39 = vpop.f32.mrb[39].mxu1 }
0x13df   :  { %v4173_v40 = vpop.f32.mrb[46].mxu0 }
0x13e0   :  { %4335 = vrot.lane.b32.xlu1 %v4173_v40, %s8076_s3  ;;  %v5927_v41 = vpop.f32.mrb[47].mxu0  ;;  %s7040_s3 = smov [#allocation43]  }
0x13e1   :  { %s5349_s7 = sshll.u32 %s7040_s3, 4  ;;  %s5350_s7 = int_to_ptr.vmem [resolvable:$true] %s5349_s7 }
0x13e2   :  { %p6953_p13 = scmp.lt.s32.totalorder %s5350_s7, %s5350_s7 }
0x13e4   :  { %v4319_v43 = vpop.f32.mrb[48].mxu0 }
0x13e5   :  { %4343 = vrot.lane.b32.xlu1 %v4319_v43, %s7021_s26  ;;  %v5937_v46 = vpop.f32.mrb[49].mxu0  ;;  %s6948_s26 = scalar_lea.vmem %s5350_s7, 32 }
0x13e6   :  { %p6949_p12 = scmp.ne.s32.totalorder %s5350_s7, %s6948_s26  ;;  %p6954_p0 = scmp.lt.s32.totalorder %s6948_s26, %s6948_s26 }
0x13e8   :  { %p6955_p1 = por %p6954_p0, %p6953_p13 }
0x13ea   :  { %p6956_p2 = pnand %p6955_p1, %p6949_p12 }
0x1446   :  { %v4326_v47 = vpop.permute.xlu0 %4325 }
0x1447   :  { %v4347_v52 = vsel %vm726_vm2, %v3808_v20, %v4326_v47 }
0x144a   :  { %v4328_v49 = vpop.permute.xlu1 %4327 }
0x144b   :  { %v4334_v48 = vpop.permute.xlu0 %4333  ;;  %v4348_v56 = vsel %vm726_vm2, %v3881_v24, %v4328_v49 }
0x144c   :  { %v4349_v53 = vsel %vm2017_vm3, %v4347_v52, %v4334_v48  ;;  %v4704_v52 = vld [vmem:[#allocation13 + $0x28] sm:$0xff] }
0x1450   :  { %v4342_v54 = vpop.permute.xlu0 %4341 }
0x1451   :  { %v4351_v55 = vsel %vm2020_vm4, %v4349_v53, %v4342_v54  ;;  %v4705_v54 = vld [vmem:[#allocation13 + $0x30] sm:$0xff] }
0x1452   :  { %v4336_v57 = vpop.permute.xlu1 %4335  ;;  %5946 = vmatprep.mubr.msk.f32.mxu1 %vm471_vm0, %v4351_v55  ;;  %v4706_v55 = vld [vmem:[#allocation13 + $0x38] sm:$0xff] }
0x1453   :  { %v4350_v58 = vsel %vm2017_vm3, %v4348_v56, %v4336_v57  ;;  %v6165_v57 = vpack.c.bf16 %v4706_v55, %v4705_v54 }
0x1457   :  { %v4344_v59 = vpop.permute.xlu1 %4343 }
0x1458   :  { %v4352_v60 = vsel %vm2020_vm4, %v4350_v58, %v4344_v59 }
0x1459   :  { %5947 = vmatmul.mubr.msk.f32.vlgmr.msra.gmra.mrb[40].mxu1 %vm471_vm0, %v4352_v60 }
0x145a   :  { %5961 = vmatpush3.msra.mxu1 %v4560_v6 }
0x152c   :  { %v5948_v51 = vpop.f32.mrb[40].mxu1 }
0x152d   :  { %v4438_v44 = vpop.f32.mrb[41].mxu1  ;;  %v4444_v4 = vadd.f32 %v5948_v51, %v5458_v1 }
0x152e   :  { %v4439_v3 = vadd.f32 %v5458_v1, %v4438_v44  ;;  %v5467_v1 = vld [vmem:[#allocation31 + $0x1] ss:$0 sm:$0xff]  ;;  %v5468_v44 = vld [vmem:[#allocation32 + $0x1] ss:$0 sm:$0xff] }
0x1530   :  { %5957 = vmatprep.mubr.msk.f32.mxu0 %vm471_vm0, %v4439_v3 }
0x1531   :  { %5958 = vmatmul.mubr.msk.f32.vlgmr.msra.gmra.mrb[50].mxu0 %vm471_vm0, %v4444_v4 }
0x1604   :  { %v5959_v8 = vpop.f32.mrb[50].mxu0 }
0x1605   :  { %v4538_v9 = vadd.f32 %v5959_v8, %v5461_v7  ;;  %v4532_v10 = vpop.f32.mrb[51].mxu0 }
0x1606   :  { %v4533_v11 = vadd.f32 %v5461_v7, %v4532_v10  ;;  %v4815_v10 = vld [vmem:[#allocation16 + $0x80] sm:$0xff] }
0x1607   :  { %v4542_v13 = vmul.f32 %v4538_v9, %v4538_v9 }
0x1608   :  { %v4541_v14 = vmul.f32 %v4533_v11, %v4533_v11 }
0x1609   :  { %v4544_v15 = vmul.f32 %v4542_v13, %v4538_v9 }
0x160a   :  { %v4543_v16 = vmul.f32 %v4541_v14, %v4533_v11  ;;  %v4817_v14 = vld [vmem:[#allocation16 + $0x90] sm:$0xff] }
0x160b   :  { %v4546_v23 = vmul.f32 0.044715, %v4544_v15  ;;  %v4818_v15 = vld [vmem:[#allocation16 + $0x98] sm:$0xff] }
0x160c   :  { %v4545_v25 = vmul.f32 0.044715, %v4543_v16  ;;  %v6173_v16 = vpack.c.bf16 %v4818_v15, %v4817_v14 }
0x160d   :  { %v4548_v17 = vadd.f32 %v4546_v23, %v4538_v9  ;;  %v4819_v23 = vld [vmem:[#allocation16 + $0xa0] sm:$0xff] }
0x160e   :  { %v4547_v18 = vadd.f32 %v4545_v25, %v4533_v11  ;;  %v4820_v25 = vld [vmem:[#allocation16 + $0xa8] sm:$0xff] }
0x160f   :  { %v4550_v19 = vmul.f32 0.7978846, %v4548_v17  ;;  %v6177_v17 = vpack.c.bf16 %v4820_v25, %v4819_v23 }
0x1610   :  { %v4549_v21 = vmul.f32 0.7978846, %v4547_v18  ;;  %v4821_v18 = vld [vmem:[#allocation16 + $0xb0] sm:$0xff] }
0x1611   :  { %6346 = vtanh.f32 %v4550_v19  ;;  %v4822_v19 = vld [vmem:[#allocation16 + $0xb8] sm:$0xff] }
0x1612   :  { %6348 = vtanh.f32 %v4549_v21  ;;  %v6181_v21 = vpack.c.bf16 %v4822_v19, %v4821_v18 }
0x161b   :  { %v6347_v24 = vpop.eup %6346 }
0x161c   :  { %v6349_v20 = vpop.eup %6348  ;;  %v4554_v12 = vadd.f32 1.0, %v6347_v24  ;;  %v4823_v24 = vld [vmem:[#allocation16 + $0xc0] sm:$0xff] }
0x161d   :  { %v4553_v26 = vadd.f32 1.0, %v6349_v20  ;;  %v4824_v20 = vld [vmem:[#allocation16 + $0xc8] sm:$0xff] }
0x161e   :  { %v4556_v27 = vmul.f32 0.5, %v4554_v12  ;;  %v4825_v12 = vld [vmem:[#allocation16 + $0xd0] sm:$0xff] }
0x161f   :  { %v4555_v28 = vmul.f32 0.5, %v4553_v26  ;;  %v6185_v26 = vpack.c.bf16 %v4824_v20, %v4823_v24 }
0x1620   :  { %v4558_v29 = vmul.f32 %v4556_v27, %v4538_v9  ;;  %v4826_v27 = vld [vmem:[#allocation16 + $0xd8] sm:$0xff] }
0x1621   :  { %v4557_v50 = vmul.f32 %v4555_v28, %v4533_v11  ;;  %v4816_v11 = vld [vmem:[#allocation16 + $0x88] sm:$0xff]  ;;  %v6189_v28 = vpack.c.bf16 %v4826_v27, %v4825_v12 }
0x1622   :  { %v6169_v13 = vpack.c.bf16 %v4816_v11, %v4815_v10 }
0x1623   :  { %5962 = vmatprep.mubr.msk.f32.mxu1 %vm726_vm2, %v4557_v50  ;;  %v4827_v50 = vld [vmem:[#allocation16 + $0xe0] sm:$0xff] }
0x1624   :  { %5963 = vmatmul.mubr.msk.f32.vlgmr.msra.gmra.mrb[42].mxu1 %vm726_vm2, %v4558_v29  ;;  %6170 = vmatprep.subr.bf16.mxu1 %v6169_v13  ;;  %v4828_v29 = vld [vmem:[#allocation16 + $0xe8] sm:$0xff] }
0x1625   :  { %6172 = vmatpush3.bf16.msra.mxu1 %v6169_v13 }
0x1626   :  { %6174 = vmatprep.subr.bf16.mxu1 %v6173_v16 }
0x1629   :  { %6176 = vmatpush3.bf16.msra.mxu1 %v6173_v16 }
0x162a   :  { %6178 = vmatprep.subr.bf16.mxu1 %v6177_v17 }
0x162d   :  { %6180 = vmatpush3.bf16.msra.mxu1 %v6177_v17 }
0x162e   :  { %6182 = vmatprep.subr.bf16.mxu1 %v6181_v21 }
0x1631   :  { %6184 = vmatpush3.bf16.msra.mxu1 %v6181_v21 }
0x1632   :  { %6186 = vmatprep.subr.bf16.mxu1 %v6185_v26 }
0x1635   :  { %6188 = vmatpush3.bf16.msra.mxu1 %v6185_v26 }
0x1636   :  { %6190 = vmatprep.subr.bf16.mxu1 %v6189_v28 }
0x1639   :  { %6192 = vmatpush3.bf16.msra.mxu1 %v6189_v28 }
0x16f7   :  { %v5964_v22 = vpop.f32.mrb[42].mxu1 }
0x16f8   :  { %v4643_v45 = vadd.f32 %v5964_v22, %v4444_v4  ;;  %v4633_v42 = vpop.f32.mrb[43].mxu1  ;;  %v6193_v22 = vpack.c.bf16 %v4828_v29, %v4827_v50 }
0x16f9   :  { %v4642_v31 = vadd.f32 %v4633_v42, %v4439_v3 }
0x16fa   :  { %v4653_v32 = vadd.f32 %v5466_v30, %v4643_v45  ;;  %v4830_v45 = vld [vmem:[#allocation16 + $0xf8] sm:$0xff]  ;;  %6194 = vmatprep.subr.bf16.mxu1 %v6193_v22 }
0x16fb   :  { %v4652_v33 = vadd.f32 %v5466_v30, %v4642_v31  ;;  %v4829_v30 = vld [vmem:[#allocation16 + $0xf0] sm:$0xff]  ;;  %6196 = vmatpush3.bf16.msra.mxu1 %v6193_v22 }
0x16fc   :  { %v4655_v34 = vadd.f32 %v4653_v32, %v7820_v5  ;;  %v6197_v42 = vpack.c.bf16 %v4830_v45, %v4829_v30  ;;  %v4915_v31 = vld [vmem:[#allocation25 + $0x20] sm:$0xff]  ;;  %v4916_v32 = vld [vmem:[#allocation25 + $0x28] sm:$0xff]  ;;  %v5478_v45 = vld [vmem:[#allocation29 + $0x1] ss:$0 sm:$0xff] }
0x16fd   :  { %v4654_v35 = vadd.f32 %v4652_v33, %v7815_v2  ;;  %v4703_v2 = vld [vmem:[#allocation13 + $0x20] sm:$0xff]  ;;  %v6201_v33 = vpack.c.bf16 %v4916_v32, %v4915_v31 }
0x16fe   :  { %v4663_v36 = vsel %vm471_vm0, %v4655_v34, 0.0  ;;  %v6161_v53 = vpack.c.bf16 %v4704_v52, %v4703_v2  ;;  %6198 = vmatprep.subr.bf16.mxu1 %v6197_v42 }
0x16ff   :  { %4664 = vadd.xlane.f32.xlu1 %v4663_v36  ;;  %v4660_v37 = vsel %vm471_vm0, %v4654_v35, 0.0  ;;  %6200 = vmatpush3.bf16.msra.mxu1 %v6197_v42 }
0x1700   :  { %4661 = vadd.xlane.f32.xlu0 %v4660_v37  ;;  %6162 = vmatprep.subr.bf16.mxu0 %v6161_v53 }
0x1701   :  { %6164 = vmatpush3.bf16.msra.mxu0 %v6161_v53 }
0x1702   :  { %6166 = vmatprep.subr.bf16.mxu0 %v6165_v57 }
0x1705   :  { %6168 = vmatpush3.bf16.msra.mxu0 %v6165_v57 }
0x1706   :  { %6202 = vmatprep.subr.bf16.mxu0 %v6201_v33 }
0x178c   :  { %v4665_v38 = vpop.xlane.xlu1 %4664 }
0x178d   :  { %v4667_v39 = vmul.f32 0.03125, %v4665_v38  ;;  %v4662_v40 = vpop.xlane.xlu0 %4661 }
0x178e   :  { %v4666_v41 = vmul.f32 0.03125, %v4662_v40 }
0x178f   :  { %v4669_v43 = vsub.f32 %v4655_v34, %v4667_v39  ;;  %v5469_v34 = vld [vmem:[#allocation14 + $0x1] ss:$0 sm:$0xff] }
0x1790   :  { %v4668_v46 = vsub.f32 %v4654_v35, %v4666_v41 }
0x1791   :  { %v4671_v49 = vmul.f32 %v4669_v43, %v4669_v43 }
0x1792   :  { %v4670_v47 = vmul.f32 %v4668_v46, %v4668_v46 }
0x1793   :  { %v4675_v5 = vsel %vm471_vm0, %v4671_v49, 0.0 }
0x1794   :  { %v4672_v48 = vsel %vm471_vm0, %v4670_v47, 0.0 }
0x1795   :  { %4673 = vadd.xlane.f32.xlu0 %v4672_v48 }
0x1799   :  { %4676 = vadd.xlane.f32.xlu0 %v4675_v5 }
0x1822   :  { %v4674_v56 = vpop.xlane.xlu0 %4673 }
0x1823   :  { %v4678_v58 = vmul.f32 0.03125, %v4674_v56 }
0x1825   :  { %v4680_v59 = vadd.f32 1e-05, %v4678_v58 }
0x1826   :  { %v4677_v60 = vpop.xlane.xlu0 %4676 }
0x1827   :  { %6350 = vrsqrt.f32 %v4680_v59  ;;  %v4679_v61 = vmul.f32 0.03125, %v4677_v60  ;;  %v4917_v60 = vld [vmem:[#allocation25 + $0x30] sm:$0xff] }
0x1829   :  { %v4681_v62 = vadd.f32 1e-05, %v4679_v61  ;;  %v4918_v61 = vld [vmem:[#allocation25 + $0x38] sm:$0xff] }
0x182b   :  { %6352 = vrsqrt.f32 %v4681_v62  ;;  %v6205_v62 = vpack.c.bf16 %v4918_v61, %v4917_v60 }
0x1831   :  { %v6351_v63 = vpop.eup %6350 }
0x1832   :  { %v4684_v51 = vmul.f32 %v6351_v63, %v4668_v46  ;;  %v5472_v63 = vld [vmem:[#allocation17 + $0x1] ss:$0 sm:$0xff] }
0x1834   :  { %v4692_v3 = vmul.f32 %v5467_v1, %v4684_v51 }
0x1835   :  { %v6353_v4 = vpop.eup %6352 }
0x1836   :  { %v4685_v6 = vmul.f32 %v6353_v4, %v4669_v43  ;;  %v7977_v7 = vadd.f32 %v5468_v44, %v4692_v3  ;;  %v5027_v4 = vld [vmem:[#allocation28 + $0x8] sm:$0xff] }
0x1838   :  { %v4693_v8 = vmul.f32 %v5467_v1, %v4685_v6  ;;  %5973 = vmatprep.mubr.msk.f32.mxu0 %vm471_vm0, %v7977_v7  ;;  %v5473_v6 = vld [vmem:[#allocation26 + $0x1] ss:$0 sm:$0xff] }
0x183a   :  { %v7981_v9 = vadd.f32 %v5468_v44, %v4693_v8 }
0x183c   :  { %5974 = vmatmul.mubr.msk.f32.vlgmr.msra.gmra.mrb[52].mxu0 %vm471_vm0, %v7981_v9 }
0x183d   :  { %6204 = vmatpush3.bf16.msra.mxu0 %v6201_v33 }
0x183e   :  { %6206 = vmatprep.subr.bf16.mxu0 %v6205_v62 }
0x1841   :  { %6208 = vmatpush3.bf16.msra.mxu0 %v6205_v62 }
0x1842   :  { %6022 = vmatprep.subr.mxu0 %v5027_v4 }
0x190f   :  { %v5975_v35 = vpop.f32.mrb[52].mxu0 }
0x1910   :  { %v4793_v36 = vadd.f32 %v5975_v35, %v5469_v34  ;;  %v4787_v37 = vpop.f32.mrb[53].mxu0 }
0x1911   :  { %v4788_v38 = vadd.f32 %v5469_v34, %v4787_v37 }
0x1912   :  { %v4797_v39 = vmul.f32 %v4793_v36, %v4793_v36 }
0x1913   :  { %v4796_v40 = vmul.f32 %v4788_v38, %v4788_v38 }
0x1914   :  { %v4799_v41 = vmul.f32 %v4797_v39, %v4793_v36 }
0x1915   :  { %v4798_v43 = vmul.f32 %v4796_v40, %v4788_v38 }
0x1916   :  { %v4801_v46 = vmul.f32 0.044715, %v4799_v41 }
0x1917   :  { %v4800_v47 = vmul.f32 0.044715, %v4798_v43 }
0x1918   :  { %v4803_v48 = vadd.f32 %v4801_v46, %v4793_v36 }
0x1919   :  { %v4802_v49 = vadd.f32 %v4800_v47, %v4788_v38 }
0x191a   :  { %v4805_v5 = vmul.f32 0.7978846, %v4803_v48 }
0x191b   :  { %v4804_v2 = vmul.f32 0.7978846, %v4802_v49 }
0x191c   :  { %6354 = vtanh.f32 %v4805_v5 }
0x191d   :  { %6356 = vtanh.f32 %v4804_v2  ;;  %v5170_v2 = vld [vmem:[#allocation37 + $0x8] sm:$0xff] }
0x1926   :  { %v6355_v52 = vpop.eup %6354 }
0x1927   :  { %v6357_v53 = vpop.eup %6356  ;;  %v4809_v54 = vadd.f32 1.0, %v6355_v52 }
0x1928   :  { %v4808_v55 = vadd.f32 1.0, %v6357_v53  ;;  %v5171_v53 = vld [vmem:[#allocation37 + $0x10] sm:$0xff] }
0x1929   :  { %v4811_v57 = vmul.f32 0.5, %v4809_v54  ;;  %v5172_v54 = vld [vmem:[#allocation37 + $0x18] sm:$0xff] }
0x192a   :  { %v4810_v56 = vmul.f32 0.5, %v4808_v55  ;;  %v7039_v55 = vmov 0.0|0.0  }
0x192b   :  { %v4813_v59 = vmul.f32 %v4811_v57, %v4793_v36  ;;  %v6213_v57 = vpack.c.bf16 %v5172_v54, %v5171_v53 }
0x192c   :  { %v4812_v58 = vmul.f32 %v4810_v56, %v4788_v38 }
0x192e   :  { %6008 = vmatprep.mubr.f32.mxu1 %v4812_v58 }
0x192f   :  { %6009 = vmatmul.mubr.f32.vlgmr.msra.gmra.mrb[44].mxu1 %v4813_v59 }
0x1a02   :  { %v6010_v1 = vpop.f32.mrb[44].mxu1 }
0x1a03   :  { %v4905_v51 = vpop.f32.mrb[45].mxu1  ;;  %v4911_v3 = vadd.f32 %v6010_v1, %v5472_v63  ;;  %v5479_v1 = vld [vmem:[#allocation34 + $0x1] ss:$0 sm:$0xff] }
0x1a04   :  { %v4906_v44 = vadd.f32 %v5472_v63, %v4905_v51 }
0x1a06   :  { %6019 = vmatprep.mubr.msk.f32.mxu0 %vm471_vm0, %v4906_v44 }
0x1a07   :  { %6020 = vmatmul.mubr.msk.f32.vlgmr.msra.gmra.mrb[54].mxu0 %vm471_vm0, %v4911_v3 }
0x1a08   :  { %6023 = vmatpush3.msra.mxu0 %v5027_v4  ;;  %v5480_v4 = vld [vmem:[#allocation35 + $0x1] ss:$0 sm:$0xff] }
0x1a09   :  { %6209 = vmatprep.subr.bf16.mxu0 %v7039_v55 }
0x1ada   :  { %v6021_v8 = vpop.f32.mrb[54].mxu0 }
0x1adb   :  { %v5005_v10 = vadd.f32 %v6021_v8, %v5473_v6  ;;  %v4999_v11 = vpop.f32.mrb[55].mxu0 }
0x1adc   :  { %v5000_v13 = vadd.f32 %v5473_v6, %v4999_v11 }
0x1add   :  { %v5009_v14 = vmul.f32 %v5005_v10, %v5005_v10 }
0x1ade   :  { %v5008_v15 = vmul.f32 %v5000_v13, %v5000_v13 }
0x1adf   :  { %v5011_v16 = vmul.f32 %v5009_v14, %v5005_v10 }
0x1ae0   :  { %v5010_v23 = vmul.f32 %v5008_v15, %v5000_v13  ;;  %v5258_v15 = vld [vmem:[#allocation40] sm:$0xff] }
0x1ae1   :  { %v5013_v25 = vmul.f32 0.044715, %v5011_v16  ;;  %v5259_v16 = vld [vmem:[#allocation40 + $0x8] sm:$0xff] }
0x1ae2   :  { %v5012_v17 = vmul.f32 0.044715, %v5010_v23  ;;  %v5260_v23 = vld [vmem:[#allocation40 + $0x10] sm:$0xff] }
0x1ae3   :  { %v5015_v18 = vadd.f32 %v5013_v25, %v5005_v10  ;;  %v6216_v25 = vpack.c.bf16 %v5259_v16, %v5258_v15 }
0x1ae4   :  { %v5014_v19 = vadd.f32 %v5012_v17, %v5000_v13  ;;  %v5261_v17 = vld [vmem:[#allocation40 + $0x18] sm:$0xff] }
0x1ae5   :  { %v5017_v21 = vmul.f32 0.7978846, %v5015_v18  ;;  %v6219_v18 = vpack.c.bf16 %v5261_v17, %v5260_v23 }
0x1ae6   :  { %v5016_v24 = vmul.f32 0.7978846, %v5014_v19  ;;  %v5481_v19 = vld [vmem:[#allocation38] ss:$0 sm:$0xff] }
0x1ae7   :  { %6358 = vtanh.f32 %v5017_v21 }
0x1ae8   :  { %6360 = vtanh.f32 %v5016_v24 }
0x1af1   :  { %v6359_v20 = vpop.eup %6358 }
0x1af2   :  { %v6361_v12 = vpop.eup %6360  ;;  %v5021_v26 = vadd.f32 1.0, %v6359_v20 }
0x1af3   :  { %v5020_v27 = vadd.f32 1.0, %v6361_v12 }
0x1af4   :  { %v5023_v28 = vmul.f32 0.5, %v5021_v26  ;;  %v5483_v26 = vld [vmem:[#allocation41] ss:$0 sm:$0xff] }
0x1af5   :  { %v5022_v50 = vmul.f32 0.5, %v5020_v27 }
0x1af6   :  { %v5025_v22 = vmul.f32 %v5023_v28, %v5005_v10 }
0x1af7   :  { %v5024_v29 = vmul.f32 %v5022_v50, %v5000_v13 }
0x1af9   :  { %6024 = vmatprep.mubr.msk.f32.mxu0 %vm726_vm2, %v5024_v29 }
0x1afa   :  { %6025 = vmatmul.mubr.msk.f32.vlgmr.msra.gmra.mrb[56].mxu0 %vm726_vm2, %v5025_v22 }
0x1afb   :  { %6035 = vmatprep.mubr.msk.f32.mxu0 %vm7035_vm1, %v7034_v0 }
0x1bcd   :  { %v6026_v30 = vpop.f32.mrb[56].mxu0 }
0x1bce   :  { %v5110_v42 = vadd.f32 %v6026_v30, %v4911_v3  ;;  %v5100_v31 = vpop.f32.mrb[57].mxu0 }
0x1bcf   :  { %v5109_v32 = vadd.f32 %v5100_v31, %v4906_v44 }
0x1bd0   :  { %v5120_v33 = vadd.f32 %v5478_v45, %v5110_v42 }
0x1bd1   :  { %v5119_v34 = vadd.f32 %v5478_v45, %v5109_v32 }
0x1bd2   :  { %v5122_v35 = vadd.f32 %v5120_v33, %v7981_v9 }
0x1bd3   :  { %v5121_v36 = vadd.f32 %v5119_v34, %v7977_v7  ;;  %v5169_v7 = vld [vmem:[#allocation37] sm:$0xff] }
0x1bd4   :  { %v5130_v37 = vsel %vm471_vm0, %v5122_v35, 0.0  ;;  %v6210_v52 = vpack.c.bf16 %v5170_v2, %v5169_v7 }
0x1bd5   :  { %5131 = vadd.xlane.f32.xlu1 %v5130_v37  ;;  %v5127_v38 = vsel %vm471_vm0, %v5121_v36, 0.0 }
0x1bd6   :  { %5128 = vadd.xlane.f32.xlu0 %v5127_v38  ;;  %6211 = vmatpush3.bf16.msra.mxu0 %v6210_v52 }
0x1bd7   :  { %6212 = vmatprep.subr.bf16.mxu0 %v7039_v55 }
0x1bda   :  { %6214 = vmatpush3.bf16.msra.mxu0 %v6213_v57 }
0x1bdb   :  { %6215 = vmatprep.subr.bf16.mxu0 %v7039_v55 }
0x1c62   :  { %v5132_v39 = vpop.xlane.xlu1 %5131 }
0x1c63   :  { %v5134_v40 = vmul.f32 0.03125, %v5132_v39  ;;  %v5129_v41 = vpop.xlane.xlu0 %5128 }
0x1c64   :  { %v5133_v43 = vmul.f32 0.03125, %v5129_v41 }
0x1c65   :  { %v5136_v46 = vsub.f32 %v5122_v35, %v5134_v40 }
0x1c66   :  { %v5135_v47 = vsub.f32 %v5121_v36, %v5133_v43 }
0x1c67   :  { %v5138_v48 = vmul.f32 %v5136_v46, %v5136_v46 }
0x1c68   :  { %v5137_v49 = vmul.f32 %v5135_v47, %v5135_v47 }
0x1c69   :  { %v5142_v5 = vsel %vm471_vm0, %v5138_v48, 0.0 }
0x1c6a   :  { %5143 = vadd.xlane.f32.xlu1 %v5142_v5  ;;  %v5139_v9 = vsel %vm471_vm0, %v5137_v49, 0.0 }
0x1c6b   :  { %5140 = vadd.xlane.f32.xlu0 %v5139_v9 }
0x1cf7   :  { %v5144_v56 = vpop.xlane.xlu1 %5143 }
0x1cf8   :  { %v5146_v58 = vmul.f32 0.03125, %v5144_v56  ;;  %v5141_v59 = vpop.xlane.xlu0 %5140 }
0x1cf9   :  { %v5145_v60 = vmul.f32 0.03125, %v5141_v59 }
0x1cfa   :  { %v5148_v61 = vadd.f32 1e-05, %v5146_v58 }
0x1cfb   :  { %v5147_v62 = vadd.f32 1e-05, %v5145_v60 }
0x1cfc   :  { %6362 = vrsqrt.f32 %v5148_v61 }
0x1cfd   :  { %6364 = vrsqrt.f32 %v5147_v62 }
0x1d06   :  { %v6363_v63 = vpop.eup %6362 }
0x1d07   :  { %v6365_v51 = vpop.eup %6364  ;;  %v5152_v44 = vmul.f32 %v6363_v63, %v5136_v46 }
0x1d08   :  { %v5151_v3 = vmul.f32 %v6365_v51, %v5135_v47 }
0x1d09   :  { %v5160_v6 = vmul.f32 %v5479_v1, %v5152_v44 }
0x1d0a   :  { %v5159_v8 = vmul.f32 %v5479_v1, %v5151_v3 }
0x1d0b   :  { %v5168_v10 = vadd.f32 %v5480_v4, %v5160_v6 }
0x1d0c   :  { %v5167_v11 = vadd.f32 %v5480_v4, %v5159_v8 }
0x1d0d   :  { %v5182_v13 = vrot.slane %v5168_v10, 7 }
0x1d0f   :  { %v5184_v14 = vsel %vm5183_vm5, %v5182_v13, %v5167_v11 }
0x1d10   :  { %6036 = vmatmul.mubr.msk.f32.vlgmr.msra.gmra.mrb[58].mxu0 %vm471_vm0, %v5184_v14 }
0x1d11   :  { %6046 = vmatprep.mubr.msk.f32.mxu0 %vm7035_vm1, %v7034_v0  ;;  %6217 = vmatpush3.bf16.msra.mxu0 %v6216_v25 }
0x1d12   :  { %6218 = vmatprep.subr.bf16.mxu0 %v7039_v55 }
0x1d15   :  { %6220 = vmatpush3.bf16.msra.mxu0 %v6219_v18 }
0x1de3   :  { %v5253_v21 = vpop.f32.mrb[58].mxu0 }
0x1de4   :  { %v5254_v24 = vadd.f32 %v5481_v19, %v5253_v21  ;;  %v6037_v20 = vpop.f32.mrb[59].mxu0 }
0x1de6   :  { %6366 = vtanh.f32 %v5254_v24 }
0x1df0   :  { %v6367_v12 = vpop.eup %6366 }
0x1df1   :  { %6047 = vmatmul.mubr.msk.f32.vlgmr.msra.gmra.mrb[60].mxu0 %vm471_vm0, %v6367_v12 }
0x1ec4   :  { %v5338_v0 = vpop.f32.mrb[60].mxu0 }
0x1ec5   :  { %v5339_v27 = vadd.f32 %v5483_v26, %v5338_v0  ;;  %v6048_v28 = vpop.f32.mrb[61].mxu0 }
0x1ec7   :  { %5342 = vst [vmem:[#allocation43] sm:$0x3] %v5339_v27 }
0x1ec8   :  { %6959 = shalt.err (!%p6956_p2)
}
0x1ec9   :  { %s8087_s2 = sld [smem:[#allocation72_spill]] }
0x1ecf   :  { %s6960_s27 = scalar_lea.hbm %s8087_s2, 32 }
0x1ed0   :  { %p6961_p3 = scmp.ne.s32.totalorder %s8087_s2, %s6960_s27  ;;  %p6964_p4 = scmp.lt.u32.totalorder %s6960_s27, %s8087_s2 }
0x1ed2   :  { %p6966_p5 = pnand %p6964_p4, %p6961_p3 }
0x1ed4   :  { %6969 = shalt.err (!%p6966_p5)
}
0x1ed5   :  { %5352 = dma.vmem_to_hbm [thread:$0]  %s5350_s7, 32, %s8087_s2, [#allocation4]  }
0x1ed6   :  { %6998 = dma.done.wait [#allocation4], 32  }
0x1ed7   :  { %6999 = vsyncadd [#allocation4], 4294967264 }
0x1ed8   :  { %5356 = vsyncpa [#allocation3], 1 }
0x1ed9   :  { %5357 = vsyncpa [#allocation6], 1 }
0x1eda   :  { %5358 = vsyncpa [#allocation9], 1 }
0x1edb   :  { %5359 = vsyncpa [#allocation12], 1 }
0x1edc   :  { %5360 = vsyncpa [#allocation15], 1 }
0x1edd   :  { %5361 = vsyncpa [#allocation18], 1 }
0x1ede   :  { %5362 = vsyncpa [#allocation21], 1 }
0x1edf   :  { %5363 = vsyncpa [#allocation24], 1 }
0x1ee0   :  { %5364 = vsyncpa [#allocation27], 1 }
0x1ee1   :  { %5365 = vsyncpa [#allocation30], 1 }
0x1ee2   :  { %5366 = vsyncpa [#allocation33], 1 }
0x1ee3   :  { %5367 = vsyncpa [#allocation36], 1 }
0x1ee4   :  { %5368 = vsyncpa [#allocation39], 1 }
0x1ee5   :  { %5369 = vsyncpa [#allocation42], 1 }
0x1ee6   :  { %5370 = vsyncpa [#allocation4], 1 }

</bundles_post_ra>
